<compile_context>
chip_gen: v5e
topology: v5e:2x2
jax: 0.10.0
libtpu: 0.0.40
codegen_flags: <defaults>
</compile_context>

<pallas_src>
import functools

import jax
import jax.numpy as jnp
from jax.experimental import pallas as pl
from jax.experimental.pallas import tpu as pltpu


def _transformer_conv(x, adj, w, b, *, heads, ch, apply_relu, exact_recip):
    """One PyG-style TransformerConv layer (concat=True, root_weight=True, eval mode).

    x   : [N, Fin]             f32 activations.
    adj : [N, N]               f32 {0,1} mask, adj[dst, src] = 1 iff edge src -> dst.
    w   : [Fin, 4*heads*ch]    bf16 fused (Wq | Wk | Wv | Wskip), 1/sqrt(ch) folded into Wq.
    b   : [1, 4*heads*ch]      f32 fused bias (same layout, scale folded into bq).
    """
    n = x.shape[0]
    hc = heads * ch

    # Single wide MXU matmul for q|k|v|skip (bf16 operands, f32 accumulation).
    proj = jnp.dot(x.astype(jnp.bfloat16), w,
                   preferred_element_type=jnp.float32) + b            # [N, 4*hc] f32
    q = proj[:, 0 * hc:1 * hc]
    k = proj[:, 1 * hc:2 * hc]
    v = proj[:, 2 * hc:3 * hc]
    skip = proj[:, 3 * hc:4 * hc]

    # Batched-head layout: [N, H*C] -> [H, N, C]  (one relayout per tensor instead of
    # H sub-128-lane slices + a lane concat).
    qh = q.reshape(n, heads, ch).transpose(1, 0, 2).astype(jnp.bfloat16)
    kh = k.reshape(n, heads, ch).transpose(1, 0, 2).astype(jnp.bfloat16)
    vh = v.reshape(n, heads, ch).transpose(1, 0, 2).astype(jnp.bfloat16)

    # Scores for all heads at once: s[h,i,j] = <q_i, k_j>/sqrt(C) (scale already in Wq).
    s = jnp.einsum('hic,hjc->hij', qh, kh,
                   preferred_element_type=jnp.float32)                 # [H, N, N]

    # Single-pass masked softmax over incoming edges j of each destination i:
    # m = max over ALL j upper-bounds the masked max (shift cancels in the ratio),
    # `* adj` zeroes non-edges.  Isolated dst rows -> all-zero p row -> agg == 0.
    m = jnp.max(s, axis=2, keepdims=True)                              # [H, N, 1]
    p = jnp.exp(s - m) * adj[None, :, :]                               # [H, N, N]
    denom = jnp.sum(p, axis=2, keepdims=True)                          # [H, N, 1]
    denom = jnp.where(denom > 0.0, denom, 1.0)                         # keep recip finite
    inv = pl.reciprocal(denom, approx=not exact_recip)

    # Aggregate first, normalize after (scales [H,N,C] instead of dividing [H,N,N]).
    agg = jnp.einsum('hij,hjc->hic', p.astype(jnp.bfloat16), vh,
                     preferred_element_type=jnp.float32) * inv         # [H, N, C]

    # [H, N, C] -> [N, H*C]; epilogue once on the full-width slab.
    out = agg.transpose(1, 0, 2).reshape(n, hc) + skip
    if apply_relu:
        out = jnp.maximum(out, 0.0)
    return out


def _gnn_encoder_kernel(x_ref, adj_ref, w1_ref, b1_ref, w2_ref, b2_ref,
                        w3_ref, b3_ref, o_ref, *, hidden, out):
    x = x_ref[...]                   # [N, Fin]  f32
    adj = adj_ref[...]               # [N, N]    f32, adj[i, j] = 1.0 iff edge j -> i

    h = _transformer_conv(x, adj, w1_ref[...], b1_ref[...],
                          heads=7, ch=hidden, apply_relu=True, exact_recip=False)
    h = _transformer_conv(h, adj, w2_ref[...], b2_ref[...],
                          heads=4, ch=hidden, apply_relu=True, exact_recip=False)
    y = _transformer_conv(h, adj, w3_ref[...], b3_ref[...],
                          heads=1, ch=out, apply_relu=False, exact_recip=True)

    # Lane-dense writeback: pad the OUT(=8)-wide result up to the 128-lane output slab
    # in-register so the store is an unmasked vst; the wrapper slices the padding off.
    pad = o_ref.shape[1] - y.shape[1]
    if pad:
        y = jnp.concatenate([y, jnp.zeros((y.shape[0], pad), y.dtype)], axis=-1)
    o_ref[...] = y


def gnn_encoder_forward(x, adj, params1, params2, params3, *, hidden, out):
    """Fused forward: a single pallas_call runs all three layers; activations stay in VMEM."""
    n = x.shape[0]
    n_pad = 8 * pl.cdiv(n, 8)           # sublane multiple
    out_pad = 128 * pl.cdiv(out, 128)   # lane-dense output slab
    if n_pad != n:
        x = jnp.pad(x, ((0, n_pad - n), (0, 0)))
        adj = jnp.pad(adj, ((0, n_pad - n), (0, n_pad - n)))   # padded nodes have no edges

    kernel = functools.partial(_gnn_encoder_kernel, hidden=hidden, out=out)
    args = (x, adj) + tuple(params1) + tuple(params2) + tuple(params3)
    y_pad = pl.pallas_call(
        kernel,
        out_shape=jax.ShapeDtypeStruct((n_pad, out_pad), jnp.float32),
        in_specs=[pl.BlockSpec(memory_space=pltpu.MemorySpace.VMEM)] * len(args),
        out_specs=pl.BlockSpec(memory_space=pltpu.MemorySpace.VMEM),
    )(*args)
    return y_pad[:n, :out]


def fuse_transformer_conv_params(wq, bq, wk, bk, wv, bv, wskip, bskip, *, ch):
    """Fuse PyG-style per-projection weights into one wide bf16 weight + f32 bias row.

    Output layout along the last axis: [ Wq | Wk | Wv | Wskip ].  The 1/sqrt(ch)
    attention scale is folded into the Wq / bq block so the kernel never scales the
    score matrix.
    """
    scale = 1.0 / (float(ch) ** 0.5)
    w = jnp.concatenate([wq * scale, wk, wv, wskip], axis=1).astype(jnp.bfloat16)
    b = jnp.concatenate([bq * scale, bk, bv, bskip],
                        axis=0).reshape(1, -1).astype(jnp.float32)
    return (w, b)


def init_layer_params(key, fin, heads, ch):
    """Deterministic glorot-ish init of per-projection weights, then fuse (scale folded)."""
    hc = heads * ch
    kq, kk, kv, ks = jax.random.split(key, 4)
    s = (2.0 / (fin + hc)) ** 0.5
    wq = s * jax.random.normal(kq, (fin, hc), dtype=jnp.float32)
    wk = s * jax.random.normal(kk, (fin, hc), dtype=jnp.float32)
    wv = s * jax.random.normal(kv, (fin, hc), dtype=jnp.float32)
    wskip = s * jax.random.normal(ks, (fin, hc), dtype=jnp.float32)
    zb = jnp.zeros((hc,), dtype=jnp.float32)
    return fuse_transformer_conv_params(wq, zb, wk, zb, wv, zb, wskip, zb, ch=ch)


if __name__ == "__main__":
    N = 16            # number of nodes
    F_IN = 8          # input feature dim
    HIDDEN = 8        # hidden_channels
    OUT = 8           # out_channels
    E = 40            # number of (unique) edges

    key = jax.random.PRNGKey(0)
    k_x, k_e, k_p1, k_p2, k_p3 = jax.random.split(key, 5)

    # Node features.
    x = jax.random.normal(k_x, (N, F_IN), dtype=jnp.float32)

    # Unique random edges; edge_index[0] = source, edge_index[1] = target.
    flat = jax.random.choice(k_e, N * N, shape=(E,), replace=False)
    src = flat // N
    dst = flat % N
    edge_index = jnp.stack([src, dst], axis=0).astype(jnp.int32)   # [2, E]

    # Dense adjacency mask: adj[dst, src] = 1.0 (glue, outside the kernel).
    adj = jnp.zeros((N, N), dtype=jnp.float32).at[edge_index[1], edge_index[0]].set(1.0)

    # Deterministic parameter init matching TransformerConv shapes (fused Wq|Wk|Wv|Wskip,
    # attention scale folded into the Wq block).
    params1 = init_layer_params(k_p1, F_IN, 7, HIDDEN)          # layer 1 -> [N, 7*HIDDEN]
    params2 = init_layer_params(k_p2, 7 * HIDDEN, 4, HIDDEN)    # layer 2 -> [N, 4*HIDDEN]
    params3 = init_layer_params(k_p3, 4 * HIDDEN, 1, OUT)       # layer 3 -> [N, OUT]

    y = gnn_encoder_forward(x, adj, params1, params2, params3, hidden=HIDDEN, out=OUT)
    y = jax.block_until_ready(y)
    assert y.shape == (N, OUT), y.shape
    assert bool(jnp.all(jnp.isfinite(y)))
    print("KERNEL_OK")
</pallas_src>

<mosaic_0001>
module attributes {stable_mosaic.version = 11 : i64} {
  func.func @_gnn_encoder_kernel(%arg0: memref<16x8xf32, #tpu.memory_space<vmem>>, %arg1: memref<16x16xf32, #tpu.memory_space<vmem>>, %arg2: memref<8x224xbf16, #tpu.memory_space<vmem>>, %arg3: memref<1x224xf32, #tpu.memory_space<vmem>>, %arg4: memref<56x128xbf16, #tpu.memory_space<vmem>>, %arg5: memref<1x128xf32, #tpu.memory_space<vmem>>, %arg6: memref<32x32xbf16, #tpu.memory_space<vmem>>, %arg7: memref<1x32xf32, #tpu.memory_space<vmem>>, %arg8: memref<16x128xf32, #tpu.memory_space<vmem>>) attributes {dimension_semantics = [], scalar_prefetch = 0 : i64, scratch_operands = 0 : i64, tpu.core_type = #tpu.core_type<tc>} {
    %c0 = arith.constant 0 : index
    %c0_0 = arith.constant 0 : index
    %0 = vector.load %arg0[%c0, %c0_0] : memref<16x8xf32, #tpu.memory_space<vmem>>, vector<16x8xf32>
    %c0_1 = arith.constant 0 : index
    %c0_2 = arith.constant 0 : index
    %1 = vector.load %arg1[%c0_1, %c0_2] : memref<16x16xf32, #tpu.memory_space<vmem>>, vector<16x16xf32>
    %c0_3 = arith.constant 0 : index
    %c0_4 = arith.constant 0 : index
    %2 = vector.load %arg2[%c0_3, %c0_4] : memref<8x224xbf16, #tpu.memory_space<vmem>>, vector<8x224xbf16>
    %c0_5 = arith.constant 0 : index
    %c0_6 = arith.constant 0 : index
    %3 = vector.load %arg3[%c0_5, %c0_6] : memref<1x224xf32, #tpu.memory_space<vmem>>, vector<1x224xf32>
    %4 = arith.truncf %0 : vector<16x8xf32> to vector<16x8xbf16>
    %cst = arith.constant dense<0.000000e+00> : vector<16x224xf32>
    %5 = tpu.matmul %4, %2, %cst {dimension_numbers = #tpu.dot_dimension_numbers<[1], [0], [0], [1], [0, 0, 1, 1], [], []>} : vector<16x8xbf16>, vector<8x224xbf16>, vector<16x224xf32> -> vector<16x224xf32>
    %6 = vector.broadcast %3 : vector<1x224xf32> to vector<16x224xf32>
    %7 = arith.addf %5, %6 : vector<16x224xf32>
    %8 = vector.extract_strided_slice %7 {offsets = [0, 0], sizes = [16, 56], strides = [1, 1]} : vector<16x224xf32> to vector<16x56xf32>
    %9 = vector.extract_strided_slice %7 {offsets = [0, 56], sizes = [16, 56], strides = [1, 1]} : vector<16x224xf32> to vector<16x56xf32>
    %10 = vector.extract_strided_slice %7 {offsets = [0, 112], sizes = [16, 56], strides = [1, 1]} : vector<16x224xf32> to vector<16x56xf32>
    %11 = vector.extract_strided_slice %7 {offsets = [0, 168], sizes = [16, 56], strides = [1, 1]} : vector<16x224xf32> to vector<16x56xf32>
    %12 = vector.shape_cast %8 : vector<16x56xf32> to vector<16x7x8xf32>
    %13 = tpu.transpose %12, [1, 0, 2] : vector<16x7x8xf32> -> vector<7x16x8xf32>
    %14 = arith.truncf %13 : vector<7x16x8xf32> to vector<7x16x8xbf16>
    %15 = vector.shape_cast %9 : vector<16x56xf32> to vector<16x7x8xf32>
    %16 = tpu.transpose %15, [1, 0, 2] : vector<16x7x8xf32> -> vector<7x16x8xf32>
    %17 = arith.truncf %16 : vector<7x16x8xf32> to vector<7x16x8xbf16>
    %18 = vector.shape_cast %10 : vector<16x56xf32> to vector<16x7x8xf32>
    %19 = tpu.transpose %18, [1, 0, 2] : vector<16x7x8xf32> -> vector<7x16x8xf32>
    %20 = arith.truncf %19 : vector<7x16x8xf32> to vector<7x16x8xbf16>
    "tpu.trace_start"() <{level = 10 : i32, message = "hic,hjc->hij"}> : () -> ()
    %cst_7 = arith.constant dense<0.000000e+00> : vector<7x16x16xf32>
    %21 = tpu.matmul %14, %17, %cst_7 {dimension_numbers = #tpu.dot_dimension_numbers<[2], [2], [1], [1], [0, 0, 0, 1, 1, 1], [0], [0]>} : vector<7x16x8xbf16>, vector<7x16x8xbf16>, vector<7x16x16xf32> -> vector<7x16x16xf32>
    "tpu.trace_stop"() : () -> ()
    %cst_8 = arith.constant dense<0xFF800000> : vector<7x16xf32>
    %22 = vector.multi_reduction <maximumf>, %21, %cst_8 [2] : vector<7x16x16xf32> to vector<7x16xf32>
    %23 = vector.shape_cast %22 : vector<7x16xf32> to vector<7x16x1xf32>
    %24 = vector.broadcast %23 : vector<7x16x1xf32> to vector<7x16x16xf32>
    %25 = arith.subf %21, %24 : vector<7x16x16xf32>
    %26 = math.exp %25 : vector<7x16x16xf32>
    %27 = vector.shape_cast %1 : vector<16x16xf32> to vector<1x16x16xf32>
    %28 = vector.broadcast %27 : vector<1x16x16xf32> to vector<7x16x16xf32>
    %29 = arith.mulf %26, %28 : vector<7x16x16xf32>
    %cst_9 = arith.constant dense<0.000000e+00> : vector<7x16xf32>
    %30 = vector.multi_reduction <add>, %29, %cst_9 [2] : vector<7x16x16xf32> to vector<7x16xf32>
    %31 = vector.shape_cast %30 : vector<7x16xf32> to vector<7x16x1xf32>
    %cst_10 = arith.constant 0.000000e+00 : f32
    %32 = vector.broadcast %cst_10 : f32 to vector<7x16x1xf32>
    %33 = arith.cmpf ogt, %31, %32 : vector<7x16x1xf32>
    %cst_11 = arith.constant 1.000000e+00 : f32
    %34 = vector.broadcast %cst_11 : f32 to vector<7x16x1xf32>
    %35 = arith.select %33, %31, %34 : vector<7x16x1xi1>, vector<7x16x1xf32>
    %36 = tpu.reciprocal %35 {approx = true} : vector<7x16x1xf32> -> vector<7x16x1xf32>
    %37 = arith.truncf %29 : vector<7x16x16xf32> to vector<7x16x16xbf16>
    "tpu.trace_start"() <{level = 10 : i32, message = "hij,hjc->hic"}> : () -> ()
    %cst_12 = arith.constant dense<0.000000e+00> : vector<7x16x8xf32>
    %38 = tpu.matmul %37, %20, %cst_12 {dimension_numbers = #tpu.dot_dimension_numbers<[2], [1], [1], [2], [0, 0, 0, 1, 1, 2], [0], [0]>} : vector<7x16x16xbf16>, vector<7x16x8xbf16>, vector<7x16x8xf32> -> vector<7x16x8xf32>
    "tpu.trace_stop"() : () -> ()
    %39 = vector.broadcast %36 : vector<7x16x1xf32> to vector<7x16x8xf32>
    %40 = arith.mulf %38, %39 : vector<7x16x8xf32>
    %41 = tpu.transpose %40, [1, 0, 2] : vector<7x16x8xf32> -> vector<16x7x8xf32>
    %42 = vector.shape_cast %41 : vector<16x7x8xf32> to vector<16x56xf32>
    %43 = arith.addf %42, %11 : vector<16x56xf32>
    %cst_13 = arith.constant 0.000000e+00 : f32
    %44 = vector.broadcast %cst_13 : f32 to vector<16x56xf32>
    %45 = arith.maximumf %43, %44 : vector<16x56xf32>
    %c0_14 = arith.constant 0 : index
    %c0_15 = arith.constant 0 : index
    %46 = vector.load %arg4[%c0_14, %c0_15] : memref<56x128xbf16, #tpu.memory_space<vmem>>, vector<56x128xbf16>
    %c0_16 = arith.constant 0 : index
    %c0_17 = arith.constant 0 : index
    %47 = vector.load %arg5[%c0_16, %c0_17] : memref<1x128xf32, #tpu.memory_space<vmem>>, vector<1x128xf32>
    %48 = arith.truncf %45 : vector<16x56xf32> to vector<16x56xbf16>
    %cst_18 = arith.constant dense<0.000000e+00> : vector<16x128xf32>
    %49 = tpu.matmul %48, %46, %cst_18 {dimension_numbers = #tpu.dot_dimension_numbers<[1], [0], [0], [1], [0, 0, 1, 1], [], []>} : vector<16x56xbf16>, vector<56x128xbf16>, vector<16x128xf32> -> vector<16x128xf32>
    %50 = vector.broadcast %47 : vector<1x128xf32> to vector<16x128xf32>
    %51 = arith.addf %49, %50 : vector<16x128xf32>
    %52 = vector.extract_strided_slice %51 {offsets = [0, 0], sizes = [16, 32], strides = [1, 1]} : vector<16x128xf32> to vector<16x32xf32>
    %53 = vector.extract_strided_slice %51 {offsets = [0, 32], sizes = [16, 32], strides = [1, 1]} : vector<16x128xf32> to vector<16x32xf32>
    %54 = vector.extract_strided_slice %51 {offsets = [0, 64], sizes = [16, 32], strides = [1, 1]} : vector<16x128xf32> to vector<16x32xf32>
    %55 = vector.extract_strided_slice %51 {offsets = [0, 96], sizes = [16, 32], strides = [1, 1]} : vector<16x128xf32> to vector<16x32xf32>
    %56 = vector.shape_cast %52 : vector<16x32xf32> to vector<16x4x8xf32>
    %57 = tpu.transpose %56, [1, 0, 2] : vector<16x4x8xf32> -> vector<4x16x8xf32>
    %58 = arith.truncf %57 : vector<4x16x8xf32> to vector<4x16x8xbf16>
    %59 = vector.shape_cast %53 : vector<16x32xf32> to vector<16x4x8xf32>
    %60 = tpu.transpose %59, [1, 0, 2] : vector<16x4x8xf32> -> vector<4x16x8xf32>
    %61 = arith.truncf %60 : vector<4x16x8xf32> to vector<4x16x8xbf16>
    %62 = vector.shape_cast %54 : vector<16x32xf32> to vector<16x4x8xf32>
    %63 = tpu.transpose %62, [1, 0, 2] : vector<16x4x8xf32> -> vector<4x16x8xf32>
    %64 = arith.truncf %63 : vector<4x16x8xf32> to vector<4x16x8xbf16>
    "tpu.trace_start"() <{level = 10 : i32, message = "hic,hjc->hij"}> : () -> ()
    %cst_19 = arith.constant dense<0.000000e+00> : vector<4x16x16xf32>
    %65 = tpu.matmul %58, %61, %cst_19 {dimension_numbers = #tpu.dot_dimension_numbers<[2], [2], [1], [1], [0, 0, 0, 1, 1, 1], [0], [0]>} : vector<4x16x8xbf16>, vector<4x16x8xbf16>, vector<4x16x16xf32> -> vector<4x16x16xf32>
    "tpu.trace_stop"() : () -> ()
    %cst_20 = arith.constant dense<0xFF800000> : vector<4x16xf32>
    %66 = vector.multi_reduction <maximumf>, %65, %cst_20 [2] : vector<4x16x16xf32> to vector<4x16xf32>
    %67 = vector.shape_cast %66 : vector<4x16xf32> to vector<4x16x1xf32>
    %68 = vector.broadcast %67 : vector<4x16x1xf32> to vector<4x16x16xf32>
    %69 = arith.subf %65, %68 : vector<4x16x16xf32>
    %70 = math.exp %69 : vector<4x16x16xf32>
    %71 = vector.shape_cast %1 : vector<16x16xf32> to vector<1x16x16xf32>
    %72 = vector.broadcast %71 : vector<1x16x16xf32> to vector<4x16x16xf32>
    %73 = arith.mulf %70, %72 : vector<4x16x16xf32>
    %cst_21 = arith.constant dense<0.000000e+00> : vector<4x16xf32>
    %74 = vector.multi_reduction <add>, %73, %cst_21 [2] : vector<4x16x16xf32> to vector<4x16xf32>
    %75 = vector.shape_cast %74 : vector<4x16xf32> to vector<4x16x1xf32>
    %cst_22 = arith.constant 0.000000e+00 : f32
    %76 = vector.broadcast %cst_22 : f32 to vector<4x16x1xf32>
    %77 = arith.cmpf ogt, %75, %76 : vector<4x16x1xf32>
    %cst_23 = arith.constant 1.000000e+00 : f32
    %78 = vector.broadcast %cst_23 : f32 to vector<4x16x1xf32>
    %79 = arith.select %77, %75, %78 : vector<4x16x1xi1>, vector<4x16x1xf32>
    %80 = tpu.reciprocal %79 {approx = true} : vector<4x16x1xf32> -> vector<4x16x1xf32>
    %81 = arith.truncf %73 : vector<4x16x16xf32> to vector<4x16x16xbf16>
    "tpu.trace_start"() <{level = 10 : i32, message = "hij,hjc->hic"}> : () -> ()
    %cst_24 = arith.constant dense<0.000000e+00> : vector<4x16x8xf32>
    %82 = tpu.matmul %81, %64, %cst_24 {dimension_numbers = #tpu.dot_dimension_numbers<[2], [1], [1], [2], [0, 0, 0, 1, 1, 2], [0], [0]>} : vector<4x16x16xbf16>, vector<4x16x8xbf16>, vector<4x16x8xf32> -> vector<4x16x8xf32>
    "tpu.trace_stop"() : () -> ()
    %83 = vector.broadcast %80 : vector<4x16x1xf32> to vector<4x16x8xf32>
    %84 = arith.mulf %82, %83 : vector<4x16x8xf32>
    %85 = tpu.transpose %84, [1, 0, 2] : vector<4x16x8xf32> -> vector<16x4x8xf32>
    %86 = vector.shape_cast %85 : vector<16x4x8xf32> to vector<16x32xf32>
    %87 = arith.addf %86, %55 : vector<16x32xf32>
    %cst_25 = arith.constant 0.000000e+00 : f32
    %88 = vector.broadcast %cst_25 : f32 to vector<16x32xf32>
    %89 = arith.maximumf %87, %88 : vector<16x32xf32>
    %c0_26 = arith.constant 0 : index
    %c0_27 = arith.constant 0 : index
    %90 = vector.load %arg6[%c0_26, %c0_27] : memref<32x32xbf16, #tpu.memory_space<vmem>>, vector<32x32xbf16>
    %c0_28 = arith.constant 0 : index
    %c0_29 = arith.constant 0 : index
    %91 = vector.load %arg7[%c0_28, %c0_29] : memref<1x32xf32, #tpu.memory_space<vmem>>, vector<1x32xf32>
    %92 = arith.truncf %89 : vector<16x32xf32> to vector<16x32xbf16>
    %cst_30 = arith.constant dense<0.000000e+00> : vector<16x32xf32>
    %93 = tpu.matmul %92, %90, %cst_30 {dimension_numbers = #tpu.dot_dimension_numbers<[1], [0], [0], [1], [0, 0, 1, 1], [], []>} : vector<16x32xbf16>, vector<32x32xbf16>, vector<16x32xf32> -> vector<16x32xf32>
    %94 = vector.broadcast %91 : vector<1x32xf32> to vector<16x32xf32>
    %95 = arith.addf %93, %94 : vector<16x32xf32>
    %96 = vector.extract_strided_slice %95 {offsets = [0, 0], sizes = [16, 8], strides = [1, 1]} : vector<16x32xf32> to vector<16x8xf32>
    %97 = vector.extract_strided_slice %95 {offsets = [0, 8], sizes = [16, 8], strides = [1, 1]} : vector<16x32xf32> to vector<16x8xf32>
    %98 = vector.extract_strided_slice %95 {offsets = [0, 16], sizes = [16, 8], strides = [1, 1]} : vector<16x32xf32> to vector<16x8xf32>
    %99 = vector.extract_strided_slice %95 {offsets = [0, 24], sizes = [16, 8], strides = [1, 1]} : vector<16x32xf32> to vector<16x8xf32>
    %100 = vector.shape_cast %96 : vector<16x8xf32> to vector<16x1x8xf32>
    %101 = tpu.transpose %100, [1, 0, 2] : vector<16x1x8xf32> -> vector<1x16x8xf32>
    %102 = arith.truncf %101 : vector<1x16x8xf32> to vector<1x16x8xbf16>
    %103 = vector.shape_cast %97 : vector<16x8xf32> to vector<16x1x8xf32>
    %104 = tpu.transpose %103, [1, 0, 2] : vector<16x1x8xf32> -> vector<1x16x8xf32>
    %105 = arith.truncf %104 : vector<1x16x8xf32> to vector<1x16x8xbf16>
    %106 = vector.shape_cast %98 : vector<16x8xf32> to vector<16x1x8xf32>
    %107 = tpu.transpose %106, [1, 0, 2] : vector<16x1x8xf32> -> vector<1x16x8xf32>
    %108 = arith.truncf %107 : vector<1x16x8xf32> to vector<1x16x8xbf16>
    "tpu.trace_start"() <{level = 10 : i32, message = "hic,hjc->hij"}> : () -> ()
    %cst_31 = arith.constant dense<0.000000e+00> : vector<1x16x16xf32>
    %109 = tpu.matmul %102, %105, %cst_31 {dimension_numbers = #tpu.dot_dimension_numbers<[2], [2], [1], [1], [0, 0, 0, 1, 1, 1], [0], [0]>} : vector<1x16x8xbf16>, vector<1x16x8xbf16>, vector<1x16x16xf32> -> vector<1x16x16xf32>
    "tpu.trace_stop"() : () -> ()
    %cst_32 = arith.constant dense<0xFF800000> : vector<1x16xf32>
    %110 = vector.multi_reduction <maximumf>, %109, %cst_32 [2] : vector<1x16x16xf32> to vector<1x16xf32>
    %111 = vector.shape_cast %110 : vector<1x16xf32> to vector<1x16x1xf32>
    %112 = vector.broadcast %111 : vector<1x16x1xf32> to vector<1x16x16xf32>
    %113 = arith.subf %109, %112 : vector<1x16x16xf32>
    %114 = math.exp %113 : vector<1x16x16xf32>
    %115 = vector.shape_cast %1 : vector<16x16xf32> to vector<1x16x16xf32>
    %116 = arith.mulf %114, %115 : vector<1x16x16xf32>
    %cst_33 = arith.constant dense<0.000000e+00> : vector<1x16xf32>
    %117 = vector.multi_reduction <add>, %116, %cst_33 [2] : vector<1x16x16xf32> to vector<1x16xf32>
    %118 = vector.shape_cast %117 : vector<1x16xf32> to vector<1x16x1xf32>
    %cst_34 = arith.constant 0.000000e+00 : f32
    %119 = vector.broadcast %cst_34 : f32 to vector<1x16x1xf32>
    %120 = arith.cmpf ogt, %118, %119 : vector<1x16x1xf32>
    %cst_35 = arith.constant 1.000000e+00 : f32
    %121 = vector.broadcast %cst_35 : f32 to vector<1x16x1xf32>
    %122 = arith.select %120, %118, %121 : vector<1x16x1xi1>, vector<1x16x1xf32>
    %123 = tpu.reciprocal %122 : vector<1x16x1xf32> -> vector<1x16x1xf32>
    %124 = arith.truncf %116 : vector<1x16x16xf32> to vector<1x16x16xbf16>
    "tpu.trace_start"() <{level = 10 : i32, message = "hij,hjc->hic"}> : () -> ()
    %cst_36 = arith.constant dense<0.000000e+00> : vector<1x16x8xf32>
    %125 = tpu.matmul %124, %108, %cst_36 {dimension_numbers = #tpu.dot_dimension_numbers<[2], [1], [1], [2], [0, 0, 0, 1, 1, 2], [0], [0]>} : vector<1x16x16xbf16>, vector<1x16x8xbf16>, vector<1x16x8xf32> -> vector<1x16x8xf32>
    "tpu.trace_stop"() : () -> ()
    %126 = vector.broadcast %123 : vector<1x16x1xf32> to vector<1x16x8xf32>
    %127 = arith.mulf %125, %126 : vector<1x16x8xf32>
    %128 = tpu.transpose %127, [1, 0, 2] : vector<1x16x8xf32> -> vector<16x1x8xf32>
    %129 = vector.shape_cast %128 : vector<16x1x8xf32> to vector<16x8xf32>
    %130 = arith.addf %129, %99 : vector<16x8xf32>
    %cst_37 = arith.constant 0.000000e+00 : f32
    %131 = vector.broadcast %cst_37 : f32 to vector<16x120xf32>
    %132 = tpu.concatenate %130, %131 in 1 : vector<16x8xf32>, vector<16x120xf32> -> vector<16x128xf32>
    %c0_38 = arith.constant 0 : index
    %c0_39 = arith.constant 0 : index
    %133 = vector.load %arg8[%c0_38, %c0_39] : memref<16x128xf32, #tpu.memory_space<vmem>>, vector<16x128xf32>
    tpu.vector_store %arg8[%c0_38, %c0_39], %132 {strides = array<i32>} : memref<16x128xf32, #tpu.memory_space<vmem>>, vector<16x128xf32>,
    return
  }
}

</mosaic_0001>

<bundles_post_ra>
// kernel: tpu_custom_call.1
= control target key start
LH: loop header
LB: loop body
LE: loop exit
PB: predicated region body
PF: predicated region fallthrough
CT: control target
= control target key end

     0   :  { %13 = vsyncpa [#allocation3], 0  ;;  %s7375_s0 = inlined_call_operand.vmem [shape: f32[16,8], index: 0, kind: input, shape index: {}]   ;;  %s7376_s1 = inlined_call_operand.vmem [shape: f32[16,16], index: 1, kind: input, shape index: {}]   ;;  %s7377_s2 = inlined_call_operand.vmem [shape: bf16[8,224], index: 2, kind: input, shape index: {}]   ;;  %s7378_s3 = inlined_call_operand.vmem [shape: f32[1,224], index: 3, kind: input, shape index: {}]   ;;  %s7379_s4 = inlined_call_operand.hbm [shape: bf16[56,128], index: 4, kind: input, shape index: {}]   ;;  %s7380_s5 = inlined_call_operand.vmem [shape: f32[1,128], index: 5, kind: input, shape index: {}]   ;;  %s7381_s6 = inlined_call_operand.hbm [shape: bf16[32,32], index: 6, kind: input, shape index: {}]   ;;  %s7382_s7 = inlined_call_operand.vmem [shape: f32[1,32], index: 7, kind: input, shape index: {}]   ;;  %s7383_s8 = inlined_call_operand.hbm [shape: f32[16,128], index: 8, kind: output, shape index: {}]  }
   0x1   :  { %14 = vsyncpa [#allocation6], 0 }
   0x2   :  { %15 = vsyncpa [#allocation4], 0  ;;  %s28_s29 = sshll.u32 %s7379_s4, 4  ;;  %s5134_s30 = smov [#allocation2]   ;;  %s29_s29 = int_to_ptr.hbm [resolvable:$true] %s28_s29 }
   0x3   :  { %s30_s9 = sshll.u32 %s5134_s30, 4  ;;  %s43_s12 = sshll.u32 %s7381_s6, 4  ;;  %s31_s9 = int_to_ptr.vmem [resolvable:$true] %s30_s9  ;;  %s44_s12 = int_to_ptr.hbm [resolvable:$true] %s43_s12 }
   0x4   :  { %s5135_s13 = smov 64   ;;  %s5136_s14 = smov 4  }
   0x5   :  { %36 = dma.hbm_to_vmem [thread:$0]  %s29_s29, 448, %s31_s9, [#allocation3], %s5135_s13, %s5135_s13, %s5136_s14  }
   0x6   :  { %s5137_s15 = smov [#allocation5]  }
   0x7   :  { %s45_s16 = sshll.u32 %s5137_s15, 4  ;;  %s46_s16 = int_to_ptr.vmem [resolvable:$true] %s45_s16 }
   0x8   :  { %51 = dma.hbm_to_vmem [thread:$0]  %s44_s12, 256, %s46_s16, [#allocation6], %s5135_s13, %s5135_s13, %s5136_s14  }
   0x9   :  { %5128 = dma.done.wait [#allocation3], 448  }
   0xa   :  { %5129 = vsyncadd [#allocation3], 4294966848 }
   0xb   :  { %5130 = dma.done.wait [#allocation6], 256  }
   0xc   :  { %5131 = vsyncadd [#allocation6], 4294967040  ;;  %v67_v0 = vld [vmem:[%s7377_s2] sm:$0xff]  ;;  %vm84_vm0 = vcmask 1043456   ;;  %v64_v3 = vld [vmem:[%s7375_s0 + $0x8] sm:$0xff]  ;;  %vm80_vm1 = vcmask 64512  }
   0xd   :  { %v76_v1 = vunpack.c.l.b16 %v67_v0  ;;  %v63_v2 = vld [vmem:[%s7375_s0] sm:$0xff]  ;;  %v77_v7 = vunpack.c.h.b16 %v67_v0  ;;  %s5138_s0 = smov 96   ;;  %s5139_s22 = smov 80   ;;  %v5145_v20 = vmov 1983009808   ;;  %vm158_vm2 = vcmask 1047556  }
   0xe   :  { %v69_v6 = vpack.c.bf16 %v64_v3, %v63_v2  ;;  %v5226_v11 = vld [vmem:[%s7378_s3] sm:$0x3]  ;;  %s5140_s3 = smov 112   ;;  %s5141_s23 = smov 88   ;;  %v163_v21 = vunpack.c.l.s4 %v5145_v20  ;;  %v5146_v43 = vmov 1934713408  }
   0xf   :  { %v78_v4 = vpack.c.b16 %v76_v1, %v76_v1  ;;  %v79_v8 = vpack.c.b16 %v77_v7, %v77_v7  ;;  %v71_v12 = vperm.slane %v5226_v11, 0  ;;  %s5142_s24 = smov 120   ;;  %s5143_s25 = smov 104   ;;  %v209_v44 = vunpack.c.l.s4 %v5146_v43 }
  0x10   :  { %s5144_s26 = smov 72   ;;  %v5257_v24 = vunpack.c.0.s8 %v163_v21  ;;  %v72_v46 = vperm.slane %v5226_v11, 1  ;;  %s5147_s27 = smov 16   ;;  %vm1836_vm3 = vcmask 130048  }
  0x11   :  { %v86_v5 = vsel %vm84_vm0, %v78_v4, 0  ;;  %v89_v9 = vsel %vm84_vm0, %v79_v8, 0  ;;  %v5282_v0 = vunpack.c.0.s8 %v209_v44  ;;  %s5148_s10 = smov 8   ;;  %s5149_s11 = smov 40  }
  0x12   :  { %98 = vmatpush.bf16.msra.mxu0 %v86_v5  ;;  %112 = vmatpush.bf16.msra.mxu1 %v89_v9  ;;  %s5150_s12 = smov 32   ;;  %s5151_s14 = smov 24  }
  0x13   :  { %s5152_s15 = smov 48   ;;  %s4693_s20 = sshll.u32 %s7383_s8, 4  ;;  %s4694_s20 = int_to_ptr.hbm [resolvable:$true] %s4693_s20 }
  0x14   :  { %s5153_s2 = smov [#allocation7]  }
  0x15   :  { %4707 = vmatmul.msk.bf16.vlgmr.msra.gmra.mxu0 %vm80_vm1, %v69_v6  ;;  %4708 = vmatmul.msk.bf16.vlgmr.msra.gmra.mxu1 %vm80_vm1, %v69_v6  ;;  %s4691_s21 = sshll.u32 %s5153_s2, 4  ;;  %s4692_s21 = int_to_ptr.vmem [resolvable:$true] %s4691_s21 }
  0x92   :  { %v100_v10 = vpop.f32.mrf.mxu0  ;;  %v114_v27 = vpop.f32.mrf.mxu1 }
  0x93   :  { %v5229_v14 = vadd.f32 %v100_v10, %v71_v12  ;;  %v5293_v10 = vadd.f32 %v114_v27, %v72_v46 }
  0x9a   :  { %v102_v13 = vpop.f32.mrf.mxu0  ;;  %v116_v63 = vpop.f32.mrf.mxu1 }
  0x9b   :  { %v5231_v15 = vadd.f32 %v102_v13, %v71_v12  ;;  %v5295_v11 = vadd.f32 %v116_v63, %v72_v46 }
  0x9d   :  { %v5235_v16 = vpack.i.bf16 %v5231_v15, %v5229_v14  ;;  %v270_v36 = vrot.slane %v5231_v15, 4 }
  0x9f   :  { %4802 = vrot.lane.b32.xlu2 %v5235_v16, %s5138_s0  ;;  %4792 = vrot.lane.b32.xlu1 %v5235_v16, %s5139_s22 }
  0xa0   :  { %4782 = vrot.lane.b32.xlu0 %v5235_v16, %s5140_s3 }
  0xa7   :  { %4807 = vrot.lane.b32.xlu2 %v5235_v16, %s5141_s23  ;;  %4797 = vrot.lane.b32.xlu1 %v5235_v16, %s5142_s24 }
  0xa8   :  { %4787 = vrot.lane.b32.xlu0 %v5235_v16, %s5143_s25 }
  0xaf   :  { %4812 = vrot.lane.b32.xlu1 %v5235_v16, %s5144_s26 }
  0xf9   :  { %v5251_v17 = vpop.permute.xlu2 %4802 }
  0xfa   :  { %v4805_v26 = vunpack.i.h.bf16 %v5251_v17  ;;  %v4804_v28 = vunpack.i.l.bf16 %v5251_v17 }
  0xfc   :  { %v294_v32 = vrot.slane %v4805_v26, 4  ;;  %v184_v37 = vrot.slane %v4804_v28, 4 }
 0x101   :  { %v5253_v18 = vpop.permute.xlu2 %4807 }
 0x102   :  { %v4810_v19 = vunpack.i.h.bf16 %v5253_v18  ;;  %v4809_v22 = vunpack.i.l.bf16 %v5253_v18 }
 0x104   :  { %v304_v23 = vrot.slane %v4810_v19, 4  ;;  %v194_v25 = vrot.slane %v4809_v22, 4  ;;  %v309_v30 = vperm.slane %v4810_v19, %v5257_v24  ;;  %v199_v34 = vperm.slane %v4809_v22, %v5257_v24 }
 0x106   :  { %v305_v29 = vsel %vm158_vm2, 0.0, %v304_v23  ;;  %v195_v31 = vsel %vm158_vm2, 0.0, %v194_v25  ;;  %v338_v42 = vrot.slane %v309_v30, 4  ;;  %v228_v52 = vrot.slane %v199_v34, 4 }
 0x107   :  { %v313_v33 = vperm.slane %v305_v29, %v5257_v24  ;;  %v203_v38 = vperm.slane %v195_v31, %v5257_v24  ;;  %v160_v23 = vrot.slane %v5229_v14, 4 }
 0x109   :  { %v350_v51 = vrot.slane %v313_v33, 4  ;;  %v240_v55 = vrot.slane %v203_v38, 4 }
 0x111   :  { %v5266_v35 = vpop.permute.xlu1 %4792 }
 0x112   :  { %v4795_v39 = vunpack.i.h.bf16 %v5266_v35  ;;  %v4794_v40 = vunpack.i.l.bf16 %v5266_v35  ;;  %v4783_v41 = vpop.permute.xlu0 %4782 }
 0x113   :  { %v4785_v45 = vunpack.i.h.bf16 %v4783_v41  ;;  %v4784_v58 = vunpack.i.l.bf16 %v4783_v41  ;;  %4817 = vrot.lane.b32.xlu0 %v4783_v41, %s5144_s26 }
 0x114   :  { %v292_v47 = vrot.slane %v4795_v39, 4  ;;  %v295_v48 = vsel %vm158_vm2, %v4795_v39, %v294_v32  ;;  %v182_v49 = vrot.slane %v4794_v40, 4  ;;  %v185_v50 = vsel %vm158_vm2, %v4794_v40, %v184_v37 }
 0x115   :  { %v303_v53 = vperm.slane %v295_v48, %v5257_v24  ;;  %v193_v54 = vperm.slane %v185_v50, %v5257_v24  ;;  %v268_v3 = vrot.slane %v4785_v45, 4  ;;  %v271_v9 = vsel %vm158_vm2, %v4785_v45, %v270_v36 }
 0x116   :  { %v293_v56 = vsel %vm158_vm2, %v292_v47, %v4805_v26  ;;  %v183_v57 = vsel %vm158_vm2, %v182_v49, %v4804_v28  ;;  %v157_v19 = vrot.slane %v4784_v58, 4  ;;  %v279_v22 = vperm.slane %v271_v9, %v5257_v24 }
 0x117   :  { %v299_v59 = vperm.slane %v293_v56, %v5257_v24  ;;  %v351_v60 = vsel %vm158_vm2, %v350_v51, %v303_v53  ;;  %v352_v61 = vrot.slane %v303_v53, 4  ;;  %v189_v62 = vperm.slane %v183_v57, %v5257_v24 }
 0x118   :  { %v241_v1 = vsel %vm158_vm2, %v240_v55, %v193_v54  ;;  %v242_v2 = vrot.slane %v193_v54, 4  ;;  %v269_v21 = vsel %vm158_vm2, %v268_v3, %v5231_v15  ;;  %v5307_v26 = vperm.slane %v351_v60, %v5282_v0 }
 0x119   :  { %v5286_v4 = vsel %vm158_vm2, %v338_v42, %v299_v59  ;;  %v340_v5 = vrot.slane %v299_v59, 4  ;;  %v353_v6 = vsel %vm158_vm2, %v313_v33, %v352_v61  ;;  %v5290_v7 = vsel %vm158_vm2, %v228_v52, %v189_v62  ;;  %v5304_v25 = vpop.permute.xlu1 %4797 }
 0x11a   :  { %v230_v8 = vrot.slane %v189_v62, 4  ;;  %v243_v13 = vsel %vm158_vm2, %v203_v38, %v242_v2  ;;  %v5310_v27 = vperm.slane %v353_v6, %v5282_v0  ;;  %v4788_v29 = vpop.permute.xlu0 %4787  ;;  %v5321_v31 = vperm.slane %v241_v1, %v5282_v0  ;;  %4832 = vrot.lane.b32.xlu1 %v5304_v25, %s5144_s26 }
 0x11b   :  { %v341_v12 = vsel %vm158_vm2, %v309_v30, %v340_v5  ;;  %v5315_v30 = vpack.i.bf16 %v5295_v11, %v5293_v10  ;;  %v159_v32 = vsel %vm158_vm2, %v157_v19, %v5229_v14  ;;  %v161_v33 = vsel %vm158_vm2, %v4784_v58, %v160_v23  ;;  %4822 = vrot.lane.b32.xlu2 %v4788_v29, %s5144_s26 }
 0x11c   :  { %v231_v20 = vsel %vm158_vm2, %v199_v34, %v230_v8  ;;  %v5318_v15 = vperm.slane %v341_v12, %v5282_v0  ;;  %v251_v34 = vperm.slane %v243_v13, %v5282_v0  ;;  %v275_v36 = vperm.slane %v269_v21, %v5257_v24  ;;  %4827 = vrot.lane.b32.xlu0 %v5266_v35, %s5144_s26 }
 0x11d   :  { %v239_v28 = vperm.slane %v231_v20, %v5282_v0  ;;  %v4800_v37 = vunpack.i.h.bf16 %v5304_v25  ;;  %v328_v38 = vrot.slane %v279_v22, 4  ;;  %v4799_v39 = vunpack.i.l.bf16 %v5304_v25 }
 0x11e   :  { %v4790_v40 = vunpack.i.h.bf16 %v4788_v29  ;;  %v4789_v42 = vunpack.i.l.bf16 %v4788_v29  ;;  %v165_v44 = vperm.slane %v159_v32, %v5257_v24  ;;  %v169_v45 = vperm.slane %v161_v33, %v5257_v24 }
 0x11f   :  { %v256_v43 = vrot.slane %v239_v28, 4  ;;  %v282_v14 = vrot.slane %v4800_v37, 4  ;;  %v172_v46 = vrot.slane %v4799_v39, 4  ;;  %v264_v49 = vrot.slane %v251_v34, 4 }
 0x120   :  { %v280_v47 = vrot.slane %v4790_v40, 4  ;;  %v170_v48 = vrot.slane %v4789_v42, 4  ;;  %v316_v50 = vrot.slane %v275_v36, 4  ;;  %v206_v41 = vrot.slane %v165_v44, 4 }
 0x121   :  { %v283_v51 = vsel %vm158_vm2, %v4790_v40, %v282_v14  ;;  %v173_v55 = vsel %vm158_vm2, %v4789_v42, %v172_v46  ;;  %v218_v59 = vrot.slane %v169_v45, 4  ;;  %v260_v20 = vrot.slane %v5321_v31, 4 }
 0x122   :  { %v281_v52 = vsel %vm158_vm2, %v280_v47, %v4800_v37  ;;  %v291_v53 = vperm.slane %v283_v51, %v5257_v24  ;;  %v171_v54 = vsel %vm158_vm2, %v170_v48, %v4799_v39  ;;  %v181_v58 = vperm.slane %v173_v55, %v5257_v24  ;;  %4847 = vrot.lane.b32.xlu1 %v5315_v30, %s5138_s0 }
 0x123   :  { %v287_v56 = vperm.slane %v281_v52, %v5257_v24  ;;  %v177_v57 = vperm.slane %v171_v54, %v5257_v24  ;;  %v374_v40 = vrot.slane %v5310_v27, 4  ;;  %4837 = vrot.lane.b32.xlu2 %v5251_v17, %s5144_s26  ;;  %v345_v52 = vperm.slane %v5286_v4, %v5282_v0 }
 0x124   :  { %v326_v60 = vrot.slane %v291_v53, 4  ;;  %v329_v61 = vsel %vm158_vm2, %v291_v53, %v328_v38  ;;  %v216_v2 = vrot.slane %v181_v58, 4  ;;  %v219_v5 = vsel %vm158_vm2, %v181_v58, %v218_v59  ;;  %4842 = vrot.lane.b32.xlu0 %v5253_v18, %s5144_s26 }
 0x125   :  { %v314_v62 = vrot.slane %v287_v56, 4  ;;  %v204_v63 = vrot.slane %v177_v57, 4  ;;  %v207_v1 = vsel %vm158_vm2, %v177_v57, %v206_v41  ;;  %v317_v6 = vsel %vm158_vm2, %v287_v56, %v316_v50 }
 0x126   :  { %v215_v3 = vperm.slane %v207_v1, %v5282_v0  ;;  %v327_v8 = vsel %vm158_vm2, %v326_v60, %v279_v22  ;;  %v217_v12 = vsel %vm158_vm2, %v216_v2, %v169_v45  ;;  %v227_v13 = vperm.slane %v219_v5, %v5282_v0 }
 0x127   :  { %v205_v9 = vsel %vm158_vm2, %v204_v63, %v165_v44  ;;  %v315_v19 = vsel %vm158_vm2, %v314_v62, %v275_v36  ;;  %v223_v21 = vperm.slane %v217_v12, %v5282_v0  ;;  %v370_v22 = vrot.slane %v5307_v26, 4 }
 0x128   :  { %v5359_v23 = vsel %vm158_vm2, %v256_v43, %v215_v3  ;;  %v258_v29 = vrot.slane %v215_v3, 4  ;;  %v265_v32 = vsel %vm158_vm2, %v264_v49, %v227_v13  ;;  %v266_v33 = vrot.slane %v227_v13, 4 }
 0x129   :  { %v325_v37 = vperm.slane %v317_v6, %v5282_v0  ;;  %v366_v36 = vrot.slane %v5318_v15, 4  ;;  %v261_v35 = vsel %vm158_vm2, %v260_v20, %v223_v21  ;;  %v262_v39 = vrot.slane %v223_v21, 4 }
 0x12a   :  { %v5366_v38 = vsel %vm158_vm2, %v239_v28, %v258_v29  ;;  %v267_v42 = vsel %vm158_vm2, %v251_v34, %v266_v33  ;;  %v333_v43 = vperm.slane %v327_v8, %v5282_v0  ;;  %v337_v44 = vperm.slane %v329_v61, %v5282_v0  ;;  %1124 = vrot.lane.b32.xlu1 %v5295_v11, %s5141_s23 }
 0x12b   :  { %v263_v28 = vsel %vm158_vm2, %v5321_v31, %v262_v39  ;;  %v5380_v45 = vsel %vm158_vm2, %v366_v36, %v325_v37  ;;  %v368_v14 = vrot.slane %v325_v37, 4  ;;  %v404_v50 = vrot.slane %v261_v35, 4  ;;  %4852 = vrot.lane.b32.xlu2 %v5315_v30, %s5140_s3 }
 0x12c   :  { %v371_v46 = vsel %vm158_vm2, %v370_v22, %v333_v43  ;;  %v372_v47 = vrot.slane %v333_v43, 4  ;;  %v375_v48 = vsel %vm158_vm2, %v374_v40, %v337_v44  ;;  %v376_v34 = vrot.slane %v337_v44, 4  ;;  %1122 = vrot.lane.b32.xlu0 %v5293_v10, %s5141_s23 }
 0x12d   :  { %v5386_v49 = vsel %vm158_vm2, %v5318_v15, %v368_v14  ;;  %v416_v51 = vrot.slane %v263_v28, 4  ;;  %v235_v53 = vperm.slane %v5290_v7, %v5282_v0  ;;  %v211_v15 = vperm.slane %v205_v9, %v5282_v0 }
 0x12e   :  { %v373_v17 = vsel %vm158_vm2, %v5307_v26, %v372_v47  ;;  %v377_v31 = vsel %vm158_vm2, %v5310_v27, %v376_v34  ;;  %v5400_v54 = vsel %vm158_vm2, %v265_v32, %v404_v50  ;;  %v321_v26 = vperm.slane %v315_v19, %v5282_v0 }
 0x12f   :  { %v5404_v55 = vsel %vm158_vm2, %v267_v42, %v416_v51  ;;  %v514_v27 = vrot.slane %v371_v46, 4  ;;  %v526_v41 = vrot.slane %v373_v17, 4  ;;  %v362_v7 = vrot.slane %v345_v52, 4 }
 0x130   :  { %v378_v56 = vrot.slane %v5359_v23, 4  ;;  %v402_v57 = vrot.slane %v265_v32, 4  ;;  %v488_v58 = vrot.slane %v5380_v45, 4  ;;  %v252_v59 = vrot.slane %v235_v53, 4 }
 0x131   :  { %v5409_v18 = vsel %vm158_vm2, %v375_v48, %v514_v27  ;;  %v5412_v4 = vsel %vm158_vm2, %v377_v31, %v526_v41  ;;  %v254_v60 = vrot.slane %v211_v15, 4  ;;  %v364_v61 = vrot.slane %v321_v26, 4 }
 0x132   :  { %v390_v11 = vrot.slane %v5366_v38, 4  ;;  %v414_v62 = vrot.slane %v267_v42, 4  ;;  %v500_v63 = vrot.slane %v5386_v49, 4  ;;  %v512_v1 = vrot.slane %v375_v48, 4 }
 0x133   :  { %v524_v2 = vrot.slane %v377_v31, 4  ;;  %v5423_v3 = vsel %vm158_vm2, %v252_v59, %v211_v15  ;;  %v5426_v5 = vsel %vm158_vm2, %v362_v7, %v321_v26  ;;  %v403_v9 = vsel %vm158_vm2, %v402_v57, %v261_v35  ;;  %4857 = vrot.lane.b32.xlu2 %v5315_v30, %s5139_s22 }
 0x134   :  { %v379_v6 = vsel %vm158_vm2, %v378_v56, %v5423_v3  ;;  %v380_v8 = vrot.slane %v5423_v3, 4  ;;  %v489_v12 = vsel %vm158_vm2, %v488_v58, %v5426_v5  ;;  %v5435_v13 = vsel %vm158_vm2, %v235_v53, %v254_v60  ;;  %4862 = vrot.lane.b32.xlu0 %v5315_v30, %s5143_s25 }
 0x135   :  { %v5438_v10 = vsel %vm158_vm2, %v345_v52, %v364_v61  ;;  %v385_v19 = vperm.slane %v379_v6, %v5257_v24  ;;  %v409_v20 = vperm.slane %v403_v9, %v5257_v24  ;;  %v391_v21 = vsel %vm158_vm2, %v390_v11, %v5435_v13 }
 0x136   :  { %v392_v29 = vrot.slane %v5435_v13, 4  ;;  %v415_v22 = vsel %vm158_vm2, %v414_v62, %v263_v28  ;;  %v490_v32 = vrot.slane %v5426_v5, 4  ;;  %v397_v33 = vperm.slane %v391_v21, %v5257_v24 }
 0x137   :  { %v421_v37 = vperm.slane %v415_v22, %v5257_v24  ;;  %v428_v36 = vrot.slane %v385_v19, 4  ;;  %v452_v35 = vrot.slane %v409_v20, 4  ;;  %v495_v39 = vperm.slane %v489_v12, %v5257_v24 }
 0x138   :  { %v501_v40 = vsel %vm158_vm2, %v500_v63, %v5438_v10  ;;  %v502_v42 = vrot.slane %v5438_v10, 4  ;;  %v513_v43 = vsel %vm158_vm2, %v512_v1, %v371_v46  ;;  %v426_v44 = vrot.slane %v397_v33, 4 }
 0x139   :  { %v450_v28 = vrot.slane %v421_v37, 4  ;;  %v507_v14 = vperm.slane %v501_v40, %v5257_v24  ;;  %v519_v47 = vperm.slane %v513_v43, %v5257_v24  ;;  %v525_v48 = vsel %vm158_vm2, %v524_v2, %v373_v17 }
 0x13a   :  { %v538_v34 = vrot.slane %v495_v39, 4  ;;  %v429_v50 = vsel %vm158_vm2, %v397_v33, %v428_v36  ;;  %v453_v31 = vsel %vm158_vm2, %v421_v37, %v452_v35  ;;  %v427_v51 = vsel %vm158_vm2, %v426_v44, %v385_v19 }
 0x13b   :  { %v451_v46 = vsel %vm158_vm2, %v450_v28, %v409_v20  ;;  %v531_v52 = vperm.slane %v525_v48, %v5257_v24  ;;  %v536_v53 = vrot.slane %v507_v14, 4  ;;  %v433_v15 = vperm.slane %v427_v51, %v5282_v0 }
 0x13c   :  { %v457_v26 = vperm.slane %v451_v46, %v5282_v0  ;;  %v562_v17 = vrot.slane %v519_v47, 4  ;;  %v437_v27 = vperm.slane %v429_v50, %v5282_v0  ;;  %v461_v56 = vperm.slane %v453_v31, %v5282_v0  ;;  %4867 = vrot.lane.b32.xlu0 %v5235_v16, %s5147_s27 }
 0x13d   :  { %v537_v41 = vsel %vm158_vm2, %v536_v53, %v495_v39  ;;  %v560_v7 = vrot.slane %v531_v52, 4  ;;  %v539_v30 = vsel %vm158_vm2, %v507_v14, %v538_v34  ;;  %v476_v57 = vrot.slane %v433_v15, 4 }
 0x13e   :  { %v543_v58 = vperm.slane %v537_v41, %v5282_v0  ;;  %v474_v59 = vrot.slane %v457_v26, 4  ;;  %v480_v60 = vrot.slane %v437_v27, 4  ;;  %v547_v11 = vperm.slane %v539_v30, %v5282_v0 }
 0x13f   :  { %v561_v61 = vsel %vm158_vm2, %v560_v7, %v519_v47  ;;  %v563_v62 = vsel %vm158_vm2, %v531_v52, %v562_v17  ;;  %v478_v63 = vrot.slane %v461_v56, 4  ;;  %v477_v1 = vsel %vm158_vm2, %v457_v26, %v476_v57 }
 0x140   :  { %v567_v2 = vperm.slane %v561_v61, %v5282_v0  ;;  %v586_v6 = vrot.slane %v543_v58, 4  ;;  %v475_v9 = vsel %vm158_vm2, %v474_v59, %v433_v15  ;;  %v600_v12 = vpack.c.bf16 %v477_v1, %v477_v1 }
 0x141   :  { %v598_v19 = vpack.c.bf16 %v475_v9, %v475_v9  ;;  %v481_v20 = vsel %vm158_vm2, %v461_v56, %v480_v60  ;;  %v571_v21 = vperm.slane %v563_v62, %v5282_v0  ;;  %v590_v37 = vrot.slane %v547_v11, 4 }
 0x142   :  { %v587_v22 = vsel %vm158_vm2, %v567_v2, %v586_v6  ;;  %v584_v33 = vrot.slane %v567_v2, 4  ;;  %v604_v36 = vpack.c.bf16 %v481_v20, %v481_v20  ;;  %v5484_v39 = vunpack.c.l.b16 %v600_v12 }
 0x143   :  { %v601_v35 = vpack.c.bf16 %v587_v22, %v587_v22  ;;  %v5486_v40 = vunpack.c.l.b16 %v598_v19  ;;  %v479_v43 = vsel %vm158_vm2, %v478_v63, %v437_v27  ;;  %v591_v28 = vsel %vm158_vm2, %v571_v21, %v590_v37 }
 0x144   :  { %v585_v44 = vsel %vm158_vm2, %v584_v33, %v543_v58  ;;  %v5491_v14 = vunpack.c.l.b16 %v604_v36  ;;  %v588_v47 = vrot.slane %v571_v21, 4  ;;  %v605_v50 = vpack.c.bf16 %v591_v28, %v591_v28 }
 0x145   :  { %v5493_v48 = vunpack.c.l.b16 %v601_v35  ;;  %v599_v34 = vpack.c.bf16 %v585_v44, %v585_v44  ;;  %v602_v31 = vpack.c.bf16 %v479_v43, %v479_v43  ;;  %v381_v51 = vsel %vm158_vm2, %v5359_v23, %v380_v8 }
 0x146   :  { %v589_v16 = vsel %vm158_vm2, %v588_v47, %v547_v11  ;;  %v393_v46 = vsel %vm158_vm2, %v5366_v38, %v392_v29  ;;  %v413_v52 = vperm.slane %v5400_v54, %v5257_v24  ;;  %v5510_v26 = vunpack.c.l.b16 %v605_v50 }
 0x147   :  { %v1660_v53 = vpack.c.b16 %v5493_v48, %v5484_v39  ;;  %v5508_v15 = vunpack.c.l.b16 %v599_v34  ;;  %v603_v17 = vpack.c.bf16 %v589_v16, %v589_v16  ;;  %v5512_v3 = vunpack.c.l.b16 %v602_v31 }
 0x148   :  { %v389_v23 = vperm.slane %v381_v51, %v5257_v24  ;;  %v401_v8 = vperm.slane %v393_v46, %v5257_v24  ;;  %v425_v38 = vperm.slane %v5404_v55, %v5257_v24  ;;  %v1720_v13 = vpack.c.b16 %v5510_v26, %v5491_v14 }
 0x149   :  { %v1630_v54 = vpack.c.b16 %v5508_v15, %v5486_v40  ;;  %v5522_v29 = vunpack.c.l.b16 %v603_v17  ;;  %v464_v27 = vrot.slane %v413_v52, 4  ;;  %v491_v30 = vsel %vm158_vm2, %v5380_v45, %v490_v32 }
 0x14a   :  { %v438_v41 = vrot.slane %v401_v8, 4  ;;  %v440_v7 = vrot.slane %v389_v23, 4  ;;  %v462_v56 = vrot.slane %v425_v38, 4  ;;  %v499_v57 = vperm.slane %v491_v30, %v5257_v24 }
 0x14b   :  { %v1690_v55 = vpack.c.b16 %v5522_v29, %v5512_v3  ;;  %v503_v58 = vsel %vm158_vm2, %v5386_v49, %v502_v42  ;;  %v523_v59 = vperm.slane %v5409_v18, %v5257_v24  ;;  %v535_v45 = vperm.slane %v5412_v4, %v5257_v24 }
 0x14c   :  { %v439_v60 = vsel %vm158_vm2, %v438_v41, %v389_v23  ;;  %v463_v5 = vsel %vm158_vm2, %v462_v56, %v413_v52  ;;  %v511_v61 = vperm.slane %v503_v58, %v5257_v24  ;;  %v550_v10 = vrot.slane %v499_v57, 4 }
 0x14d   :  { %v445_v32 = vperm.slane %v439_v60, %v5282_v0  ;;  %v469_v11 = vperm.slane %v463_v5, %v5282_v0  ;;  %v574_v62 = vrot.slane %v523_v59, 4  ;;  %v572_v49 = vrot.slane %v535_v45, 4 }
 0x14e   :  { %v548_v63 = vrot.slane %v511_v61, 4  ;;  %v441_v42 = vsel %vm158_vm2, %v401_v8, %v440_v7  ;;  %v465_v18 = vsel %vm158_vm2, %v425_v38, %v464_v27  ;;  %v551_v12 = vsel %vm158_vm2, %v511_v61, %v550_v10  ;;  %v4813_v61 = vpop.permute.xlu1 %4812 }
 0x14f   :  { %v484_v1 = vrot.slane %v445_v32, 4  ;;  %v482_v2 = vrot.slane %v469_v11, 4  ;;  %v473_v6 = vperm.slane %v465_v18, %v5282_v0  ;;  %v573_v4 = vsel %vm158_vm2, %v572_v49, %v523_v59 }
 0x150   :  { %v549_v9 = vsel %vm158_vm2, %v548_v63, %v499_v57  ;;  %v575_v19 = vsel %vm158_vm2, %v535_v45, %v574_v62  ;;  %v579_v22 = vperm.slane %v573_v4, %v5282_v0  ;;  %v449_v35 = vperm.slane %v441_v42, %v5282_v0 }
 0x151   :  { %v485_v20 = vsel %vm158_vm2, %v469_v11, %v484_v1  ;;  %v555_v21 = vperm.slane %v549_v9, %v5282_v0  ;;  %v483_v33 = vsel %vm158_vm2, %v482_v2, %v445_v32  ;;  %v486_v43 = vrot.slane %v473_v6, 4 }
 0x152   :  { %v608_v37 = vpack.c.bf16 %v485_v20, %v485_v20  ;;  %v606_v36 = vpack.c.bf16 %v483_v33, %v483_v33  ;;  %v592_v28 = vrot.slane %v579_v22, 4  ;;  %v583_v47 = vperm.slane %v575_v19, %v5282_v0 }
 0x153   :  { %v594_v44 = vrot.slane %v555_v21, 4  ;;  %v487_v34 = vsel %vm158_vm2, %v486_v43, %v449_v35  ;;  %v559_v50 = vperm.slane %v551_v12, %v5282_v0  ;;  %v4815_v45 = vunpack.i.h.bf16 %v4813_v61 }
 0x154   :  { %v593_v16 = vsel %vm158_vm2, %v592_v28, %v555_v21  ;;  %v596_v51 = vrot.slane %v583_v47, 4  ;;  %v610_v46 = vpack.c.bf16 %v487_v34, %v487_v34  ;;  %v5561_v17 = vunpack.c.l.b16 %v608_v37 }
 0x155   :  { %v595_v31 = vsel %vm158_vm2, %v579_v22, %v594_v44  ;;  %v607_v23 = vpack.c.bf16 %v593_v16, %v593_v16  ;;  %v5563_v8 = vunpack.c.l.b16 %v606_v36  ;;  %v4814_v32 = vunpack.i.l.bf16 %v4813_v61 }
 0x156   :  { %v609_v52 = vpack.c.bf16 %v595_v31, %v595_v31  ;;  %v597_v38 = vsel %vm158_vm2, %v596_v51, %v559_v50  ;;  %v5570_v56 = vunpack.c.l.b16 %v610_v46  ;;  %v766_v10 = vrot.slane %v4815_v45, 4 }
 0x157   :  { %v5568_v41 = vunpack.c.l.b16 %v607_v23  ;;  %v611_v7 = vpack.c.bf16 %v597_v38, %v597_v38  ;;  %v656_v62 = vrot.slane %v4814_v32, 4 }
 0x158   :  { %v5566_v27 = vunpack.c.l.b16 %v609_v52 }
 0x159   :  { %v1750_v57 = vpack.c.b16 %v5568_v41, %v5563_v8  ;;  %v5576_v58 = vunpack.c.l.b16 %v611_v7 }
 0x15a   :  { %v1780_v30 = vpack.c.b16 %v5566_v27, %v5561_v17 }
 0x15b   :  { %v1810_v59 = vpack.c.b16 %v5576_v58, %v5570_v56 }
 0x175   :  { %v4823_v60 = vpop.permute.xlu2 %4822 }
 0x176   :  { %v4825_v49 = vunpack.i.h.bf16 %v4823_v60  ;;  %v4824_v42 = vunpack.i.l.bf16 %v4823_v60 }
 0x178   :  { %v776_v21 = vrot.slane %v4825_v49, 4  ;;  %v666_v22 = vrot.slane %v4824_v42, 4 }
 0x17d   :  { %v5580_v5 = vpop.permute.xlu2 %4837 }
 0x17e   :  { %v4840_v31 = vunpack.i.h.bf16 %v5580_v5  ;;  %v4839_v23 = vunpack.i.l.bf16 %v5580_v5 }
 0x185   :  { %v4853_v11 = vpop.permute.xlu2 %4852  ;;  %v4818_v63 = vpop.permute.xlu0 %4817 }
 0x186   :  { %v4820_v18 = vunpack.i.h.bf16 %v4818_v63  ;;  %v4819_v1 = vunpack.i.l.bf16 %v4818_v63  ;;  %4877 = vrot.lane.b32.xlu2 %v4853_v11, %s5147_s27 }
 0x188   :  { %v764_v2 = vrot.slane %v4820_v18, 4  ;;  %v767_v6 = vsel %vm158_vm2, %v4820_v18, %v766_v10  ;;  %v654_v9 = vrot.slane %v4819_v1, 4  ;;  %v657_v4 = vsel %vm158_vm2, %v4819_v1, %v656_v62 }
 0x189   :  { %v775_v35 = vperm.slane %v767_v6, %v5257_v24  ;;  %v665_v44 = vperm.slane %v657_v4, %v5257_v24 }
 0x18a   :  { %v765_v33 = vsel %vm158_vm2, %v764_v2, %v4815_v45  ;;  %v655_v37 = vsel %vm158_vm2, %v654_v9, %v4814_v32 }
 0x18b   :  { %v771_v36 = vperm.slane %v765_v33, %v5257_v24  ;;  %v661_v43 = vperm.slane %v655_v37, %v5257_v24  ;;  %v714_v61 = vrot.slane %v665_v44, 4  ;;  %v824_v62 = vrot.slane %v775_v35, 4 }
 0x18c   :  { %v4833_v12 = vpop.permute.xlu1 %4832  ;;  %v680_v37 = vrot.slane %v4839_v23, 4 }
 0x18d   :  { %v4835_v19 = vunpack.i.h.bf16 %v4833_v12  ;;  %v4834_v20 = vunpack.i.l.bf16 %v4833_v12  ;;  %v702_v16 = vrot.slane %v661_v43, 4  ;;  %v812_v10 = vrot.slane %v771_v36, 4 }
 0x18e   :  { %v4828_v52 = vpop.permute.xlu0 %4827 }
 0x18f   :  { %v778_v28 = vrot.slane %v4835_v19, 4  ;;  %v667_v47 = vsel %vm158_vm2, %v666_v22, %v4834_v20  ;;  %v668_v34 = vrot.slane %v4834_v20, 4  ;;  %v777_v50 = vsel %vm158_vm2, %v776_v21, %v4835_v19 }
 0x190   :  { %v673_v51 = vperm.slane %v667_v47, %v5257_v24  ;;  %v783_v46 = vperm.slane %v777_v50, %v5257_v24  ;;  %v4830_v60 = vunpack.i.h.bf16 %v4828_v52  ;;  %v4829_v20 = vunpack.i.l.bf16 %v4828_v52 }
 0x191   :  { %v669_v38 = vsel %vm158_vm2, %v4824_v42, %v668_v34  ;;  %v779_v7 = vsel %vm158_vm2, %v4825_v49, %v778_v28  ;;  %v790_v21 = vrot.slane %v4840_v31, 4 }
 0x192   :  { %v677_v45 = vperm.slane %v669_v38, %v5257_v24  ;;  %v700_v32 = vrot.slane %v673_v51, 4  ;;  %v703_v11 = vsel %vm158_vm2, %v673_v51, %v702_v16  ;;  %v787_v63 = vperm.slane %v779_v7, %v5257_v24 }
 0x193   :  { %v810_v18 = vrot.slane %v783_v46, 4  ;;  %v788_v42 = vrot.slane %v4830_v60, 4  ;;  %v5608_v6 = vperm.slane %v703_v11, %v5282_v0  ;;  %v813_v4 = vsel %vm158_vm2, %v783_v46, %v812_v10 }
 0x194   :  { %v701_v1 = vsel %vm158_vm2, %v700_v32, %v661_v43  ;;  %v712_v2 = vrot.slane %v677_v45, 4  ;;  %v715_v5 = vsel %vm158_vm2, %v677_v45, %v714_v61  ;;  %v822_v22 = vrot.slane %v787_v63, 4  ;;  %v4848_v47 = vpop.permute.xlu1 %4847 }
 0x195   :  { %v5605_v49 = vperm.slane %v701_v1, %v5282_v0  ;;  %v811_v9 = vsel %vm158_vm2, %v810_v18, %v771_v36  ;;  %v5614_v19 = vperm.slane %v715_v5, %v5282_v0  ;;  %v825_v33 = vsel %vm158_vm2, %v787_v63, %v824_v62  ;;  %4872 = vrot.lane.b32.xlu1 %v4848_v47, %s5147_s27 }
 0x196   :  { %v713_v12 = vsel %vm158_vm2, %v712_v2, %v665_v44  ;;  %v5618_v43 = vperm.slane %v811_v9, %v5282_v0  ;;  %v5621_v28 = vperm.slane %v813_v4, %v5282_v0  ;;  %v789_v36 = vsel %vm158_vm2, %v788_v42, %v4840_v31  ;;  %v4843_v51 = vpop.permute.xlu0 %4842 }
 0x197   :  { %v5625_v44 = vperm.slane %v713_v12, %v5282_v0  ;;  %v750_v34 = vrot.slane %v5605_v49, 4  ;;  %v754_v50 = vrot.slane %v5608_v6, 4  ;;  %v791_v16 = vsel %vm158_vm2, %v4830_v60, %v790_v21 }
 0x198   :  { %v762_v46 = vrot.slane %v5614_v19, 4  ;;  %v5632_v52 = vperm.slane %v825_v33, %v5282_v0  ;;  %v795_v38 = vperm.slane %v789_v36, %v5257_v24  ;;  %v678_v7 = vrot.slane %v4829_v20, 4 }
 0x199   :  { %v823_v31 = vsel %vm158_vm2, %v822_v22, %v775_v35  ;;  %v681_v61 = vsel %vm158_vm2, %v4829_v20, %v680_v37  ;;  %v860_v45 = vrot.slane %v5618_v43, 4  ;;  %v799_v32 = vperm.slane %v791_v16, %v5257_v24 }
 0x19a   :  { %v679_v11 = vsel %vm158_vm2, %v678_v7, %v4839_v23  ;;  %v4845_v60 = vunpack.i.h.bf16 %v4843_v51  ;;  %v864_v10 = vrot.slane %v5621_v28, 4  ;;  %v4844_v63 = vunpack.i.l.bf16 %v4843_v51 }
 0x19b   :  { %v685_v62 = vperm.slane %v679_v11, %v5257_v24  ;;  %v836_v18 = vrot.slane %v795_v38, 4  ;;  %v689_v1 = vperm.slane %v681_v61, %v5257_v24  ;;  %v5645_v5 = vperm.slane %v823_v31, %v5282_v0 }
 0x19c   :  { %v800_v2 = vrot.slane %v4845_v60, 4  ;;  %v805_v35 = vperm.slane %v4845_v60, %v5257_v24  ;;  %v690_v9 = vrot.slane %v4844_v63, 4  ;;  %v695_v4 = vperm.slane %v4844_v63, %v5257_v24 }
 0x19d   :  { %v726_v42 = vrot.slane %v685_v62, 4  ;;  %v848_v23 = vrot.slane %v799_v32, 4  ;;  %v738_v16 = vrot.slane %v689_v1, 4 }
 0x19e   :  { %v801_v12 = vsel %vm158_vm2, 0.0, %v800_v2  ;;  %v834_v20 = vrot.slane %v805_v35, 4  ;;  %v837_v21 = vsel %vm158_vm2, %v805_v35, %v836_v18  ;;  %v691_v33 = vsel %vm158_vm2, 0.0, %v690_v9 }
 0x19f   :  { %v809_v22 = vperm.slane %v801_v12, %v5257_v24  ;;  %v724_v37 = vrot.slane %v695_v4, 4  ;;  %v727_v36 = vsel %vm158_vm2, %v695_v4, %v726_v42  ;;  %v699_v51 = vperm.slane %v691_v33, %v5257_v24  ;;  %v5663_v42 = vpop.permute.xlu0 %1122 }
 0x1a0   :  { %v735_v7 = vperm.slane %v727_v36, %v5282_v0  ;;  %v835_v47 = vsel %vm158_vm2, %v834_v20, %v795_v38  ;;  %v845_v60 = vperm.slane %v837_v21, %v5282_v0  ;;  %v758_v9 = vrot.slane %v5625_v44, 4 }
 0x1a1   :  { %v846_v31 = vrot.slane %v809_v22, 4  ;;  %v725_v61 = vsel %vm158_vm2, %v724_v37, %v685_v62  ;;  %v841_v11 = vperm.slane %v835_v47, %v5282_v0  ;;  %v736_v18 = vrot.slane %v699_v51, 4 }
 0x1a2   :  { %v731_v63 = vperm.slane %v725_v61, %v5282_v0  ;;  %v739_v2 = vsel %vm158_vm2, %v699_v51, %v738_v16  ;;  %v849_v35 = vsel %vm158_vm2, %v809_v22, %v848_v23  ;;  %v752_v4 = vrot.slane %v735_v7, 4 }
 0x1a3   :  { %v747_v38 = vperm.slane %v739_v2, %v5282_v0  ;;  %v847_v62 = vsel %vm158_vm2, %v846_v31, %v799_v32  ;;  %v868_v12 = vrot.slane %v5645_v5, 4  ;;  %v872_v20 = vrot.slane %v5632_v52, 4 }
 0x1a4   :  { %v737_v21 = vsel %vm158_vm2, %v736_v18, %v689_v1  ;;  %v748_v33 = vrot.slane %v731_v63, 4  ;;  %v755_v23 = vsel %vm158_vm2, %v735_v7, %v754_v50  ;;  %v857_v36 = vperm.slane %v849_v35, %v5282_v0 }
 0x1a5   :  { %v743_v37 = vperm.slane %v737_v21, %v5282_v0  ;;  %v760_v22 = vrot.slane %v747_v38, 4  ;;  %v853_v51 = vperm.slane %v847_v62, %v5282_v0  ;;  %v858_v32 = vrot.slane %v841_v11, 4 }
 0x1a6   :  { %v749_v16 = vsel %vm158_vm2, %v748_v33, %v5605_v49  ;;  %v862_v47 = vrot.slane %v845_v60, 4  ;;  %v751_v31 = vsel %vm158_vm2, %v731_v63, %v750_v34  ;;  %v753_v1 = vsel %vm158_vm2, %v752_v4, %v5608_v6 }
 0x1a7   :  { %v5683_v61 = vsel %vm158_vm2, %v747_v38, %v762_v46  ;;  %v861_v50 = vsel %vm158_vm2, %v841_v11, %v860_v45  ;;  %v756_v7 = vrot.slane %v743_v37, 4  ;;  %v5687_v18 = vsel %vm158_vm2, %v743_v37, %v758_v9  ;;  %v5709_v38 = vpop.permute.xlu1 %1124  ;;  %v4863_v21 = vpop.permute.xlu0 %4862 }
 0x1a8   :  { %v5691_v2 = vsel %vm158_vm2, %v760_v22, %v5614_v19  ;;  %v865_v49 = vsel %vm158_vm2, %v845_v60, %v864_v10  ;;  %v859_v34 = vsel %vm158_vm2, %v858_v32, %v5618_v43  ;;  %v863_v6 = vsel %vm158_vm2, %v862_v47, %v5621_v28  ;;  %4892 = vrot.lane.b32.xlu0 %v4863_v21, %s5147_s27 }
 0x1a9   :  { %v870_v46 = vrot.slane %v857_v36, 4  ;;  %v876_v63 = vrot.slane %v749_v16, 4  ;;  %v866_v35 = vrot.slane %v853_v51, 4  ;;  %v5699_v45 = vsel %vm158_vm2, %v853_v51, %v868_v12 }
 0x1aa   :  { %v886_v11 = vrot.slane %v755_v23, 4  ;;  %v888_v9 = vrot.slane %v751_v31, 4  ;;  %v5706_v10 = vsel %vm158_vm2, %v857_v36, %v872_v20  ;;  %v874_v60 = vrot.slane %v753_v1, 4 }
 0x1ab   :  { %v5703_v19 = vsel %vm158_vm2, %v870_v46, %v5632_v52  ;;  %v898_v43 = vrot.slane %v5691_v2, 4  ;;  %v910_v4 = vrot.slane %v5683_v61, 4  ;;  %v986_v62 = vrot.slane %v859_v34, 4 }
 0x1ac   :  { %v889_v28 = vsel %vm158_vm2, %v755_v23, %v888_v9  ;;  %v996_v12 = vrot.slane %v865_v49, 4  ;;  %v5714_v33 = vsel %vm158_vm2, %v753_v1, %v876_v63  ;;  %v912_v52 = vrot.slane %v5687_v18, 4 }
 0x1ad   :  { %v984_v37 = vrot.slane %v863_v6, 4  ;;  %v998_v20 = vrot.slane %v861_v50, 4  ;;  %v887_v22 = vsel %vm158_vm2, %v886_v11, %v751_v31  ;;  %v5719_v36 = vperm.slane %v889_v28, %v5257_v24 }
 0x1ae   :  { %v1008_v51 = vrot.slane %v5703_v19, 4  ;;  %v4881_v23 = vpack.i.bf16 %v5709_v38, %v5663_v42  ;;  %v1020_v47 = vrot.slane %v5706_v10, 4  ;;  %v5727_v1 = vsel %vm158_vm2, %v863_v6, %v986_v62 }
 0x1af   :  { %v999_v32 = vsel %vm158_vm2, %v865_v49, %v998_v20  ;;  %v997_v46 = vsel %vm158_vm2, %v996_v12, %v861_v50  ;;  %v1022_v63 = vrot.slane %v5699_v45, 4  ;;  %v5734_v31 = vsel %vm158_vm2, %v756_v7, %v5625_v44  ;;  %v4868_v3 = vpop.permute.xlu0 %4867 }
 0x1b0   :  { %4882 = vrot.lane.b32.xlu1 %v4881_v23, %s5147_s27  ;;  %v5738_v11 = vsel %vm158_vm2, %v866_v35, %v5645_v5  ;;  %v875_v49 = vsel %vm158_vm2, %v874_v60, %v749_v16  ;;  %v893_v9 = vperm.slane %v887_v22, %v5257_v24  ;;  %v5743_v6 = vperm.slane %v999_v32, %v5257_v24 }
 0x1b1   :  { %v881_v50 = vperm.slane %v875_v49, %v5257_v24  ;;  %v899_v28 = vsel %vm158_vm2, %v898_v43, %v5734_v31  ;;  %v900_v62 = vrot.slane %v5734_v31, 4  ;;  %v911_v5 = vsel %vm158_vm2, %v910_v4, %v5687_v18 }
 0x1b2   :  { %v905_v44 = vperm.slane %v899_v28, %v5257_v24  ;;  %v922_v16 = vrot.slane %v893_v9, 4  ;;  %v985_v7 = vsel %vm158_vm2, %v984_v37, %v859_v34  ;;  %v917_v35 = vperm.slane %v911_v5, %v5257_v24 }
 0x1b3   :  { %v991_v60 = vperm.slane %v985_v7, %v5257_v24  ;;  %v1003_v12 = vperm.slane %v997_v46, %v5257_v24  ;;  %v1009_v43 = vsel %vm158_vm2, %v1008_v51, %v5738_v11  ;;  %v1010_v21 = vrot.slane %v5738_v11, 4 }
 0x1b4   :  { %v923_v20 = vsel %vm158_vm2, %v922_v16, %v881_v50  ;;  %v1015_v22 = vperm.slane %v1009_v43, %v5257_v24  ;;  %v1021_v4 = vsel %vm158_vm2, %v1020_v47, %v5699_v45  ;;  %v946_v37 = vrot.slane %v917_v35, 4 }
 0x1b5   :  { %v929_v34 = vperm.slane %v923_v20, %v5282_v0  ;;  %v1027_v23 = vperm.slane %v1021_v4, %v5257_v24  ;;  %v1032_v32 = vrot.slane %v1003_v12, 4  ;;  %v924_v31 = vrot.slane %v881_v50, 4 }
 0x1b6   :  { %v948_v46 = vrot.slane %v905_v44, 4  ;;  %v1034_v49 = vrot.slane %v991_v60, 4  ;;  %v1058_v28 = vrot.slane %v1015_v22, 4  ;;  %v947_v51 = vsel %vm158_vm2, %v946_v37, %v905_v44 }
 0x1b7   :  { %v972_v11 = vrot.slane %v929_v34, 4  ;;  %v1033_v5 = vsel %vm158_vm2, %v1032_v32, %v991_v60  ;;  %v1056_v16 = vrot.slane %v1027_v23, 4  ;;  %v953_v47 = vperm.slane %v947_v51, %v5282_v0 }
 0x1b8   :  { %4897 = vrot.lane.b32.xlu1 %v5304_v25, %s5147_s27  ;;  %v1039_v7 = vperm.slane %v1033_v5, %v5282_v0  ;;  %v925_v43 = vsel %vm158_vm2, %v893_v9, %v924_v31  ;;  %v949_v50 = vsel %vm158_vm2, %v917_v35, %v948_v46  ;;  %v1035_v44 = vsel %vm158_vm2, %v1003_v12, %v1034_v49 }
 0x1b9   :  { %v1057_v20 = vsel %vm158_vm2, %v1056_v16, %v1015_v22  ;;  %v5776_v4 = vperm.slane %v925_v43, %v5282_v0  ;;  %v5779_v25 = vperm.slane %v949_v50, %v5282_v0  ;;  %v973_v60 = vsel %vm158_vm2, %v953_v47, %v972_v11 }
 0x1ba   :  { %v1063_v37 = vperm.slane %v1057_v20, %v5282_v0  ;;  %v1082_v32 = vrot.slane %v1039_v7, 4  ;;  %v970_v51 = vrot.slane %v953_v47, 4  ;;  %v1096_v5 = vpack.c.bf16 %v973_v60, %v973_v60 }
 0x1bb   :  { %v976_v9 = vrot.slane %v5776_v4, 4  ;;  %v5786_v35 = vperm.slane %v1035_v44, %v5282_v0  ;;  %v1059_v22 = vsel %vm158_vm2, %v1027_v23, %v1058_v28  ;;  %v5798_v23 = vperm.slane %v5714_v33, %v5257_v24 }
 0x1bc   :  { %v1083_v31 = vsel %vm158_vm2, %v1063_v37, %v1082_v32  ;;  %v971_v46 = vsel %vm158_vm2, %v970_v51, %v929_v34  ;;  %v1080_v16 = vrot.slane %v1063_v37, 4  ;;  %v1067_v12 = vperm.slane %v1059_v22, %v5282_v0 }
 0x1bd   :  { %v1097_v49 = vpack.c.bf16 %v1083_v31, %v1083_v31  ;;  %v1663_v11 = vunpack.c.l.b16 %v1096_v5  ;;  %v1094_v43 = vpack.c.bf16 %v971_v46, %v971_v46  ;;  %v977_v47 = vsel %vm158_vm2, %v5779_v25, %v976_v9 }
 0x1be   :  { %v1081_v50 = vsel %vm158_vm2, %v1080_v16, %v1039_v7  ;;  %v1086_v20 = vrot.slane %v5786_v35, 4  ;;  %v1100_v44 = vpack.c.bf16 %v977_v47, %v977_v47  ;;  %v901_v37 = vsel %vm158_vm2, %v5691_v2, %v900_v62 }
 0x1bf   :  { %v1664_v28 = vunpack.c.l.b16 %v1097_v49  ;;  %v1095_v34 = vpack.c.bf16 %v1081_v50, %v1081_v50  ;;  %v1633_v60 = vunpack.c.l.b16 %v1094_v43  ;;  %v909_v5 = vperm.slane %v901_v37, %v5257_v24 }
 0x1c0   :  { %v1087_v32 = vsel %vm158_vm2, %v1067_v12, %v1086_v20  ;;  %v1723_v51 = vunpack.c.l.b16 %v1100_v44  ;;  %v913_v7 = vsel %vm158_vm2, %v5683_v61, %v912_v52  ;;  %v934_v46 = vrot.slane %v5719_v36, 4  ;;  %v4858_v44 = vpop.permute.xlu2 %4857 }
 0x1c1   :  { %v1665_v9 = vpack.c.b16 %v1664_v28, %v1663_v11  ;;  %v1634_v22 = vunpack.c.l.b16 %v1095_v34  ;;  %v1101_v33 = vpack.c.bf16 %v1087_v32, %v1087_v32  ;;  %v921_v31 = vperm.slane %v913_v7, %v5257_v24  ;;  %4887 = vrot.lane.b32.xlu2 %v4858_v44, %s5147_s27 }
 0x1c2   :  { %v960_v16 = vrot.slane %v909_v5, 4  ;;  %v5812_v2 = vperm.slane %v5727_v1, %v5257_v24  ;;  %v1011_v62 = vsel %vm158_vm2, %v5703_v19, %v1010_v21  ;;  %v935_v52 = vsel %vm158_vm2, %v934_v46, %v5798_v23 }
 0x1c3   :  { %v1670_v18 = vsel %vm80_vm1, %v1665_v9, 0  ;;  %v1635_v49 = vpack.c.b16 %v1634_v22, %v1633_v60  ;;  %v1724_v43 = vunpack.c.l.b16 %v1101_v33  ;;  %v958_v61 = vrot.slane %v921_v31, 4 }
 0x1c4   :  { %1679 = vmatpush.bf16.xpose.msra.mxu3 %v1670_v18  ;;  %v1019_v11 = vperm.slane %v1011_v62, %v5257_v24  ;;  %v1023_v1 = vsel %vm158_vm2, %v5706_v10, %v1022_v63  ;;  %v1044_v47 = vrot.slane %v5743_v6, 4  ;;  %v941_v50 = vperm.slane %v935_v52, %v5282_v0 }
 0x1c5   :  { %v1640_v19 = vsel %vm80_vm1, %v1635_v49, 0  ;;  %v1725_v21 = vpack.c.b16 %v1724_v43, %v1723_v51  ;;  %v959_v20 = vsel %vm158_vm2, %v958_v61, %v909_v5  ;;  %v1031_v34 = vperm.slane %v1023_v1, %v5257_v24 }
 0x1c6   :  { %1649 = vmatpush.bf16.xpose.msra.mxu2 %v1640_v19  ;;  %v965_v28 = vperm.slane %v959_v20, %v5282_v0  ;;  %v1045_v45 = vsel %vm158_vm2, %v1044_v47, %v5812_v2  ;;  %v1070_v60 = vrot.slane %v1019_v11, 4  ;;  %v980_v63 = vrot.slane %v941_v50, 4 }
 0x1c7   :  { %v1730_v10 = vsel %vm80_vm1, %v1725_v21, 0  ;;  %v1051_v37 = vperm.slane %v1045_v45, %v5282_v0  ;;  %v974_v32 = vrot.slane %v5779_v25, 4  ;;  %v1068_v51 = vrot.slane %v1031_v34, 4 }
 0x1c8   :  { %1739 = vmatpush.bf16.xpose.msrb.mxu1 %v1730_v10  ;;  %v1084_v5 = vrot.slane %v1067_v12, 4  ;;  %v978_v7 = vrot.slane %v965_v28, 4  ;;  %v981_v9 = vsel %vm158_vm2, %v965_v28, %v980_v63  ;;  %v961_v19 = vsel %vm158_vm2, %v921_v31, %v960_v16 }
 0x1c9   :  { %v1090_v22 = vrot.slane %v1051_v37, 4  ;;  %v975_v33 = vsel %vm158_vm2, %v974_v32, %v5776_v4  ;;  %v1069_v46 = vsel %vm158_vm2, %v1068_v51, %v1019_v11  ;;  %v1104_v62 = vpack.c.bf16 %v981_v9, %v981_v9 }
 0x1ca   :  { %v1085_v18 = vsel %vm158_vm2, %v1084_v5, %v5786_v35  ;;  %v1098_v49 = vpack.c.bf16 %v975_v33, %v975_v33  ;;  %v1075_v43 = vperm.slane %v1069_v46, %v5282_v0  ;;  %v979_v61 = vsel %vm158_vm2, %v978_v7, %v941_v50 }
 0x1cb   :  { %v1099_v25 = vpack.c.bf16 %v1085_v18, %v1085_v18  ;;  %4710 = vmatmul.msk.bf16.vlgmr.msra.gmra.mxu3 %vm80_vm1, %v1660_v53  ;;  %v1783_v12 = vunpack.c.l.b16 %v1104_v62  ;;  %v1102_v4 = vpack.c.bf16 %v979_v61, %v979_v61  ;;  %v936_v11 = vrot.slane %v5798_v23, 4 }
 0x1cc   :  { %v1693_v52 = vunpack.c.l.b16 %v1098_v49  ;;  %v1091_v1 = vsel %vm158_vm2, %v1075_v43, %v1090_v22  ;;  %v1088_v35 = vrot.slane %v1075_v43, 4  ;;  %v969_v23 = vperm.slane %v961_v19, %v5282_v0 }
 0x1cd   :  { %v1694_v47 = vunpack.c.l.b16 %v1099_v25  ;;  %4709 = vmatmul.msk.bf16.vlgmr.msra.gmra.mxu2 %vm80_vm1, %v1630_v54  ;;  %v1105_v39 = vpack.c.bf16 %v1091_v1, %v1091_v1  ;;  %v1753_v48 = vunpack.c.l.b16 %v1102_v4  ;;  %v937_v53 = vsel %vm158_vm2, %v5719_v36, %v936_v11 }
 0x1ce   :  { %v1089_v50 = vsel %vm158_vm2, %v1088_v35, %v1051_v37  ;;  %v945_v20 = vperm.slane %v937_v53, %v5282_v0  ;;  %v1046_v31 = vrot.slane %v5812_v2, 4  ;;  %v982_v54 = vrot.slane %v969_v23, 4 }
 0x1cf   :  { %v1695_v21 = vpack.c.b16 %v1694_v47, %v1693_v52  ;;  %4712 = vmatmul.msk.bf16.vlgmr.msrb.gmra.mxu1 %vm80_vm1, %v1720_v13  ;;  %v1784_v40 = vunpack.c.l.b16 %v1105_v39  ;;  %v1103_v15 = vpack.c.bf16 %v1089_v50, %v1089_v50  ;;  %v1071_v16 = vsel %vm158_vm2, %v1031_v34, %v1070_v60 }
 0x1d0   :  { %v1047_v44 = vsel %vm158_vm2, %v5743_v6, %v1046_v31  ;;  %v1079_v28 = vperm.slane %v1071_v16, %v5282_v0  ;;  %v983_v10 = vsel %vm158_vm2, %v982_v54, %v945_v20  ;;  %v4869_v9 = vunpack.i.l.bf16 %v4868_v3 }
 0x1d1   :  { %v1700_v36 = vsel %vm80_vm1, %v1695_v21, 0  ;;  %v1785_v45 = vpack.c.b16 %v1784_v40, %v1783_v12  ;;  %v1754_v2 = vunpack.c.l.b16 %v1103_v15  ;;  %v1055_v14 = vperm.slane %v1047_v44, %v5282_v0 }
 0x1d2   :  { %1709 = vmatpush.bf16.xpose.msrb.mxu0 %v1700_v36  ;;  %v1092_v26 = vrot.slane %v1079_v28, 4  ;;  %v1106_v13 = vpack.c.bf16 %v983_v10, %v983_v10  ;;  %v4870_v17 = vunpack.i.h.bf16 %v4868_v3  ;;  %v1174_v27 = vrot.slane %v4869_v9, 4 }
 0x1d3   :  { %v1790_v63 = vsel %vm80_vm1, %v1785_v45, 0  ;;  %v1755_v37 = vpack.c.b16 %v1754_v2, %v1753_v48 }
 0x1d4   :  { %1799 = vmatpush.bf16.xpose.msrb.mxu3 %v1790_v63  ;;  %v1093_v34 = vsel %vm158_vm2, %v1092_v26, %v1055_v14  ;;  %v1813_v32 = vunpack.c.l.b16 %v1106_v13  ;;  %v1284_v8 = vrot.slane %v4870_v17, 4 }
 0x1d5   :  { %v1760_v60 = vsel %vm80_vm1, %v1755_v37, 0  ;;  %v1107_v6 = vpack.c.bf16 %v1093_v34, %v1093_v34 }
 0x1d6   :  { %1769 = vmatpush.bf16.xpose.msrb.mxu2 %v1760_v60 }
 0x1d7   :  { %v1814_v51 = vunpack.c.l.b16 %v1107_v6 }
 0x1d9   :  { %4711 = vmatmul.msk.bf16.vlgmr.msrb.gmra.mxu0 %vm80_vm1, %v1690_v55  ;;  %v1815_v5 = vpack.c.b16 %v1814_v51, %v1813_v32 }
 0x1db   :  { %v1820_v7 = vsel %vm80_vm1, %v1815_v5, 0  ;;  %4714 = vmatmul.msk.bf16.vlgmr.msrb.gmra.mxu3 %vm80_vm1, %v1780_v30 }
 0x1dc   :  { %1829 = vmatpush.bf16.xpose.msra.mxu0 %v1820_v7 }
 0x1dd   :  { %4713 = vmatmul.msk.bf16.vlgmr.msrb.gmra.mxu2 %vm80_vm1, %v1750_v57 }
 0x1e0   :  { %v4878_v29 = vpop.permute.xlu2 %4877 }
 0x1e1   :  { %v4880_v22 = vunpack.i.h.bf16 %v4878_v29  ;;  %v4879_v33 = vunpack.i.l.bf16 %v4878_v29 }
 0x1e3   :  { %v1282_v30 = vrot.slane %v4880_v22, 4  ;;  %v1172_v46 = vrot.slane %v4879_v33, 4  ;;  %v1175_v62 = vsel %vm158_vm2, %v4879_v33, %v1174_v27  ;;  %v1285_v58 = vsel %vm158_vm2, %v4880_v22, %v1284_v8 }
 0x1e4   :  { %v5895_v57 = vperm.slane %v1175_v62, %v5257_v24  ;;  %v5900_v61 = vperm.slane %v1285_v58, %v5257_v24 }
 0x1e5   :  { %v1173_v41 = vsel %vm158_vm2, %v1172_v46, %v4869_v9  ;;  %v1283_v56 = vsel %vm158_vm2, %v1282_v30, %v4870_v17 }
 0x1e6   :  { %v5905_v11 = vperm.slane %v1173_v41, %v5257_v24  ;;  %v1232_v1 = vrot.slane %v5895_v57, 4  ;;  %v5909_v47 = vperm.slane %v1283_v56, %v5257_v24  ;;  %v1342_v40 = vrot.slane %v5900_v61, 4 }
 0x1e8   :  { %v1220_v36 = vrot.slane %v5905_v11, 4 }
 0x1e9   :  { %4715 = vmatmul.msk.bf16.vlgmr.msra.gmra.mxu0 %vm80_vm1, %v1810_v59 }
 0x207   :  { %v4873_v55 = vpop.permute.xlu1 %4872 }
 0x208   :  { %v4875_v18 = vunpack.i.h.bf16 %v4873_v55  ;;  %v4874_v49 = vunpack.i.l.bf16 %v4873_v55 }
 0x20a   :  { %v1308_v19 = vrot.slane %v4875_v18, 4  ;;  %v1198_v39 = vrot.slane %v4874_v49, 4 }
 0x21a   :  { %v5902_v4 = vpop.permute.xlu0 %4892 }
 0x21b   :  { %v4888_v20 = vpop.permute.xlu2 %4887  ;;  %v4895_v31 = vunpack.i.h.bf16 %v5902_v4  ;;  %v4894_v16 = vunpack.i.l.bf16 %v5902_v4 }
 0x21c   :  { %v4890_v15 = vunpack.i.h.bf16 %v4888_v20  ;;  %v4889_v54 = vunpack.i.l.bf16 %v4888_v20 }
 0x21d   :  { %v1294_v60 = vrot.slane %v4895_v31, 4  ;;  %v1184_v5 = vrot.slane %v4894_v16, 4 }
 0x21e   :  { %v1306_v10 = vrot.slane %v4890_v15, 4  ;;  %v1309_v14 = vsel %vm158_vm2, %v4890_v15, %v1308_v19  ;;  %v1196_v26 = vrot.slane %v4889_v54, 4  ;;  %v1199_v13 = vsel %vm158_vm2, %v4889_v54, %v1198_v39 }
 0x21f   :  { %v1317_v37 = vperm.slane %v1309_v14, %v5257_v24  ;;  %v1207_v34 = vperm.slane %v1199_v13, %v5257_v24 }
 0x220   :  { %v1307_v6 = vsel %vm158_vm2, %v1306_v10, %v4875_v18  ;;  %v1197_v32 = vsel %vm158_vm2, %v1196_v26, %v4874_v49 }
 0x221   :  { %v1313_v7 = vperm.slane %v1307_v6, %v5257_v24  ;;  %v1366_v3 = vrot.slane %v1317_v37, 4  ;;  %v1203_v29 = vperm.slane %v1197_v32, %v5257_v24  ;;  %v1256_v9 = vrot.slane %v1207_v34, 4 }
 0x222   :  { %v4883_v59 = vpop.permute.xlu1 %4882 }
 0x223   :  { %v4885_v43 = vunpack.i.h.bf16 %v4883_v59  ;;  %v4884_v25 = vunpack.i.l.bf16 %v4883_v59  ;;  %v1354_v27 = vrot.slane %v1313_v7, 4  ;;  %v1244_v46 = vrot.slane %v1203_v29, 4 }
 0x225   :  { %v1318_v12 = vrot.slane %v4885_v43, 4  ;;  %v1208_v52 = vrot.slane %v4884_v25, 4  ;;  %v1323_v35 = vperm.slane %v4885_v43, %v5257_v24  ;;  %v1213_v21 = vperm.slane %v4884_v25, %v5257_v24 }
 0x226   :  { %v1330_v25 = vrot.slane %v5909_v47, 4 }
 0x227   :  { %v1319_v48 = vsel %vm158_vm2, 0.0, %v1318_v12  ;;  %v1209_v53 = vsel %vm158_vm2, 0.0, %v1208_v52  ;;  %v1352_v44 = vrot.slane %v1323_v35, 4  ;;  %v1242_v63 = vrot.slane %v1213_v21, 4 }
 0x228   :  { %v1327_v23 = vperm.slane %v1319_v48, %v5257_v24  ;;  %v1217_v50 = vperm.slane %v1209_v53, %v5257_v24  ;;  %v1245_v59 = vsel %vm158_vm2, %v1213_v21, %v1244_v46  ;;  %v1355_v49 = vsel %vm158_vm2, %v1323_v35, %v1354_v27 }
 0x229   :  { %v1243_v30 = vsel %vm158_vm2, %v1242_v63, %v1203_v29  ;;  %v1353_v62 = vsel %vm158_vm2, %v1352_v44, %v1313_v7  ;;  %v5949_v12 = vperm.slane %v1245_v59, %v5282_v0  ;;  %v1363_v52 = vperm.slane %v1355_v49, %v5282_v0 }
 0x22a   :  { %v1364_v28 = vrot.slane %v1327_v23, 4  ;;  %v1254_v45 = vrot.slane %v1217_v50, 4  ;;  %v4898_v2 = vpop.permute.xlu1 %4897  ;;  %v5937_v8 = vperm.slane %v1243_v30, %v5282_v0  ;;  %v1257_v41 = vsel %vm158_vm2, %v1217_v50, %v1256_v9 }
 0x22b   :  { %v4900_v51 = vunpack.i.h.bf16 %v4898_v2  ;;  %v4899_v17 = vunpack.i.l.bf16 %v4898_v2  ;;  %v1359_v56 = vperm.slane %v1353_v62, %v5282_v0  ;;  %v5943_v18 = vperm.slane %v1257_v41, %v5282_v0 }
 0x22c   :  { %v1255_v55 = vsel %vm158_vm2, %v1254_v45, %v1207_v34  ;;  %v1365_v33 = vsel %vm158_vm2, %v1364_v28, %v1317_v37  ;;  %v1367_v43 = vsel %vm158_vm2, %v1327_v23, %v1366_v3  ;;  %v1266_v19 = vrot.slane %v5937_v8, 4 }
 0x22d   :  { %v5931_v22 = vperm.slane %v1255_v55, %v5282_v0  ;;  %v1296_v58 = vrot.slane %v4900_v51, 4  ;;  %v1371_v4 = vperm.slane %v1365_v33, %v5282_v0  ;;  %v1375_v48 = vperm.slane %v1367_v43, %v5282_v0 }
 0x22e   :  { %v1186_v53 = vrot.slane %v4899_v17, 4  ;;  %v1270_v35 = vrot.slane %v5949_v12, 4  ;;  %v1278_v23 = vrot.slane %v5943_v18, 4  ;;  %v1376_v21 = vrot.slane %v1359_v56, 4 }
 0x22f   :  { %v1274_v39 = vrot.slane %v5931_v22, 4  ;;  %v1295_v50 = vsel %vm158_vm2, %v1294_v60, %v4900_v51  ;;  %v1380_v20 = vrot.slane %v1363_v52, 4  ;;  %v1297_v15 = vsel %vm158_vm2, %v4895_v31, %v1296_v58 }
 0x230   :  { %v1301_v54 = vperm.slane %v1295_v50, %v5257_v24  ;;  %v1185_v44 = vsel %vm158_vm2, %v1184_v5, %v4899_v17  ;;  %v1384_v28 = vrot.slane %v1371_v4, 4  ;;  %v1305_v45 = vperm.slane %v1297_v15, %v5257_v24 }
 0x231   :  { %v1187_v2 = vsel %vm158_vm2, %v4894_v16, %v1186_v53  ;;  %v1191_v10 = vperm.slane %v1185_v44, %v5257_v24  ;;  %v1388_v14 = vrot.slane %v1375_v48, 4 }
 0x232   :  { %v1328_v26 = vrot.slane %v1301_v54, 4  ;;  %v1331_v13 = vsel %vm158_vm2, %v1301_v54, %v1330_v25  ;;  %v1195_v63 = vperm.slane %v1187_v2, %v5257_v24  ;;  %v1340_v31 = vrot.slane %v1305_v45, 4 }
 0x233   :  { %v1339_v37 = vperm.slane %v1331_v13, %v5282_v0  ;;  %v1343_v34 = vsel %vm158_vm2, %v1305_v45, %v1342_v40  ;;  %v1218_v60 = vrot.slane %v1191_v10, 4  ;;  %v1221_v32 = vsel %vm158_vm2, %v1191_v10, %v1220_v36 }
 0x234   :  { %v1329_v6 = vsel %vm158_vm2, %v1328_v26, %v5909_v47  ;;  %v1351_v16 = vperm.slane %v1343_v34, %v5282_v0  ;;  %v1230_v51 = vrot.slane %v1195_v63, 4  ;;  %v1341_v7 = vsel %vm158_vm2, %v1340_v31, %v5900_v61 }
 0x235   :  { %v1335_v5 = vperm.slane %v1329_v6, %v5282_v0  ;;  %v1381_v3 = vsel %vm158_vm2, %v1380_v20, %v1339_v37  ;;  %v1382_v29 = vrot.slane %v1339_v37, 4  ;;  %v1347_v40 = vperm.slane %v1341_v7, %v5282_v0 }
 0x236   :  { %v1389_v55 = vsel %vm158_vm2, %v1388_v14, %v1351_v16  ;;  %v1390_v47 = vrot.slane %v1351_v16, 4  ;;  %v1502_v9 = vrot.slane %v1381_v3, 4  ;;  %v1219_v50 = vsel %vm158_vm2, %v1218_v60, %v5905_v11 }
 0x237   :  { %v1377_v33 = vsel %vm158_vm2, %v1376_v21, %v1335_v5  ;;  %v1378_v17 = vrot.slane %v1335_v5, 4  ;;  %v5985_v36 = vsel %vm158_vm2, %v1363_v52, %v1382_v29  ;;  %v1526_v27 = vrot.slane %v1389_v55, 4 }
 0x238   :  { %v1385_v30 = vsel %vm158_vm2, %v1384_v28, %v1347_v40  ;;  %v1386_v46 = vrot.slane %v1347_v40, 4  ;;  %v1391_v61 = vsel %vm158_vm2, %v1375_v48, %v1390_v47  ;;  %v1504_v62 = vrot.slane %v1377_v33, 4 }
 0x239   :  { %v5990_v41 = vsel %vm158_vm2, %v1359_v56, %v1378_v17  ;;  %v1514_v58 = vrot.slane %v5985_v36, 4  ;;  %v1527_v59 = vsel %vm158_vm2, %v1526_v27, %v1385_v30  ;;  %v1528_v49 = vrot.slane %v1385_v30, 4 }
 0x23a   :  { %v1387_v43 = vsel %vm158_vm2, %v1371_v4, %v1386_v46  ;;  %v5996_v25 = vsel %vm158_vm2, %v1381_v3, %v1504_v62  ;;  %v1516_v52 = vrot.slane %v5990_v41, 4  ;;  %v6000_v53 = vperm.slane %v1527_v59, %v5257_v24 }
 0x23b   :  { %v1529_v48 = vsel %vm158_vm2, %v1389_v55, %v1528_v49  ;;  %v1538_v21 = vrot.slane %v1391_v61, 4  ;;  %v1540_v56 = vrot.slane %v1387_v43, 4  ;;  %v1225_v4 = vperm.slane %v1219_v50, %v5282_v0 }
 0x23c   :  { %v6006_v20 = vperm.slane %v1529_v48, %v5257_v24  ;;  %v1229_v15 = vperm.slane %v1221_v32, %v5282_v0  ;;  %v1231_v54 = vsel %vm158_vm2, %v1230_v51, %v5895_v57  ;;  %v1233_v28 = vsel %vm158_vm2, %v1195_v63, %v1232_v1 }
 0x23d   :  { %v6013_v44 = vsel %vm158_vm2, %v1391_v61, %v1540_v56  ;;  %v1237_v45 = vperm.slane %v1231_v54, %v5282_v0  ;;  %v1503_v11 = vsel %vm158_vm2, %v1502_v9, %v1377_v33  ;;  %v1241_v2 = vperm.slane %v1233_v28, %v5282_v0 }
 0x23e   :  { %v1267_v10 = vsel %vm158_vm2, %v1266_v19, %v1225_v4  ;;  %v1268_v14 = vrot.slane %v1225_v4, 4  ;;  %v1271_v26 = vsel %vm158_vm2, %v1270_v35, %v1229_v15  ;;  %v1272_v13 = vrot.slane %v1229_v15, 4 }
 0x23f   :  { %v1275_v57 = vsel %vm158_vm2, %v1274_v39, %v1237_v45  ;;  %v1276_v1 = vrot.slane %v1237_v45, 4  ;;  %v1392_v63 = vrot.slane %v1271_v26, 4  ;;  %v1279_v19 = vsel %vm158_vm2, %v1278_v23, %v1241_v2 }
 0x240   :  { %v6032_v37 = vsel %vm158_vm2, %v5937_v8, %v1268_v14  ;;  %v1280_v31 = vrot.slane %v1241_v2, 4  ;;  %v1394_v34 = vrot.slane %v1267_v10, 4  ;;  %v6039_v35 = vsel %vm158_vm2, %v5949_v12, %v1272_v13 }
 0x241   :  { %v1277_v60 = vsel %vm158_vm2, %v5931_v22, %v1276_v1  ;;  %v1406_v39 = vrot.slane %v6032_v37, 4  ;;  %v1416_v6 = vrot.slane %v1279_v19, 4  ;;  %v1404_v23 = vrot.slane %v6039_v35, 4 }
 0x242   :  { %v1281_v8 = vsel %vm158_vm2, %v5943_v18, %v1280_v31  ;;  %v6047_v16 = vsel %vm158_vm2, %v1271_v26, %v1394_v34  ;;  %v1418_v32 = vrot.slane %v1275_v57, 4  ;;  %v1430_v12 = vrot.slane %v1277_v60, 4 }
 0x243   :  { %v1417_v51 = vsel %vm158_vm2, %v1416_v6, %v1275_v57  ;;  %v1428_v5 = vrot.slane %v1281_v8, 4  ;;  %v1393_v7 = vsel %vm158_vm2, %v1392_v63, %v1267_v10  ;;  %v1405_v18 = vsel %vm158_vm2, %v1404_v23, %v6032_v37 }
 0x244   :  { %v1419_v22 = vsel %vm158_vm2, %v1279_v19, %v1418_v32  ;;  %v1423_v3 = vperm.slane %v1417_v51, %v5257_v24  ;;  %v1399_v29 = vperm.slane %v1393_v7, %v5257_v24  ;;  %v6061_v55 = vsel %vm158_vm2, %v1281_v8, %v1430_v12 }
 0x245   :  { %v6058_v40 = vperm.slane %v1419_v22, %v5257_v24  ;;  %v1411_v47 = vperm.slane %v1405_v18, %v5257_v24  ;;  %v1429_v9 = vsel %vm158_vm2, %v1428_v5, %v1277_v60  ;;  %v1509_v30 = vperm.slane %v1503_v11, %v5257_v24 }
 0x246   :  { %v1435_v33 = vperm.slane %v1429_v9, %v5257_v24  ;;  %v1442_v17 = vrot.slane %v1399_v29, 4  ;;  %v1466_v27 = vrot.slane %v1423_v3, 4  ;;  %v1515_v46 = vsel %vm158_vm2, %v1514_v58, %v5990_v41 }
 0x247   :  { %v1539_v61 = vsel %vm158_vm2, %v1538_v21, %v1387_v43  ;;  %v1576_v62 = vrot.slane %v6000_v53, 4  ;;  %v1440_v59 = vrot.slane %v1411_v47, 4  ;;  %v1521_v56 = vperm.slane %v1515_v46, %v5257_v24 }
 0x248   :  { %v1443_v49 = vsel %vm158_vm2, %v1411_v47, %v1442_v17  ;;  %v1467_v48 = vsel %vm158_vm2, %v1435_v33, %v1466_v27  ;;  %v1545_v50 = vperm.slane %v1539_v61, %v5257_v24  ;;  %v1552_v54 = vrot.slane %v1509_v30, 4 }
 0x249   :  { %v1451_v4 = vperm.slane %v1443_v49, %v5282_v0  ;;  %v1475_v15 = vperm.slane %v1467_v48, %v5282_v0  ;;  %v1441_v58 = vsel %vm158_vm2, %v1440_v59, %v1399_v29  ;;  %v1464_v28 = vrot.slane %v1435_v33, 4 }
 0x24a   :  { %v1577_v43 = vsel %vm158_vm2, %v1545_v50, %v1576_v62  ;;  %v1447_v21 = vperm.slane %v1441_v58, %v5282_v0  ;;  %v1550_v45 = vrot.slane %v1521_v56, 4  ;;  %v1553_v2 = vsel %vm158_vm2, %v1521_v56, %v1552_v54 }
 0x24b   :  { %v1492_v11 = vrot.slane %v1475_v15, 4  ;;  %v1585_v10 = vperm.slane %v1577_v43, %v5282_v0  ;;  %v1494_v14 = vrot.slane %v1451_v4, 4  ;;  %v1561_v26 = vperm.slane %v1553_v2, %v5282_v0 }
 0x24c   :  { %v1465_v13 = vsel %vm158_vm2, %v1464_v28, %v1423_v3  ;;  %v1551_v57 = vsel %vm158_vm2, %v1550_v45, %v1509_v30  ;;  %v1574_v1 = vrot.slane %v1545_v50, 4  ;;  %v1490_v17 = vrot.slane %v1447_v21, 4 }
 0x24d   :  { %v1493_v19 = vsel %vm158_vm2, %v1492_v11, %v1451_v4  ;;  %v1602_v31 = vrot.slane %v1585_v10, 4  ;;  %v1495_v34 = vsel %vm158_vm2, %v1475_v15, %v1494_v14  ;;  %v1471_v60 = vperm.slane %v1465_v13, %v5282_v0 }
 0x24e   :  { %v6085_v63 = vpop.f32.mrf.mxu3  ;;  %v1616_v6 = vpack.c.bf16 %v1493_v19, %v1493_v19  ;;  %v1604_v8 = vrot.slane %v1561_v26, 4  ;;  %v1618_v23 = vpack.c.bf16 %v1495_v34, %v1495_v34  ;;  %v1557_v32 = vperm.slane %v1551_v57, %v5282_v0 }
 0x24f   :  { %v1603_v51 = vsel %vm158_vm2, %v1602_v31, %v1561_v26  ;;  %v1488_v5 = vrot.slane %v1471_v60, 4  ;;  %v1575_v12 = vsel %vm158_vm2, %v1574_v1, %v6000_v53  ;;  %v1491_v59 = vsel %vm158_vm2, %v1471_v60, %v1490_v17 }
 0x250   :  { %v1617_v7 = vpack.c.bf16 %v1603_v51, %v1603_v51  ;;  %v2096_v22 = vunpack.c.l.b16 %v1616_v6  ;;  %v1605_v3 = vsel %vm158_vm2, %v1585_v10, %v1604_v8  ;;  %v2124_v29 = vunpack.c.l.b16 %v1618_v23  ;;  %v6125_v13 = vpop.f32.mrf.mxu2 }
 0x251   :  { %v1619_v47 = vpack.c.bf16 %v1605_v3, %v1605_v3  ;;  %v1489_v9 = vsel %vm158_vm2, %v1488_v5, %v1447_v21  ;;  %v1581_v33 = vperm.slane %v1575_v12, %v5282_v0  ;;  %v1600_v53 = vrot.slane %v1557_v32, 4 }
 0x252   :  { %v2097_v27 = vunpack.c.l.b16 %v1617_v7  ;;  %v1612_v30 = vpack.c.bf16 %v1489_v9, %v1489_v9  ;;  %v1403_v49 = vperm.slane %v6047_v16, %v5257_v24  ;;  %v1614_v4 = vpack.c.bf16 %v1491_v59, %v1491_v59 }
 0x253   :  { %v2125_v61 = vunpack.c.l.b16 %v1619_v47  ;;  %v1598_v62 = vrot.slane %v1581_v33, 4  ;;  %v1601_v50 = vsel %vm158_vm2, %v1581_v33, %v1600_v53  ;;  %v1407_v43 = vsel %vm158_vm2, %v6039_v35, %v1406_v39 }
 0x254   :  { %v2098_v48 = vpack.c.b16 %v2097_v27, %v2096_v22  ;;  %v2040_v56 = vunpack.c.l.b16 %v1612_v30  ;;  %v1615_v58 = vpack.c.bf16 %v1601_v50, %v1601_v50  ;;  %v2068_v28 = vunpack.c.l.b16 %v1614_v4 }
 0x255   :  { %v2126_v15 = vpack.c.b16 %v2125_v61, %v2124_v29  ;;  %v1599_v54 = vsel %vm158_vm2, %v1598_v62, %v1557_v32  ;;  %v1415_v45 = vperm.slane %v1407_v43, %v5257_v24  ;;  %v1439_v16 = vperm.slane %v6061_v55, %v5257_v24 }
 0x256   :  { %v6095_v18 = vpop.f32.mrf.mxu0  ;;  %2110 = vmatpush.bf16.msra.mxu3 %v2098_v48  ;;  %v1613_v21 = vpack.c.bf16 %v1599_v54, %v1599_v54  ;;  %v6113_v11 = vpop.f32.mrf.mxu3  ;;  %v2069_v2 = vunpack.c.l.b16 %v1615_v58  ;;  %v1454_v10 = vrot.slane %v1403_v49, 4  ;;  %v1478_v14 = vrot.slane %v6058_v40, 4 }
 0x257   :  { %v1849_v46 = vsel %vm1836_vm3, %v6095_v18, -inf  ;;  %2138 = vmatpush.bf16.msrb.mxu0 %v2126_v15  ;;  %v1513_v37 = vperm.slane %v5996_v25, %v5257_v24  ;;  %v1517_v35 = vsel %vm158_vm2, %v5985_v36, %v1516_v52  ;;  %v1549_v39 = vperm.slane %v6013_v44, %v5257_v24 }
 0x258   :  { %1850 = vmax.xlane.f32.xlu2 %v1849_v46  ;;  %v2041_v26 = vunpack.c.l.b16 %v1613_v21  ;;  %v1588_v55 = vrot.slane %v6006_v20, 4  ;;  %v2070_v57 = vpack.c.b16 %v2069_v2, %v2068_v28  ;;  %v1455_v1 = vsel %vm158_vm2, %v1415_v45, %v1454_v10  ;;  %v6162_v43 = vpop.f32.mrf.mxu2 }
 0x259   :  { %v1479_v19 = vsel %vm158_vm2, %v1439_v16, %v1478_v14  ;;  %v1525_v25 = vperm.slane %v1517_v35, %v5257_v24  ;;  %v1463_v34 = vperm.slane %v1455_v1, %v5282_v0  ;;  %v1564_v52 = vrot.slane %v1513_v37, 4 }
 0x25a   :  { %v2042_v41 = vpack.c.b16 %v2041_v26, %v2040_v56  ;;  %v1487_v36 = vperm.slane %v1479_v19, %v5282_v0  ;;  %2082 = vmatpush.bf16.msra.mxu2 %v2070_v57  ;;  %v1589_v44 = vsel %vm158_vm2, %v1549_v39, %v1588_v55  ;;  %v1452_v60 = vrot.slane %v1415_v45, 4 }
 0x25b   :  { %v1476_v6 = vrot.slane %v1439_v16, 4  ;;  %v1562_v8 = vrot.slane %v1525_v25, 4  ;;  %v1565_v32 = vsel %vm158_vm2, %v1525_v25, %v1564_v52  ;;  %v1597_v51 = vperm.slane %v1589_v44, %v5282_v0 }
 0x25c   :  { %2054 = vmatpush.bf16.msra.mxu1 %v2042_v41  ;;  %v1500_v23 = vrot.slane %v1487_v36, 4  ;;  %v1586_v5 = vrot.slane %v1549_v39, 4  ;;  %v1573_v12 = vperm.slane %v1565_v32, %v5282_v0  ;;  %v1453_v7 = vsel %vm158_vm2, %v1452_v60, %v1403_v49 }
 0x25d   :  { %v1477_v22 = vsel %vm158_vm2, %v1476_v6, %v6058_v40  ;;  %v1563_v3 = vsel %vm158_vm2, %v1562_v8, %v1513_v37  ;;  %v1610_v47 = vrot.slane %v1597_v51, 4  ;;  %v1459_v9 = vperm.slane %v1453_v7, %v5282_v0  ;;  %v6182_v6 = vpop.f32.mrf.mxu1 }
 0x25e   :  { %v6130_v31 = vpop.f32.mrf.mxu0  ;;  %v1501_v29 = vsel %vm158_vm2, %v1500_v23, %v1463_v34  ;;  %v1483_v33 = vperm.slane %v1477_v22, %v5282_v0  ;;  %v1569_v27 = vperm.slane %v1563_v3, %v5282_v0  ;;  %v1587_v30 = vsel %vm158_vm2, %v1586_v5, %v6006_v20  ;;  %v6152_v59 = vpop.f32.mrf.mxu3 }
 0x25f   :  { %v1624_v17 = vpack.c.bf16 %v1501_v29, %v1501_v29  ;;  %v1843_v46 = vsel %vm1836_vm3, %v6085_v63, -inf  ;;  %v1611_v40 = vsel %vm158_vm2, %v1610_v47, %v1573_v12  ;;  %v1593_v61 = vperm.slane %v1587_v30, %v5282_v0  ;;  %v6202_v47 = vld [vmem:[%s7376_s1] sm:$0xff] }
 0x260   :  { %v1496_v53 = vrot.slane %v1483_v33, 4  ;;  %1844 = vmax.xlane.f32.xlu1 %v1843_v46  ;;  %v1498_v62 = vrot.slane %v1459_v9, 4  ;;  %v1625_v49 = vpack.c.bf16 %v1611_v40, %v1611_v40  ;;  %v1608_v56 = vrot.slane %v1569_v27, 4  ;;  %v6174_v36 = vpop.f32.mrf.mxu2 }
 0x261   :  { %v2208_v48 = vunpack.c.l.b16 %v1624_v17  ;;  %v1852_v50 = vsel %vm1836_vm3, %v6130_v31, -inf  ;;  %v1606_v15 = vrot.slane %v1593_v61, 4  ;;  %v1837_v58 = vsel %vm1836_vm3, %v6125_v13, -inf }
 0x262   :  { %v1497_v20 = vsel %vm158_vm2, %v1496_v53, %v1459_v9  ;;  %v1499_v54 = vsel %vm158_vm2, %v1483_v33, %v1498_v62  ;;  %1853 = vmax.xlane.f32.xlu0 %v1852_v50  ;;  %v2209_v21 = vunpack.c.l.b16 %v1625_v49  ;;  %v1609_v45 = vsel %vm158_vm2, %v1593_v61, %v1608_v56  ;;  %1838 = vmax.xlane.f32.xlu2 %v1837_v58  ;;  %v6212_v50 = vld [vmem:[%s7376_s1 + $0x8] sm:$0xff] }
 0x263   :  { %v1620_v28 = vpack.c.bf16 %v1497_v20, %v1497_v20  ;;  %v1622_v16 = vpack.c.bf16 %v1499_v54, %v1499_v54  ;;  %v1607_v2 = vsel %vm158_vm2, %v1606_v15, %v1569_v27  ;;  %v1623_v10 = vpack.c.bf16 %v1609_v45, %v1609_v45 }
 0x264   :  { %v2210_v37 = vpack.c.b16 %v2209_v21, %v2208_v48  ;;  %v1621_v26 = vpack.c.bf16 %v1607_v2, %v1607_v2  ;;  %v1840_v25 = vsel %vm1836_vm3, %v6162_v43, -inf  ;;  %v1846_v41 = vsel %vm1836_vm3, %v6113_v11, -inf }
 0x265   :  { %v2152_v35 = vunpack.c.l.b16 %v1620_v28  ;;  %v2180_v39 = vunpack.c.l.b16 %v1622_v16  ;;  %v2181_v55 = vunpack.c.l.b16 %v1623_v10  ;;  %v1867_v44 = vsel %vm1836_vm3, %v6152_v59, -inf  ;;  %v6194_v12 = vpop.f32.mrf.mxu1 }
 0x266   :  { %v6156_v4 = vpop.f32.mrf.mxu0  ;;  %2222 = vmatpush.bf16.msrb.mxu3 %v2210_v37  ;;  %v2153_v57 = vunpack.c.l.b16 %v1621_v26  ;;  %v6172_v34 = vpop.f32.mrf.mxu3  ;;  %v1861_v60 = vsel %vm1836_vm3, %v6174_v36, -inf  ;;  %v1855_v32 = vsel %vm1836_vm3, %v6182_v6, -inf  ;;  %v1858_v7 = vsel %vm1836_vm3, %v6194_v12, -inf }
 0x267   :  { %v1873_v14 = vsel %vm1836_vm3, %v6156_v4, -inf  ;;  %v2182_v1 = vpack.c.b16 %v2181_v55, %v2180_v39  ;;  %v1870_v52 = vsel %vm1836_vm3, %v6172_v34, -inf }
 0x268   :  { %1874 = vmax.xlane.f32.xlu1 %v1873_v14  ;;  %v2154_v19 = vpack.c.b16 %v2153_v57, %v2152_v35  ;;  %v6184_v8 = vpop.f32.mrf.mxu2 }
 0x269   :  { %2194 = vmatpush.bf16.msrb.mxu2 %v2182_v1  ;;  %v1864_v51 = vsel %vm1836_vm3, %v6184_v8, -inf }
 0x26a   :  { %1841 = vmax.xlane.f32.xlu0 %v1840_v25  ;;  %2166 = vmatpush.bf16.msrb.mxu1 %v2154_v19 }
 0x26b   :  { %1847 = vmax.xlane.f32.xlu2 %v1846_v41 }
 0x26e   :  { %v6186_v23 = vpop.f32.mrf.mxu0 }
 0x26f   :  { %v1876_v5 = vsel %vm1836_vm3, %v6186_v23, -inf }
 0x270   :  { %1871 = vmax.xlane.f32.xlu1 %v1870_v52 }
 0x272   :  { %1868 = vmax.xlane.f32.xlu0 %v1867_v44 }
 0x273   :  { %1862 = vmax.xlane.f32.xlu2 %v1861_v60 }
 0x278   :  { %1856 = vmax.xlane.f32.xlu1 %v1855_v32 }
 0x27a   :  { %1865 = vmax.xlane.f32.xlu0 %v1864_v51 }
 0x27b   :  { %1877 = vmax.xlane.f32.xlu2 %v1876_v5 }
 0x283   :  { %1859 = vmax.xlane.f32.xlu2 %v1858_v7 }
 0x2cb   :  { %v1851_v22 = vpop.xlane.xlu2 %1850 }
 0x2cc   :  { %v1883_v3 = vsub.f32 %v6095_v18, %v1851_v22 }
 0x2ce   :  { %v1901_v29 = vmul.f32 1.442695, %v1883_v3 }
 0x2d0   :  { %4958 = vpow2.f32 %v1901_v29 }
 0x2d3   :  { %v1845_v17 = vpop.xlane.xlu1 %1844 }
 0x2d4   :  { %v1881_v30 = vsub.f32 %v6085_v63, %v1845_v17 }
 0x2d5   :  { %v1854_v46 = vpop.xlane.xlu0 %1853  ;;  %v1839_v18 = vpop.xlane.xlu2 %1838 }
 0x2d6   :  { %v4959_v9 = vpop.eup %4958  ;;  %v1884_v40 = vsub.f32 %v6130_v31, %v1854_v46  ;;  %v1879_v53 = vsub.f32 %v6125_v13, %v1839_v18  ;;  %v1897_v62 = vmul.f32 1.442695, %v1881_v30 }
 0x2d7   :  { %v1925_v33 = vmul.f32 %v4959_v9, %v6202_v47 }
 0x2d8   :  { %v1903_v61 = vmul.f32 1.442695, %v1884_v40  ;;  %v1893_v49 = vmul.f32 1.442695, %v1879_v53 }
 0x2d9   :  { %v1947_v27 = vsel %vm1836_vm3, %v1925_v33, 0.0  ;;  %v2023_v28 = vpack.c.bf16 %v1925_v33, %v1925_v33 }
 0x2da   :  { %1948 = vadd.xlane.f32.xlu0 %v1947_v27  ;;  %4960 = vpow2.f32 %v1903_v61 }
 0x2db   :  { %4962 = vpow2.f32 %v1893_v49  ;;  %v1875_v48 = vpop.xlane.xlu1 %1874  ;;  %v2091_v37 = vunpack.c.l.b16 %v2023_v28 }
 0x2dc   :  { %4964 = vpow2.f32 %v1897_v62  ;;  %v1891_v63 = vsub.f32 %v6156_v4, %v1875_v48 }
 0x2dd   :  { %v1842_v56 = vpop.xlane.xlu0 %1841 }
 0x2de   :  { %v1848_v20 = vpop.xlane.xlu2 %1847  ;;  %v1880_v31 = vsub.f32 %v6162_v43, %v1842_v56  ;;  %v1917_v16 = vmul.f32 1.442695, %v1891_v63 }
 0x2df   :  { %v1882_v13 = vsub.f32 %v6113_v11, %v1848_v20 }
 0x2e0   :  { %v4961_v15 = vpop.eup %4960  ;;  %v1895_v54 = vmul.f32 1.442695, %v1880_v31 }
 0x2e1   :  { %v4963_v58 = vpop.eup %4962  ;;  %v6218_v21 = vmul.f32 %v4961_v15, %v6212_v50  ;;  %v1899_v45 = vmul.f32 1.442695, %v1882_v13 }
 0x2e2   :  { %4966 = vpow2.f32 %v1895_v54  ;;  %v1921_v2 = vmul.f32 %v4963_v58, %v6202_v47  ;;  %v4965_v10 = vpop.eup %4964 }
 0x2e3   :  { %v2024_v4 = vpack.c.bf16 %v6218_v21, %v6218_v21  ;;  %4968 = vpow2.f32 %v1899_v45  ;;  %v1872_v43 = vpop.xlane.xlu1 %1871  ;;  %v1923_v57 = vmul.f32 %v4965_v10, %v6202_v47 }
 0x2e4   :  { %v1935_v11 = vsel %vm1836_vm3, %v1921_v2, 0.0  ;;  %v1890_v14 = vsub.f32 %v6172_v34, %v1872_v43  ;;  %4970 = vpow2.f32 %v1917_v16  ;;  %v2019_v44 = vpack.c.bf16 %v1921_v2, %v1921_v2 }
 0x2e5   :  { %v2092_v26 = vunpack.c.l.b16 %v2024_v4  ;;  %1936 = vadd.xlane.f32.xlu1 %v1935_v11  ;;  %v1869_v35 = vpop.xlane.xlu0 %1868  ;;  %v1941_v3 = vsel %vm1836_vm3, %v1923_v57, 0.0 }
 0x2e6   :  { %v1889_v39 = vsub.f32 %v6152_v59, %v1869_v35  ;;  %v1863_v55 = vpop.xlane.xlu2 %1862  ;;  %v1915_v25 = vmul.f32 1.442695, %v1890_v14  ;;  %v2021_v59 = vpack.c.bf16 %v1923_v57, %v1923_v57  ;;  %v2035_v33 = vunpack.c.l.b16 %v2019_v44 }
 0x2e7   :  { %v2093_v1 = vpack.c.b16 %v2092_v26, %v2091_v37  ;;  %v1887_v19 = vsub.f32 %v6174_v36, %v1863_v55 }
 0x2e8   :  { %v4967_v41 = vpop.eup %4966  ;;  %v1913_v60 = vmul.f32 1.442695, %v1889_v39  ;;  %4972 = vpow2.f32 %v1915_v25  ;;  %v2063_v30 = vunpack.c.l.b16 %v2021_v59 }
 0x2e9   :  { %v4969_v52 = vpop.eup %4968  ;;  %v1909_v32 = vmul.f32 1.442695, %v1887_v19  ;;  %4718 = vmatmul.msk.bf16.vlgmr.msra.gmra.mxu3 %vm1836_vm3, %v2093_v1  ;;  %v1922_v34 = vmul.f32 %v4967_v41, %v6212_v50 }
 0x2ea   :  { %v6231_v51 = vmul.f32 %v4969_v52, %v6212_v50  ;;  %v4971_v36 = vpop.eup %4970 }
 0x2eb   :  { %v1938_v5 = vsel %vm1836_vm3, %v1922_v34, 0.0  ;;  %v2020_v7 = vpack.c.bf16 %v1922_v34, %v1922_v34  ;;  %v1857_v22 = vpop.xlane.xlu1 %1856  ;;  %4974 = vpow2.f32 %v1909_v32  ;;  %v1933_v49 = vmul.f32 %v4971_v36, %v6202_v47 }
 0x2ec   :  { %v2022_v29 = vpack.c.bf16 %v6231_v51, %v6231_v51  ;;  %1939 = vadd.xlane.f32.xlu2 %v1938_v5  ;;  %v1885_v9 = vsub.f32 %v6182_v6, %v1857_v22  ;;  %4976 = vpow2.f32 %v1913_v60 }
 0x2ed   :  { %1942 = vadd.xlane.f32.xlu1 %v1941_v3  ;;  %v2036_v17 = vunpack.c.l.b16 %v2020_v7  ;;  %v1866_v27 = vpop.xlane.xlu0 %1865  ;;  %v2031_v35 = vpack.c.bf16 %v1933_v49, %v1933_v49  ;;  %v1944_v7 = vsel %vm1836_vm3, %v6231_v51, 0.0 }
 0x2ee   :  { %v2064_v46 = vunpack.c.l.b16 %v2022_v29  ;;  %v1878_v40 = vpop.xlane.xlu2 %1877  ;;  %v1888_v18 = vsub.f32 %v6184_v8, %v1866_v27  ;;  %v1905_v53 = vmul.f32 1.442695, %v1885_v9  ;;  %v4973_v6 = vpop.eup %4972  ;;  %v1971_v8 = vsel %vm1836_vm3, %v1933_v49, 0.0 }
 0x2ef   :  { %v2037_v61 = vpack.c.b16 %v2036_v17, %v2035_v33  ;;  %v1892_v62 = vsub.f32 %v6186_v23, %v1878_v40  ;;  %v1932_v13 = vmul.f32 %v4973_v6, %v6212_v50  ;;  %v1950_v23 = vsel %vm1836_vm3, %v6218_v21, 0.0 }
 0x2f0   :  { %v2065_v48 = vpack.c.b16 %v2064_v46, %v2063_v30  ;;  %v1911_v56 = vmul.f32 1.442695, %v1888_v18  ;;  %4978 = vpow2.f32 %v1905_v53  ;;  %v2203_v25 = vunpack.c.l.b16 %v2031_v35 }
 0x2f1   :  { %v1919_v63 = vmul.f32 1.442695, %v1892_v62  ;;  %4716 = vmatmul.msk.bf16.vlgmr.msra.gmra.mxu1 %vm1836_vm3, %v2037_v61  ;;  %v4975_v20 = vpop.eup %4974  ;;  %v2030_v10 = vpack.c.bf16 %v1932_v13, %v1932_v13 }
 0x2f2   :  { %4980 = vpow2.f32 %v1911_v56  ;;  %4717 = vmatmul.msk.bf16.vlgmr.msra.gmra.mxu2 %vm1836_vm3, %v2065_v48  ;;  %v4977_v31 = vpop.eup %4976  ;;  %v1929_v15 = vmul.f32 %v4975_v20, %v6202_v47 }
 0x2f3   :  { %4982 = vpow2.f32 %v1919_v63  ;;  %v1931_v58 = vmul.f32 %v4977_v31, %v6202_v47  ;;  %v2176_v55 = vunpack.c.l.b16 %v2030_v10 }
 0x2f4   :  { %1972 = vadd.xlane.f32.xlu2 %v1971_v8  ;;  %v2027_v14 = vpack.c.bf16 %v1929_v15, %v1929_v15  ;;  %v1959_v39 = vsel %vm1836_vm3, %v1929_v15, 0.0 }
 0x2f5   :  { %1951 = vadd.xlane.f32.xlu1 %v1950_v23  ;;  %v2029_v37 = vpack.c.bf16 %v1931_v58, %v1931_v58  ;;  %v1965_v17 = vsel %vm1836_vm3, %v1931_v58, 0.0 }
 0x2f6   :  { %v4979_v54 = vpop.eup %4978  ;;  %v1860_v28 = vpop.xlane.xlu2 %1859  ;;  %v2147_v57 = vunpack.c.l.b16 %v2027_v14 }
 0x2f7   :  { %v1886_v45 = vsub.f32 %v6194_v12, %v1860_v28  ;;  %v1927_v16 = vmul.f32 %v4979_v54, %v6202_v47  ;;  %v2175_v19 = vunpack.c.l.b16 %v2029_v37 }
 0x2f8   :  { %v4981_v2 = vpop.eup %4980 }
 0x2f9   :  { %v4983_v4 = vpop.eup %4982  ;;  %v1930_v43 = vmul.f32 %v4981_v2, %v6212_v50  ;;  %v1907_v11 = vmul.f32 1.442695, %v1886_v45  ;;  %v1953_v21 = vsel %vm1836_vm3, %v1927_v16, 0.0  ;;  %v2177_v60 = vpack.c.b16 %v2176_v55, %v2175_v19 }
 0x2fa   :  { %v1934_v26 = vmul.f32 %v4983_v4, %v6212_v50  ;;  %1954 = vadd.xlane.f32.xlu0 %v1953_v21  ;;  %v2025_v34 = vpack.c.bf16 %v1927_v16, %v1927_v16 }
 0x2fb   :  { %4984 = vpow2.f32 %v1907_v11  ;;  %v2028_v12 = vpack.c.bf16 %v1930_v43, %v1930_v43  ;;  %v1962_v33 = vsel %vm1836_vm3, %v1930_v43, 0.0 }
 0x2fc   :  { %v2032_v47 = vpack.c.bf16 %v1934_v26, %v1934_v26  ;;  %1960 = vadd.xlane.f32.xlu2 %v1959_v39  ;;  %v1974_v5 = vsel %vm1836_vm3, %v1934_v26, 0.0  ;;  %v2119_v3 = vunpack.c.l.b16 %v2025_v34 }
 0x2fd   :  { %v2148_v1 = vunpack.c.l.b16 %v2028_v12 }
 0x2fe   :  { %v2204_v41 = vunpack.c.l.b16 %v2032_v47 }
 0x2ff   :  { %v2149_v52 = vpack.c.b16 %v2148_v1, %v2147_v57 }
 0x300   :  { %v2205_v44 = vpack.c.b16 %v2204_v41, %v2203_v25 }
 0x301   :  { %v4985_v32 = vpop.eup %4984  ;;  %4720 = vmatmul.msk.bf16.vlgmr.msrb.gmra.mxu1 %vm1836_vm3, %v2149_v52 }
 0x302   :  { %4721 = vmatmul.msk.bf16.vlgmr.msrb.gmra.mxu2 %vm1836_vm3, %v2177_v60  ;;  %4722 = vmatmul.msk.bf16.vlgmr.msrb.gmra.mxu3 %vm1836_vm3, %v2205_v44  ;;  %v1928_v59 = vmul.f32 %v4985_v32, %v6212_v50  ;;  %v1968_v50 = vsel %vm1836_vm3, %v1932_v13, 0.0 }
 0x303   :  { %1975 = vadd.xlane.f32.xlu0 %v1974_v5 }
 0x304   :  { %1945 = vadd.xlane.f32.xlu2 %v1944_v7  ;;  %v1956_v22 = vsel %vm1836_vm3, %v1928_v59, 0.0  ;;  %v2026_v36 = vpack.c.bf16 %v1928_v59, %v1928_v59 }
 0x305   :  { %1957 = vadd.xlane.f32.xlu1 %v1956_v22 }
 0x306   :  { %v2120_v29 = vunpack.c.l.b16 %v2026_v36 }
 0x308   :  { %v2121_v9 = vpack.c.b16 %v2120_v29, %v2119_v3 }
 0x30a   :  { %4719 = vmatmul.msk.bf16.vlgmr.msrb.gmra.mxu0 %vm1836_vm3, %v2121_v9 }
 0x30b   :  { %1963 = vadd.xlane.f32.xlu0 %v1962_v33 }
 0x30d   :  { %1969 = vadd.xlane.f32.xlu1 %v1968_v50 }
 0x313   :  { %1966 = vadd.xlane.f32.xlu0 %v1965_v17 }
 0x34d   :  { %v1949_v46 = vpop.xlane.xlu0 %1948 }
 0x34e   :  { %vm1981_vm4 = vcmp.gt.f32.partialorder %v1949_v46, 0.0 }
 0x34f   :  { %v1995_v49 = vsel %vm1981_vm4, %v1949_v46, 1.0 }
 0x350   :  { %4986 = vrcp.f32 %v1995_v49 }
 0x356   :  { %v4987_v15 = vpop.eup %4986 }
 0x358   :  { %v1937_v51 = vpop.xlane.xlu1 %1936 }
 0x359   :  { %vm1977_vm5 = vcmp.gt.f32.partialorder %v1937_v51, 0.0 }
 0x35a   :  { %v1991_v56 = vsel %vm1977_vm5, %v1937_v51, 1.0 }
 0x35b   :  { %4988 = vrcp.f32 %v1991_v56 }
 0x35f   :  { %v1940_v27 = vpop.xlane.xlu2 %1939 }
 0x360   :  { %v1943_v30 = vpop.xlane.xlu1 %1942  ;;  %vm1978_vm6 = vcmp.gt.f32.partialorder %v1940_v27, 0.0 }
 0x361   :  { %v1992_v6 = vsel %vm1978_vm6, %v1940_v27, 1.0  ;;  %vm1979_vm8 = vcmp.gt.f32.partialorder %v1943_v30, 0.0  ;;  %v4989_v28 = vpop.eup %4988  ;;  %vm2735_vm6 = vcmask 195584  }
 0x362   :  { %4990 = vrcp.f32 %v1992_v6  ;;  %v1993_v13 = vsel %vm1979_vm8, %v1943_v30, 1.0  ;;  %vm2744_vm8 = vcmask 392192  }
 0x367   :  { %v1973_v40 = vpop.xlane.xlu2 %1972 }
 0x368   :  { %v1952_v18 = vpop.xlane.xlu1 %1951  ;;  %vm1989_vm10 = vcmp.gt.f32.partialorder %v1973_v40, 0.0  ;;  %v4991_v2 = vpop.eup %4990 }
 0x369   :  { %vm1982_vm7 = vcmp.gt.f32.partialorder %v1952_v18, 0.0  ;;  %v2003_v43 = vsel %vm1989_vm10, %v1973_v40, 1.0 }
 0x36a   :  { %v1996_v63 = vsel %vm1982_vm7, %v1952_v18, 1.0  ;;  %vm2738_vm7 = vcmask 261120  }
 0x36b   :  { %4992 = vrcp.f32 %v1996_v63 }
 0x36c   :  { %v2112_v48 = vpop.f32.mrf.mxu3  ;;  %4994 = vrcp.f32 %v1993_v13 }
 0x36d   :  { %v1955_v53 = vpop.xlane.xlu0 %1954  ;;  %v2233_v45 = vmul.f32 %v4987_v15, %v2112_v48 }
 0x36e   :  { %v2056_v61 = vpop.f32.mrf.mxu1  ;;  %vm1983_vm11 = vcmp.gt.f32.partialorder %v1955_v53, 0.0 }
 0x36f   :  { %v1961_v62 = vpop.xlane.xlu2 %1960  ;;  %v2229_v10 = vmul.f32 %v4989_v28, %v2056_v61  ;;  %v1997_v11 = vsel %vm1983_vm11, %v1955_v53, 1.0  ;;  %v2243_v26 = vrot.slane %v2233_v45, 4 }
 0x370   :  { %vm1985_vm9 = vcmp.gt.f32.partialorder %v1961_v62, 0.0 }
 0x371   :  { %v1999_v54 = vsel %vm1985_vm9, %v1961_v62, 1.0  ;;  %v4993_v4 = vpop.eup %4992  ;;  %v2245_v12 = vrot.slane %v2229_v10, 4  ;;  %v2244_v52 = vsel %vm158_vm2, %v2243_v26, %v2229_v10  ;;  %vm2786_vm9 = vcmask 457728  }
 0x372   :  { %4996 = vrcp.f32 %v1999_v54  ;;  %v4995_v1 = vpop.eup %4994  ;;  %v2250_v7 = vperm.slane %v2244_v52, %v5257_v24 }
 0x373   :  { %4998 = vrcp.f32 %v2003_v43  ;;  %v2246_v60 = vsel %vm158_vm2, %v2233_v45, %v2245_v12 }
 0x374   :  { %v2114_v16 = vpop.f32.mrf.mxu3  ;;  %5000 = vrcp.f32 %v1997_v11  ;;  %v2254_v33 = vperm.slane %v2246_v60, %v5257_v24  ;;  %v2291_v56 = vrot.slane %v2250_v7, 4 }
 0x375   :  { %v2084_v20 = vpop.f32.mrf.mxu2  ;;  %v2234_v14 = vmul.f32 %v4993_v4, %v2114_v16 }
 0x376   :  { %v2058_v31 = vpop.f32.mrf.mxu1  ;;  %v1976_v8 = vpop.xlane.xlu0 %1975  ;;  %v2231_v44 = vmul.f32 %v4995_v1, %v2084_v20 }
 0x377   :  { %v1946_v58 = vpop.xlane.xlu2 %1945  ;;  %v2230_v21 = vmul.f32 %v4991_v2, %v2058_v31  ;;  %vm1990_vm14 = vcmp.gt.f32.partialorder %v1976_v8, 0.0  ;;  %v2353_v19 = vrot.slane %v2234_v14, 4  ;;  %v2303_v31 = vrot.slane %v2254_v33, 4 }
 0x378   :  { %v1958_v23 = vpop.xlane.xlu1 %1957  ;;  %vm1980_vm12 = vcmp.gt.f32.partialorder %v1946_v58, 0.0  ;;  %v4997_v41 = vpop.eup %4996  ;;  %v2004_v32 = vsel %vm1990_vm14, %v1976_v8, 1.0  ;;  %v2257_v50 = vrot.slane %v2231_v44, 4 }
 0x379   :  { %v1994_v55 = vsel %vm1980_vm12, %v1946_v58, 1.0  ;;  %v2355_v25 = vrot.slane %v2230_v21, 4  ;;  %vm1984_vm4 = vcmp.gt.f32.partialorder %v1958_v23, 0.0  ;;  %v4999_v5 = vpop.eup %4998  ;;  %v2354_v22 = vsel %vm158_vm2, %v2353_v19, %v2230_v21 }
 0x37a   :  { %v5001_v9 = vpop.eup %5000  ;;  %v1998_v30 = vsel %vm1984_vm4, %v1958_v23, 1.0  ;;  %v6276_v53 = vperm.slane %v2354_v22, %v5257_v24 }
 0x37b   :  { %v2356_v36 = vsel %vm158_vm2, %v2234_v14, %v2355_v25 }
 0x37c   :  { %v6279_v61 = vperm.slane %v2356_v36, %v5257_v24  ;;  %v2401_v28 = vrot.slane %v6276_v53, 4 }
 0x37d   :  { %v2086_v37 = vpop.f32.mrf.mxu2 }
 0x37e   :  { %v2168_v35 = vpop.f32.mrf.mxu1  ;;  %v1964_v39 = vpop.xlane.xlu0 %1963  ;;  %v2413_v45 = vrot.slane %v6279_v61, 4 }
 0x37f   :  { %vm1986_vm13 = vcmp.gt.f32.partialorder %v1964_v39, 0.0  ;;  %v2237_v34 = vmul.f32 %v4997_v41, %v2168_v35 }
 0x380   :  { %v1970_v47 = vpop.xlane.xlu1 %1969  ;;  %v2000_v57 = vsel %vm1986_vm13, %v1964_v39, 1.0 }
 0x381   :  { %vm1988_vm15 = vcmp.gt.f32.partialorder %v1970_v47, 0.0  ;;  %5002 = vrcp.f32 %v2000_v57  ;;  %v2269_v46 = vrot.slane %v2237_v34, 4 }
 0x382   :  { %5004 = vrcp.f32 %v1994_v55  ;;  %v2002_v59 = vsel %vm1988_vm15, %v1970_v47, 1.0 }
 0x383   :  { %5006 = vrcp.f32 %v2004_v32 }
 0x384   :  { %5008 = vrcp.f32 %v2002_v59 }
 0x385   :  { %v6272_v3 = vpop.f32.mrf.mxu2  ;;  %v2224_v29 = vpop.f32.mrf.mxu3  ;;  %5010 = vrcp.f32 %v1998_v30 }
 0x386   :  { %v2241_v17 = vmul.f32 %v4999_v5, %v2224_v29  ;;  %v1967_v51 = vpop.xlane.xlu0 %1966  ;;  %v2170_v48 = vpop.f32.mrf.mxu1 }
 0x387   :  { %v5003_v27 = vpop.eup %5002  ;;  %v2140_v40 = vpop.f32.mrf.mxu0  ;;  %vm1987_vm5 = vcmp.gt.f32.partialorder %v1967_v51, 0.0 }
 0x388   :  { %v5005_v18 = vpop.eup %5004  ;;  %v2267_v62 = vrot.slane %v2241_v17, 4  ;;  %v2235_v49 = vmul.f32 %v5001_v9, %v2140_v40  ;;  %v2270_v6 = vsel %vm158_vm2, %v2241_v17, %v2269_v46  ;;  %v2238_v63 = vmul.f32 %v5003_v27, %v2170_v48 }
 0x389   :  { %v2001_v20 = vsel %vm1987_vm5, %v1967_v51, 1.0  ;;  %v6283_v23 = vmul.f32 %v5005_v18, %v2086_v37  ;;  %v5007_v58 = vpop.eup %5006  ;;  %v6290_v16 = vperm.slane %v2270_v6, %v5257_v24 }
 0x38a   :  { %v2255_v8 = vrot.slane %v2235_v49, 4  ;;  %v2258_v13 = vsel %vm158_vm2, %v2235_v49, %v2257_v50  ;;  %v2268_v15 = vsel %vm158_vm2, %v2267_v62, %v2237_v34  ;;  %5012 = vrcp.f32 %v2001_v20  ;;  %v5009_v10 = vpop.eup %5008 }
 0x38b   :  { %v2266_v54 = vperm.slane %v2258_v13, %v5257_v24  ;;  %v2379_v14 = vrot.slane %v2238_v63, 4  ;;  %v2274_v26 = vperm.slane %v2268_v15, %v5257_v24  ;;  %v2367_v55 = vrot.slane %v6283_v23, 4  ;;  %v5011_v19 = vpop.eup %5010 }
 0x38c   :  { %v2256_v2 = vsel %vm158_vm2, %v2255_v8, %v2231_v44  ;;  %v2327_v25 = vrot.slane %v6290_v16, 4 }
 0x38d   :  { %v2262_v4 = vperm.slane %v2256_v2, %v5257_v24  ;;  %v2301_v43 = vrot.slane %v2266_v54, 4  ;;  %v2304_v11 = vsel %vm158_vm2, %v2266_v54, %v2303_v31  ;;  %v2198_v21 = vpop.f32.mrf.mxu2  ;;  %v2226_v37 = vpop.f32.mrf.mxu3  ;;  %v2315_v22 = vrot.slane %v2274_v26, 4 }
 0x38e   :  { %v6297_v35 = vperm.slane %v2304_v11, %v5282_v0  ;;  %v2240_v39 = vmul.f32 %v5009_v10, %v2198_v21  ;;  %v2242_v12 = vmul.f32 %v5007_v58, %v2226_v37 }
 0x38f   :  { %v2289_v47 = vrot.slane %v2262_v4, 4  ;;  %v2292_v57 = vsel %vm158_vm2, %v2262_v4, %v2291_v56  ;;  %v2302_v1 = vsel %vm158_vm2, %v2301_v43, %v2254_v33  ;;  %v2142_v33 = vpop.f32.mrf.mxu0 }
 0x390   :  { %v6304_v41 = vperm.slane %v2292_v57, %v5282_v0  ;;  %v6307_v52 = vperm.slane %v2302_v1, %v5282_v0  ;;  %v2389_v44 = vrot.slane %v2240_v39, 4  ;;  %v5013_v60 = vpop.eup %5012  ;;  %v2394_v34 = vperm.slane %v2240_v39, %v5257_v24 }
 0x391   :  { %v2290_v32 = vsel %vm158_vm2, %v2289_v47, %v2250_v7  ;;  %v2377_v59 = vrot.slane %v2242_v12, 4  ;;  %v2380_v5 = vsel %vm158_vm2, %v2242_v12, %v2379_v14  ;;  %v2351_v29 = vrot.slane %v6297_v35, 4 }
 0x392   :  { %v2296_v36 = vperm.slane %v2290_v32, %v5282_v0  ;;  %v2239_v9 = vmul.f32 %v5013_v60, %v6272_v3  ;;  %v2390_v50 = vsel %vm158_vm2, 0.0, %v2389_v44  ;;  %v2423_v17 = vrot.slane %v2394_v34, 4 }
 0x393   :  { %v2378_v51 = vsel %vm158_vm2, %v2377_v59, %v2238_v63  ;;  %v2388_v7 = vperm.slane %v2380_v5, %v5257_v24  ;;  %v2343_v27 = vrot.slane %v6304_v41, 4  ;;  %v2398_v40 = vperm.slane %v2390_v50, %v5257_v24 }
 0x394   :  { %v2279_v30 = vrot.slane %v2239_v9, 4  ;;  %v2284_v46 = vperm.slane %v2239_v9, %v5257_v24  ;;  %v2347_v18 = vrot.slane %v6307_v52, 4  ;;  %v2384_v62 = vperm.slane %v2378_v51, %v5257_v24 }
 0x395   :  { %v2437_v3 = vrot.slane %v2388_v7, 4  ;;  %v2236_v49 = vmul.f32 %v5011_v19, %v2142_v33  ;;  %v2435_v63 = vrot.slane %v2398_v40, 4  ;;  %v2339_v10 = vrot.slane %v2296_v36, 4 }
 0x396   :  { %v2280_v48 = vsel %vm158_vm2, 0.0, %v2279_v30  ;;  %v2313_v56 = vrot.slane %v2284_v46, 4  ;;  %v2316_v6 = vsel %vm158_vm2, %v2284_v46, %v2315_v22  ;;  %v2424_v8 = vsel %vm158_vm2, %v2423_v17, %v2384_v62 }
 0x397   :  { %v2288_v20 = vperm.slane %v2280_v48, %v5257_v24  ;;  %v2324_v31 = vperm.slane %v2316_v6, %v5282_v0  ;;  %v2425_v13 = vrot.slane %v2384_v62, 4  ;;  %v6330_v54 = vperm.slane %v2424_v8, %v5282_v0 }
 0x398   :  { %v2314_v15 = vsel %vm158_vm2, %v2313_v56, %v2274_v26  ;;  %v2436_v58 = vsel %vm158_vm2, %v2435_v63, %v2388_v7  ;;  %v2438_v2 = vsel %vm158_vm2, %v2398_v40, %v2437_v3  ;;  %v2365_v44 = vrot.slane %v2236_v49, 4 }
 0x399   :  { %v2320_v4 = vperm.slane %v2314_v15, %v5282_v0  ;;  %v2325_v43 = vrot.slane %v2288_v20, 4  ;;  %v2328_v11 = vsel %vm158_vm2, %v2288_v20, %v2327_v25  ;;  %v2341_v21 = vrot.slane %v2324_v31, 4 }
 0x39a   :  { %v2336_v14 = vperm.slane %v2328_v11, %v5282_v0  ;;  %v2426_v37 = vsel %vm158_vm2, %v2394_v34, %v2425_v13  ;;  %v6339_v26 = vperm.slane %v2436_v58, %v5282_v0  ;;  %v2446_v57 = vperm.slane %v2438_v2, %v5282_v0 }
 0x39b   :  { %v2326_v39 = vsel %vm158_vm2, %v2325_v43, %v6290_v16  ;;  %v2337_v12 = vrot.slane %v2320_v4, 4  ;;  %v2434_v47 = vperm.slane %v2426_v37, %v5282_v0  ;;  %v2344_v1 = vsel %vm158_vm2, %v2324_v31, %v2343_v27 }
 0x39c   :  { %v2349_v19 = vrot.slane %v2336_v14, 4  ;;  %v2447_v25 = vrot.slane %v6330_v54, 4  ;;  %v2455_v32 = vrot.slane %v6339_v26, 4  ;;  %v2368_v34 = vsel %vm158_vm2, %v2236_v49, %v2367_v55 }
 0x39d   :  { %v2451_v60 = vrot.slane %v2434_v47, 4  ;;  %v2332_v59 = vperm.slane %v2326_v39, %v5282_v0  ;;  %v2459_v5 = vrot.slane %v2446_v57, 4  ;;  %v2366_v16 = vsel %vm158_vm2, %v2365_v44, %v6283_v23 }
 0x39e   :  { %v2376_v22 = vperm.slane %v2368_v34, %v5257_v24  ;;  %v2338_v9 = vsel %vm158_vm2, %v2337_v12, %v2296_v36  ;;  %v2372_v33 = vperm.slane %v2366_v16, %v5257_v24  ;;  %v2340_v50 = vsel %vm158_vm2, %v2320_v4, %v2339_v10 }
 0x39f   :  { %v2342_v17 = vsel %vm158_vm2, %v2341_v21, %v6304_v41  ;;  %v2345_v51 = vrot.slane %v2332_v59, 4  ;;  %v2348_v27 = vsel %vm158_vm2, %v2332_v59, %v2347_v18  ;;  %v2350_v23 = vsel %vm158_vm2, %v2349_v19, %v6297_v35 }
 0x3a0   :  { %v2411_v7 = vrot.slane %v2376_v22, 4  ;;  %v2414_v55 = vsel %vm158_vm2, %v2376_v22, %v2413_v45  ;;  %v2399_v30 = vrot.slane %v2372_v33, 4  ;;  %v2402_v36 = vsel %vm158_vm2, %v2372_v33, %v2401_v28 }
 0x3a1   :  { %v2422_v46 = vperm.slane %v2414_v55, %v5282_v0  ;;  %v2352_v41 = vsel %vm158_vm2, %v2336_v14, %v2351_v29  ;;  %v2410_v40 = vperm.slane %v2402_v36, %v5282_v0  ;;  %v2346_v18 = vsel %vm158_vm2, %v2345_v51, %v6307_v52 }
 0x3a2   :  { %v2412_v45 = vsel %vm158_vm2, %v2411_v7, %v6279_v61  ;;  %v2463_v62 = vrot.slane %v2342_v17, 4  ;;  %v2400_v3 = vsel %vm158_vm2, %v2399_v30, %v6276_v53  ;;  %v2465_v56 = vrot.slane %v2338_v9, 4 }
 0x3a3   :  { %v6379_v28 = vperm.slane %v2412_v45, %v5282_v0  ;;  %v6382_v49 = vsel %vm158_vm2, %v2459_v5, %v2422_v46  ;;  %v2461_v35 = vrot.slane %v2422_v46, 4  ;;  %v2406_v29 = vperm.slane %v2400_v3, %v5282_v0 }
 0x3a4   :  { %v6386_v48 = vsel %vm158_vm2, %v2451_v60, %v2410_v40  ;;  %v2453_v61 = vrot.slane %v2410_v40, 4  ;;  %v2597_v53 = vrot.slane %v6382_v49, 4  ;;  %v2464_v63 = vsel %vm158_vm2, %v2463_v62, %v2338_v9 }
 0x3a5   :  { %v2457_v52 = vrot.slane %v6379_v28, 4  ;;  %v6390_v6 = vsel %vm158_vm2, %v2446_v57, %v2461_v35  ;;  %v2449_v20 = vrot.slane %v2406_v29, 4  ;;  %v2573_v8 = vrot.slane %v6386_v48, 4 }
 0x3a6   :  { %v6395_v31 = vsel %vm158_vm2, %v2434_v47, %v2453_v61  ;;  %v2609_v13 = vrot.slane %v6390_v6, 4  ;;  %v2470_v15 = vperm.slane %v2464_v63, %v5257_v24  ;;  %v2475_v58 = vrot.slane %v2344_v1, 4 }
 0x3a7   :  { %v2477_v2 = vrot.slane %v2340_v50, 4  ;;  %v2487_v10 = vrot.slane %v2350_v23, 4  ;;  %v2489_v4 = vrot.slane %v2346_v18, 4  ;;  %v2499_v43 = vrot.slane %v2352_v41, 4 }
 0x3a8   :  { %v2501_v11 = vrot.slane %v2348_v27, 4  ;;  %v2466_v14 = vsel %vm158_vm2, %v2342_v17, %v2465_v56  ;;  %v2476_v21 = vsel %vm158_vm2, %v2475_v58, %v2340_v50  ;;  %v2513_v5 = vrot.slane %v2470_v15, 4 }
 0x3a9   :  { %v2488_v37 = vsel %vm158_vm2, %v2487_v10, %v2346_v18  ;;  %v6404_v39 = vperm.slane %v2466_v14, %v5257_v24  ;;  %v2478_v12 = vsel %vm158_vm2, %v2344_v1, %v2477_v2  ;;  %v2482_v47 = vperm.slane %v2476_v21, %v5257_v24 }
 0x3aa   :  { %v2494_v57 = vperm.slane %v2488_v37, %v5257_v24  ;;  %v2500_v19 = vsel %vm158_vm2, %v2499_v43, %v2348_v27  ;;  %v6411_v44 = vperm.slane %v2478_v12, %v5257_v24  ;;  %v2490_v34 = vsel %vm158_vm2, %v2350_v23, %v2489_v4 }
 0x3ab   :  { %v2506_v60 = vperm.slane %v2500_v19, %v5257_v24  ;;  %v2502_v59 = vsel %vm158_vm2, %v2352_v41, %v2501_v11  ;;  %v2511_v16 = vrot.slane %v2482_v47, 4  ;;  %v6417_v22 = vperm.slane %v2490_v34, %v5257_v24 }
 0x3ac   :  { %v6420_v1 = vperm.slane %v2502_v59, %v5257_v24  ;;  %v2523_v9 = vrot.slane %v6411_v44, 4  ;;  %v2585_v33 = vrot.slane %v6395_v31, 4  ;;  %v2514_v17 = vsel %vm158_vm2, %v2482_v47, %v2513_v5 }
 0x3ad   :  { %v2535_v50 = vrot.slane %v2506_v60, 4  ;;  %v2537_v51 = vrot.slane %v2494_v57, 4  ;;  %v2512_v7 = vsel %vm158_vm2, %v2511_v16, %v2470_v15  ;;  %v2522_v23 = vperm.slane %v2514_v17, %v5282_v0 }
 0x3ae   :  { %v2524_v55 = vsel %vm158_vm2, %v2523_v9, %v6404_v39  ;;  %v2547_v27 = vrot.slane %v6420_v1, 4  ;;  %v6431_v30 = vperm.slane %v2512_v7, %v5282_v0  ;;  %v2450_v56 = vsel %vm158_vm2, %v6330_v54, %v2449_v20 }
 0x3af   :  { %v2536_v36 = vsel %vm158_vm2, %v2535_v50, %v2494_v57  ;;  %v2530_v46 = vperm.slane %v2524_v55, %v5282_v0  ;;  %v2538_v41 = vsel %vm158_vm2, %v2506_v60, %v2537_v51  ;;  %v2565_v62 = vrot.slane %v2522_v23, 4 }
 0x3b0   :  { %v6437_v40 = vperm.slane %v2536_v36, %v5282_v0  ;;  %v2548_v45 = vsel %vm158_vm2, %v2547_v27, %v6417_v22  ;;  %v2546_v18 = vperm.slane %v2538_v41, %v5282_v0  ;;  %v2561_v3 = vrot.slane %v6431_v30, 4 }
 0x3b1   :  { %v2554_v35 = vperm.slane %v2548_v45, %v5282_v0  ;;  %v2569_v61 = vrot.slane %v2530_v46, 4  ;;  %v2448_v58 = vsel %vm158_vm2, %v2447_v25, %v2406_v29  ;;  %v2456_v2 = vsel %vm158_vm2, %v2455_v32, %v6379_v28 }
 0x3b2   :  { %v2559_v63 = vrot.slane %v6437_v40, 4  ;;  %v2566_v15 = vsel %vm158_vm2, %v2546_v18, %v2565_v62  ;;  %v2562_v10 = vsel %vm158_vm2, %v6437_v40, %v2561_v3  ;;  %v2458_v20 = vsel %vm158_vm2, %v6339_v26, %v2457_v52 }
 0x3b3   :  { %v2570_v4 = vsel %vm158_vm2, %v2554_v35, %v2569_v61  ;;  %v2567_v43 = vrot.slane %v2554_v35, 4  ;;  %2685 = vrot.lane.b32.xlu2 %v2562_v10, %s5148_s10  ;;  %v2563_v54 = vrot.slane %v2546_v18, 4  ;;  %v2574_v25 = vsel %vm158_vm2, %v2573_v8, %v2448_v58 }
 0x3b4   :  { %2717 = vrot.lane.b32.xlu1 %v2570_v4, %s5149_s11  ;;  %v2586_v32 = vsel %vm158_vm2, %v2585_v33, %v2450_v56  ;;  %v2599_v28 = vrot.slane %v2456_v2, 4  ;;  %v2580_v11 = vperm.slane %v2574_v25, %v5257_v24  ;;  %v2598_v26 = vsel %vm158_vm2, %v2597_v53, %v2456_v2 }
 0x3b5   :  { %v2568_v29 = vsel %vm158_vm2, %v2567_v43, %v2530_v46  ;;  %v2592_v14 = vperm.slane %v2586_v32, %v5257_v24  ;;  %v2604_v52 = vperm.slane %v2598_v26, %v5257_v24  ;;  %v2610_v8 = vsel %vm158_vm2, %v2609_v13, %v2458_v20 }
 0x3b6   :  { %2709 = vrot.lane.b32.xlu0 %v2568_v29, %s5150_s12  ;;  %v2611_v21 = vrot.slane %v2458_v20, 4  ;;  %v2575_v37 = vrot.slane %v2448_v58, 4  ;;  %v2616_v12 = vperm.slane %v2610_v8, %v5257_v24  ;;  %v2587_v57 = vrot.slane %v2450_v56, 4 }
 0x3b7   :  { %v2621_v47 = vrot.slane %v2592_v14, 4  ;;  %v2600_v19 = vsel %vm158_vm2, %v6382_v49, %v2599_v28  ;;  %v2564_v53 = vsel %vm158_vm2, %v2563_v54, %v2522_v23  ;;  %v2623_v59 = vrot.slane %v2580_v11, 4 }
 0x3b8   :  { %v2576_v60 = vsel %vm158_vm2, %v6386_v48, %v2575_v37  ;;  %v2612_v34 = vsel %vm158_vm2, %v6390_v6, %v2611_v21  ;;  %v2645_v5 = vrot.slane %v2616_v12, 4  ;;  %v2588_v16 = vsel %vm158_vm2, %v6395_v31, %v2587_v57  ;;  %v2759_v21 = vld [vmem:[#allocation2 + $0x18] sm:$0xf] }
 0x3b9   :  { %v2622_v13 = vsel %vm158_vm2, %v2621_v47, %v2580_v11  ;;  %v2608_v9 = vperm.slane %v2600_v19, %v5257_v24  ;;  %v2596_v49 = vperm.slane %v2588_v16, %v5257_v24  ;;  %v2620_v50 = vperm.slane %v2612_v34, %v5257_v24  ;;  %v4757_v19 = vld [vmem:[#allocation2 + $0x10] sm:$0xff]  ;;  %v4756_v34 = vld [vmem:[#allocation2 + $0x8] sm:$0xff] }
 0x3ba   :  { %v2628_v33 = vperm.slane %v2622_v13, %v5282_v0  ;;  %v2624_v48 = vsel %vm158_vm2, %v2592_v14, %v2623_v59  ;;  %v2646_v17 = vsel %vm158_vm2, %v2645_v5, %v2604_v52  ;;  %v2584_v6 = vperm.slane %v2576_v60, %v5257_v24  ;;  %v4755_v13 = vld [vmem:[#allocation2] sm:$0xff] }
 0x3bb   :  { %v2632_v51 = vperm.slane %v2624_v48, %v5282_v0  ;;  %v2647_v7 = vrot.slane %v2604_v52, 4  ;;  %2701 = vrot.lane.b32.xlu2 %v2566_v15, %s5151_s14  ;;  %v2652_v31 = vperm.slane %v2646_v17, %v5282_v0  ;;  %v2633_v27 = vrot.slane %v2596_v49, 4 }
 0x3bc   :  { %2693 = vrot.lane.b32.xlu1 %v2564_v53, %s5147_s27  ;;  %v2671_v55 = vrot.slane %v2628_v33, 4  ;;  %v2657_v23 = vrot.slane %v2620_v50, 4  ;;  %v2549_v46 = vrot.slane %v6417_v22, 4  ;;  %v2659_v22 = vrot.slane %v2608_v9, 4 }
 0x3bd   :  { %v2648_v36 = vsel %vm158_vm2, %v2616_v12, %v2647_v7  ;;  %v2669_v41 = vrot.slane %v2652_v31, 4  ;;  %v2634_v18 = vsel %vm158_vm2, %v2633_v27, %v2584_v6  ;;  %v2675_v56 = vrot.slane %v2632_v51, 4 }
 0x3be   :  { %v2672_v45 = vsel %vm158_vm2, %v2652_v31, %v2671_v55  ;;  %v2658_v62 = vsel %vm158_vm2, %v2657_v23, %v2608_v9  ;;  %v2640_v3 = vperm.slane %v2634_v18, %v5282_v0  ;;  %v2656_v61 = vperm.slane %v2648_v36, %v5282_v0 }
 0x3bf   :  { %2687 = vrot.lane.b32.xlu0 %v2672_v45, %s5148_s10  ;;  %v2664_v35 = vperm.slane %v2658_v62, %v5282_v0  ;;  %v2550_v15 = vsel %vm158_vm2, %v6420_v1, %v2549_v46  ;;  %v2560_v58 = vsel %vm158_vm2, %v2559_v63, %v6431_v30  ;;  %v2525_v10 = vrot.slane %v6404_v39, 4 }
 0x3c0   :  { %v2673_v4 = vrot.slane %v2656_v61, 4  ;;  %v2635_v43 = vrot.slane %v2584_v6, 4  ;;  %v2660_v20 = vsel %vm158_vm2, %v2620_v50, %v2659_v22  ;;  %v2670_v54 = vsel %vm158_vm2, %v2669_v41, %v2628_v33  ;;  %v4956_v22 = vld [vmem:[%s7380_s5] ss:$0 sm:$0xff] }
 0x3c1   :  { %v2677_v2 = vrot.slane %v2664_v35, 4  ;;  %v2676_v32 = vsel %vm158_vm2, %v2656_v61, %v2675_v56  ;;  %v2558_v1 = vperm.slane %v2550_v15, %v5282_v0  ;;  %v2668_v30 = vperm.slane %v2660_v20, %v5282_v0 }
 0x3c2   :  { %v2674_v39 = vsel %vm158_vm2, %v2673_v4, %v2632_v51  ;;  %v2526_v40 = vsel %vm158_vm2, %v6411_v44, %v2525_v10  ;;  %v2636_v63 = vsel %vm158_vm2, %v2596_v49, %v2635_v43  ;;  %v2679_v26 = vrot.slane %v2640_v3, 4 }
 0x3c3   :  { %v2678_v25 = vsel %vm158_vm2, %v2677_v2, %v2640_v3  ;;  %v2571_v28 = vrot.slane %v2558_v1, 4  ;;  %v2681_v29 = vrot.slane %v2668_v30, 4  ;;  %v2534_v11 = vperm.slane %v2526_v40, %v5282_v0 }
 0x3c4   :  { %2711 = vrot.lane.b32.xlu2 %v2678_v25, %s5150_s12  ;;  %2703 = vrot.lane.b32.xlu1 %v2676_v32, %s5151_s14  ;;  %v2644_v14 = vperm.slane %v2636_v63, %v5282_v0  ;;  %v2680_v44 = vsel %vm158_vm2, %v2664_v35, %v2679_v26  ;;  %v2778_v37 = vunpack.c.l.b16 %v2759_v21 }
 0x3c5   :  { %v2572_v52 = vsel %vm158_vm2, %v2571_v28, %v2534_v11 }
 0x3c6   :  { %v2682_v8 = vsel %vm158_vm2, %v2681_v29, %v2644_v14  ;;  %v2782_v12 = vpack.c.b16 %v2778_v37, %v2778_v37 }
 0x3c7   :  { %2695 = vrot.lane.b32.xlu0 %v2674_v39, %s5147_s27 }
 0x3c8   :  { %v2791_v57 = vsel %vm84_vm0, %v2782_v12, 0  ;;  %vm2741_vm0 = vcmask 326656  }
 0x3c9   :  { %2797 = vmatpush.bf16.msra.mxu0 %v2791_v57 }
 0x3cc   :  { %2725 = vrot.lane.b32.xlu2 %v2572_v52, %s5152_s15  ;;  %2727 = vrot.lane.b32.xlu1 %v2682_v8, %s5152_s15 }
 0x3cd   :  { %2798 = vmatpush.bf16.msra.mxu0 %v4757_v19 }
 0x3cf   :  { %2719 = vrot.lane.b32.xlu0 %v2680_v44, %s5149_s11 }
 0x3d1   :  { %2799 = vmatpush.bf16.msra.mxu0 %v4756_v34 }
 0x3d5   :  { %2800 = vmatpush.bf16.msra.mxu0 %v4755_v13 }
 0x40d   :  { %v2686_v47 = vpop.permute.xlu2 %2685 }
 0x40e   :  { %v2731_v9 = vsel %vm80_vm1, %v2560_v58, %v2686_v47 }
 0x415   :  { %v2702_v59 = vpop.permute.xlu2 %2701 }
 0x41e   :  { %v2712_v49 = vpop.permute.xlu2 %2711 }
 0x426   :  { %v2718_v53 = vpop.permute.xlu1 %2717  ;;  %v2726_v55 = vpop.permute.xlu2 %2725 }
 0x428   :  { %v2710_v60 = vpop.permute.xlu0 %2709 }
 0x42e   :  { %v2694_v5 = vpop.permute.xlu1 %2693 }
 0x42f   :  { %v2733_v33 = vsel %vm1836_vm3, %v2731_v9, %v2694_v5 }
 0x430   :  { %v2736_v50 = vsel %vm2735_vm6, %v2733_v33, %v2702_v59 }
 0x431   :  { %v2688_v16 = vpop.permute.xlu0 %2687  ;;  %v2739_v17 = vsel %vm2738_vm7, %v2736_v50, %v2710_v60 }
 0x432   :  { %v2732_v51 = vsel %vm80_vm1, %v2670_v54, %v2688_v16  ;;  %v2742_v31 = vsel %vm2741_vm0, %v2739_v17, %v2718_v53 }
 0x433   :  { %v2745_v23 = vsel %vm2744_vm8, %v2742_v31, %v2726_v55 }
 0x434   :  { %v2749_v18 = vadd.f32 %v2745_v23, %v5663_v42 }
 0x436   :  { %v2704_v48 = vpop.permute.xlu1 %2703  ;;  %v2751_v35 = vmax.f32 %v2749_v18, 0.0 }
 0x439   :  { %v2696_v6 = vpop.permute.xlu0 %2695 }
 0x43a   :  { %v2734_v7 = vsel %vm1836_vm3, %v2732_v51, %v2696_v6 }
 0x43b   :  { %v2737_v27 = vsel %vm2735_vm6, %v2734_v7, %v2704_v48 }
 0x43c   :  { %v2740_v46 = vsel %vm2738_vm7, %v2737_v27, %v2712_v49 }
 0x43e   :  { %v2728_v41 = vpop.permute.xlu1 %2727 }
 0x441   :  { %v2720_v36 = vpop.permute.xlu0 %2719 }
 0x442   :  { %v2743_v45 = vsel %vm2741_vm0, %v2740_v46, %v2720_v36 }
 0x443   :  { %v2746_v62 = vsel %vm2744_vm8, %v2743_v45, %v2728_v41 }
 0x444   :  { %v2750_v3 = vadd.f32 %v2746_v62, %v5709_v38 }
 0x446   :  { %v2752_v61 = vmax.f32 %v2750_v3, 0.0 }
 0x448   :  { %v2761_v56 = vpack.c.bf16 %v2752_v61, %v2751_v35 }
 0x44a   :  { %4735 = vmatmul.msk.bf16.vlgmr.msra.gmra.mxu0 %vm2786_vm9, %v2761_v56 }
 0x4c7   :  { %v2802_v15 = vpop.f32.mrf.mxu0 }
 0x4c8   :  { %v6546_v2 = vadd.f32 %v4956_v22, %v2802_v15 }
 0x4ca   :  { %v2829_v32 = vrot.slane %v6546_v2, 4 }
 0x4cf   :  { %v2804_v58 = vpop.f32.mrf.mxu0 }
 0x4d0   :  { %v6548_v10 = vadd.f32 %v4956_v22, %v2804_v58 }
 0x4d2   :  { %v6552_v42 = vpack.i.bf16 %v6548_v10, %v6546_v2  ;;  %v2885_v25 = vrot.slane %v6548_v10, 4 }
 0x4d4   :  { %4912 = vrot.lane.b32.xlu1 %v6552_v42, %s5143_s25  ;;  %4907 = vrot.lane.b32.xlu2 %v6552_v42, %s5140_s3 }
 0x4d5   :  { %4902 = vrot.lane.b32.xlu0 %v6552_v42, %s5142_s24 }
 0x4dd   :  { %4917 = vrot.lane.b32.xlu0 %v6552_v42, %s5138_s0 }
 0x52e   :  { %v6562_v38 = vpop.permute.xlu2 %4907 }
 0x52f   :  { %v4910_v4 = vunpack.i.h.bf16 %v6562_v38  ;;  %v4909_v43 = vunpack.i.l.bf16 %v6562_v38  ;;  %4927 = vrot.lane.b32.xlu1 %v6562_v38, %s5138_s0 }
 0x531   :  { %v2883_v20 = vrot.slane %v4910_v4, 4  ;;  %v2827_v54 = vrot.slane %v4909_v43, 4  ;;  %v2886_v39 = vsel %vm158_vm2, %v4910_v4, %v2885_v25  ;;  %v2830_v40 = vsel %vm158_vm2, %v4909_v43, %v2829_v32 }
 0x532   :  { %v2894_v52 = vperm.slane %v2886_v39, %v5257_v24  ;;  %v2838_v8 = vperm.slane %v2830_v40, %v5257_v24 }
 0x533   :  { %v2884_v1 = vsel %vm158_vm2, %v2883_v20, %v6548_v10  ;;  %v2828_v30 = vsel %vm158_vm2, %v2827_v54, %v6546_v2 }
 0x534   :  { %v2890_v28 = vperm.slane %v2884_v1, %v5257_v24  ;;  %v2834_v29 = vperm.slane %v2828_v30, %v5257_v24  ;;  %v2921_v9 = vrot.slane %v2894_v52, 4  ;;  %v2865_v33 = vrot.slane %v2838_v8, 4 }
 0x536   :  { %v2909_v19 = vrot.slane %v2890_v28, 4  ;;  %v2853_v53 = vrot.slane %v2834_v29, 4 }
 0x546   :  { %v6576_v63 = vpop.permute.xlu1 %4912 }
 0x547   :  { %v4915_v11 = vunpack.i.h.bf16 %v6576_v63  ;;  %v4914_v14 = vunpack.i.l.bf16 %v6576_v63  ;;  %v4903_v26 = vpop.permute.xlu0 %4902  ;;  %4932 = vrot.lane.b32.xlu0 %v6576_v63, %s5138_s0 }
 0x548   :  { %v4905_v44 = vunpack.i.h.bf16 %v4903_v26  ;;  %v4904_v21 = vunpack.i.l.bf16 %v4903_v26  ;;  %4942 = vrot.lane.b32.xlu1 %v4903_v26, %s5135_s13  ;;  %4922 = vrot.lane.b32.xlu2 %v4903_v26, %s5138_s0  ;;  %s5154_s0 = smov 128  }
 0x549   :  { %v2895_v37 = vrot.slane %v4915_v11, 4  ;;  %v2839_v12 = vrot.slane %v4914_v14, 4 }
 0x54a   :  { %v2897_v47 = vrot.slane %v4905_v44, 4  ;;  %v2841_v57 = vrot.slane %v4904_v21, 4 }
 0x54b   :  { %v2896_v60 = vsel %vm158_vm2, %v2895_v37, %v4905_v44  ;;  %v2840_v34 = vsel %vm158_vm2, %v2839_v12, %v4904_v21 }
 0x54c   :  { %v2898_v59 = vsel %vm158_vm2, %v4915_v11, %v2897_v47  ;;  %v2902_v13 = vperm.slane %v2896_v60, %v5257_v24  ;;  %v2842_v5 = vsel %vm158_vm2, %v4914_v14, %v2841_v57  ;;  %v2846_v16 = vperm.slane %v2840_v34, %v5257_v24 }
 0x54d   :  { %v2906_v49 = vperm.slane %v2898_v59, %v5257_v24  ;;  %v2850_v50 = vperm.slane %v2842_v5, %v5257_v24 }
 0x54e   :  { %v2907_v48 = vrot.slane %v2902_v13, 4  ;;  %v2910_v17 = vsel %vm158_vm2, %v2902_v13, %v2909_v19  ;;  %v2851_v6 = vrot.slane %v2846_v16, 4  ;;  %v2854_v51 = vsel %vm158_vm2, %v2846_v16, %v2853_v53 }
 0x54f   :  { %v2918_v7 = vperm.slane %v2910_v17, %v5282_v0  ;;  %v2919_v31 = vrot.slane %v2906_v49, 4  ;;  %v2922_v55 = vsel %vm158_vm2, %v2906_v49, %v2921_v9  ;;  %v2862_v27 = vperm.slane %v2854_v51, %v5282_v0  ;;  %4947 = vrot.lane.b32.xlu0 %v6562_v38, %s5135_s13 }
 0x550   :  { %v2908_v23 = vsel %vm158_vm2, %v2907_v48, %v2890_v28  ;;  %v2930_v36 = vperm.slane %v2922_v55, %v5282_v0  ;;  %v2852_v46 = vsel %vm158_vm2, %v2851_v6, %v2834_v29  ;;  %v2863_v41 = vrot.slane %v2850_v50, 4  ;;  %4937 = vrot.lane.b32.xlu2 %v6552_v42, %s5135_s13 }
 0x551   :  { %v2914_v45 = vperm.slane %v2908_v23, %v5282_v0  ;;  %v2920_v18 = vsel %vm158_vm2, %v2919_v31, %v2894_v52  ;;  %v2933_v62 = vrot.slane %v2918_v7, 4  ;;  %v2858_v3 = vperm.slane %v2852_v46, %v5282_v0 }
 0x552   :  { %v2926_v35 = vperm.slane %v2920_v18, %v5282_v0  ;;  %v2937_v61 = vrot.slane %v2930_v36, 4  ;;  %v2864_v56 = vsel %vm158_vm2, %v2863_v41, %v2838_v8  ;;  %v2866_v15 = vsel %vm158_vm2, %v2850_v50, %v2865_v33 }
 0x553   :  { %v2931_v22 = vrot.slane %v2914_v45, 4  ;;  %v2934_v58 = vsel %vm158_vm2, 0.0, %v2933_v62  ;;  %v2993_v4 = vsel %vm158_vm2, %v2933_v62, %v2914_v45  ;;  %v2870_v43 = vperm.slane %v2864_v56, %v5282_v0 }
 0x554   :  { %v2935_v20 = vrot.slane %v2926_v35, 4  ;;  %v2938_v54 = vsel %vm158_vm2, 0.0, %v2937_v61  ;;  %v2997_v25 = vperm.slane %v2993_v4, %v5257_v24  ;;  %v2998_v32 = vrot.slane %v2934_v58, 4 }
 0x555   :  { %v2932_v1 = vsel %vm158_vm2, 0.0, %v2931_v22  ;;  %v3004_v30 = vsel %vm158_vm2, %v2937_v61, %v2926_v35  ;;  %v3009_v39 = vrot.slane %v2938_v54, 4  ;;  %v2874_v40 = vperm.slane %v2866_v15, %v5282_v0 }
 0x556   :  { %v2936_v28 = vsel %vm158_vm2, 0.0, %v2935_v20  ;;  %v2999_v38 = vsel %vm158_vm2, %v2998_v32, %v2932_v1  ;;  %v3008_v29 = vperm.slane %v3004_v30, %v5257_v24  ;;  %v2875_v11 = vrot.slane %v2858_v3, 4 }
 0x557   :  { %v2877_v14 = vrot.slane %v2862_v27, 4  ;;  %v2879_v26 = vrot.slane %v2870_v43, 4  ;;  %v3003_v52 = vperm.slane %v2999_v38, %v5257_v24  ;;  %v3017_v8 = vrot.slane %v2997_v25, 4 }
 0x558   :  { %v2881_v44 = vrot.slane %v2874_v40, 4  ;;  %v3010_v21 = vsel %vm158_vm2, %v3009_v39, %v2936_v28  ;;  %v2876_v37 = vsel %vm158_vm2, 0.0, %v2875_v11  ;;  %4952 = vrot.lane.b32.xlu2 %v6576_v63, %s5135_s13  ;;  %v3029_v6 = vrot.slane %v3008_v29, 4 }
 0x559   :  { %v2878_v12 = vsel %vm158_vm2, 0.0, %v2877_v14  ;;  %v2880_v42 = vsel %vm158_vm2, 0.0, %v2879_v26  ;;  %v2939_v47 = vsel %vm158_vm2, %v2877_v14, %v2858_v3  ;;  %v3014_v16 = vperm.slane %v3010_v21, %v5257_v24 }
 0x55a   :  { %v2882_v57 = vsel %vm158_vm2, 0.0, %v2881_v44  ;;  %v2943_v19 = vperm.slane %v2939_v47, %v5257_v24  ;;  %v2944_v53 = vrot.slane %v2878_v12, 4  ;;  %v2950_v60 = vsel %vm158_vm2, %v2881_v44, %v2870_v43 }
 0x55b   :  { %v2954_v34 = vperm.slane %v2950_v60, %v5257_v24  ;;  %v2955_v59 = vrot.slane %v2882_v57, 4  ;;  %v3018_v9 = vsel %vm158_vm2, %v3003_v52, %v3017_v8  ;;  %v3015_v51 = vrot.slane %v3003_v52, 4 }
 0x55c   :  { %v2945_v13 = vsel %vm158_vm2, %v2944_v53, %v2876_v37  ;;  %v2963_v5 = vrot.slane %v2943_v19, 4  ;;  %v3026_v48 = vperm.slane %v3018_v9, %v5282_v0  ;;  %v3027_v7 = vrot.slane %v3014_v16, 4 }
 0x55d   :  { %v2949_v33 = vperm.slane %v2945_v13, %v5257_v24  ;;  %v2956_v49 = vsel %vm158_vm2, %v2955_v59, %v2880_v42  ;;  %v2975_v50 = vrot.slane %v2954_v34, 4  ;;  %v3030_v63 = vsel %vm158_vm2, %v3014_v16, %v3029_v6 }
 0x55e   :  { %v2960_v17 = vperm.slane %v2956_v49, %v5257_v24  ;;  %v3045_v27 = vrot.slane %v3026_v48, 4  ;;  %v3038_v45 = vperm.slane %v3030_v63, %v5282_v0  ;;  %v3016_v62 = vsel %vm158_vm2, %v3015_v51, %v2997_v25 }
 0x55f   :  { %v2964_v31 = vsel %vm158_vm2, %v2949_v33, %v2963_v5  ;;  %v2961_v55 = vrot.slane %v2949_v33, 4  ;;  %v3022_v61 = vperm.slane %v3016_v62, %v5282_v0  ;;  %v3028_v56 = vsel %vm158_vm2, %v3027_v7, %v3008_v29 }
 0x560   :  { %v2972_v23 = vperm.slane %v2964_v31, %v5282_v0  ;;  %v2976_v36 = vsel %vm158_vm2, %v2960_v17, %v2975_v50  ;;  %v2973_v46 = vrot.slane %v2960_v17, 4  ;;  %v3043_v22 = vrot.slane %v3038_v45, 4  ;;  %v4918_v50 = vpop.permute.xlu0 %4917 }
 0x561   :  { %v2984_v41 = vperm.slane %v2976_v36, %v5282_v0  ;;  %v2962_v18 = vsel %vm158_vm2, %v2961_v55, %v2943_v19  ;;  %v3034_v4 = vperm.slane %v3028_v56, %v5282_v0  ;;  %v3046_v20 = vsel %vm158_vm2, %v3038_v45, %v3045_v27 }
 0x562   :  { %v2968_v3 = vperm.slane %v2962_v18, %v5282_v0  ;;  %v2974_v35 = vsel %vm158_vm2, %v2973_v46, %v2954_v34  ;;  %v2991_v43 = vrot.slane %v2972_v23, 4  ;;  %v3041_v32 = vrot.slane %v3022_v61, 4 }
 0x563   :  { %v2989_v15 = vrot.slane %v2984_v41, 4  ;;  %v2980_v58 = vperm.slane %v2974_v35, %v5282_v0  ;;  %v3044_v1 = vsel %vm158_vm2, %v3043_v22, %v3026_v48  ;;  %v3039_v39 = vrot.slane %v3034_v4, 4 }
 0x564   :  { %v2987_v54 = vrot.slane %v2968_v3, 4  ;;  %v3052_v28 = vpack.c.bf16 %v3044_v1, %v3044_v1  ;;  %v2992_v38 = vsel %vm158_vm2, %v2984_v41, %v2991_v43  ;;  %v3054_v29 = vpack.c.bf16 %v3046_v20, %v3046_v20 }
 0x565   :  { %v2990_v25 = vsel %vm158_vm2, %v2989_v15, %v2972_v23  ;;  %v2985_v30 = vrot.slane %v2980_v58, 4  ;;  %v3040_v14 = vsel %vm158_vm2, %v3039_v39, %v3022_v61  ;;  %v3053_v26 = vpack.c.bf16 %v2992_v38, %v2992_v38 }
 0x566   :  { %v3051_v40 = vpack.c.bf16 %v2990_v25, %v2990_v25  ;;  %v2988_v52 = vsel %vm158_vm2, %v2980_v58, %v2987_v54  ;;  %v6667_v44 = vunpack.c.l.b16 %v3052_v28  ;;  %v3048_v37 = vpack.c.bf16 %v3040_v14, %v3040_v14 }
 0x567   :  { %v2986_v11 = vsel %vm158_vm2, %v2985_v30, %v2968_v3  ;;  %v6669_v12 = vunpack.c.l.b16 %v3053_v26  ;;  %v6671_v42 = vunpack.c.l.b16 %v3054_v29  ;;  %v3042_v47 = vsel %vm158_vm2, %v3034_v4, %v3041_v32 }
 0x568   :  { %v6665_v8 = vunpack.c.l.b16 %v3051_v40  ;;  %v3047_v21 = vpack.c.bf16 %v2986_v11, %v2986_v11  ;;  %v3049_v57 = vpack.c.bf16 %v2988_v52, %v2988_v52  ;;  %v6678_v60 = vunpack.c.l.b16 %v3048_v37 }
 0x569   :  { %v3050_v34 = vpack.c.bf16 %v3042_v47, %v3042_v47  ;;  %v3653_v59 = vpack.c.b16 %v6671_v42, %v6669_v12  ;;  %v4920_v51 = vunpack.i.h.bf16 %v4918_v50  ;;  %v4919_v7 = vunpack.i.l.bf16 %v4918_v50 }
 0x56a   :  { %v3623_v19 = vpack.c.b16 %v6667_v44, %v6665_v8  ;;  %v6676_v53 = vunpack.c.l.b16 %v3047_v21  ;;  %v6682_v13 = vunpack.c.l.b16 %v3049_v57 }
 0x56b   :  { %v6686_v16 = vunpack.c.l.b16 %v3050_v34  ;;  %v3137_v27 = vrot.slane %v4920_v51, 4  ;;  %v3081_v23 = vrot.slane %v4919_v7, 4 }
 0x56c   :  { %v3563_v5 = vpack.c.b16 %v6678_v60, %v6676_v53 }
 0x56d   :  { %v3593_v9 = vpack.c.b16 %v6686_v16, %v6682_v13 }
 0x5a1   :  { %v4928_v49 = vpop.permute.xlu1 %4927 }
 0x5a2   :  { %v4923_v33 = vpop.permute.xlu2 %4922  ;;  %v4930_v48 = vunpack.i.h.bf16 %v4928_v49  ;;  %v4929_v17 = vunpack.i.l.bf16 %v4928_v49 }
 0x5a3   :  { %v4925_v45 = vunpack.i.h.bf16 %v4923_v33  ;;  %v4924_v18 = vunpack.i.l.bf16 %v4923_v33 }
 0x5a4   :  { %v3135_v31 = vrot.slane %v4930_v48, 4  ;;  %v3079_v55 = vrot.slane %v4929_v17, 4  ;;  %v3082_v63 = vsel %vm158_vm2, %v4929_v17, %v3081_v23  ;;  %v3138_v41 = vsel %vm158_vm2, %v4930_v48, %v3137_v27 }
 0x5a5   :  { %v3090_v35 = vperm.slane %v3082_v63, %v5257_v24  ;;  %v3146_v56 = vperm.slane %v3138_v41, %v5257_v24  ;;  %v3149_v43 = vrot.slane %v4925_v45, 4  ;;  %v3093_v20 = vrot.slane %v4924_v18, 4 }
 0x5a6   :  { %v3080_v36 = vsel %vm158_vm2, %v3079_v55, %v4919_v7  ;;  %v3136_v46 = vsel %vm158_vm2, %v3135_v31, %v4920_v51 }
 0x5a7   :  { %v3086_v3 = vperm.slane %v3080_v36, %v5257_v24  ;;  %v3142_v61 = vperm.slane %v3136_v46, %v5257_v24  ;;  %v3117_v32 = vrot.slane %v3090_v35, 4  ;;  %v3173_v1 = vrot.slane %v3146_v56, 4 }
 0x5a9   :  { %v3105_v54 = vrot.slane %v3086_v3, 4  ;;  %v3161_v25 = vrot.slane %v3142_v61, 4 }
 0x5aa   :  { %v6690_v6 = vpop.permute.xlu2 %4937 }
 0x5ab   :  { %v4940_v15 = vunpack.i.h.bf16 %v6690_v6  ;;  %v4939_v22 = vunpack.i.l.bf16 %v6690_v6 }
 0x5ad   :  { %v6708_v39 = vrot.slane %v4940_v15, 4  ;;  %v6712_v40 = vrot.slane %v4939_v22, 4 }
 0x5b2   :  { %v6696_v62 = vpop.permute.xlu2 %4952 }
 0x5b3   :  { %v4955_v58 = vunpack.i.h.bf16 %v6696_v62  ;;  %v4954_v4 = vunpack.i.l.bf16 %v6696_v62 }
 0x5b5   :  { %v6718_v11 = vrot.slane %v4955_v58, 4  ;;  %v3343_v14 = vrot.slane %v4954_v4, 4 }
 0x5b9   :  { %v4933_v30 = vpop.permute.xlu0 %4932 }
 0x5ba   :  { %v4935_v28 = vunpack.i.h.bf16 %v4933_v30  ;;  %v4934_v38 = vunpack.i.l.bf16 %v4933_v30  ;;  %v6714_v29 = vpop.permute.xlu1 %4942 }
 0x5bb   :  { %v4945_v26 = vunpack.i.h.bf16 %v6714_v29  ;;  %v4944_v52 = vunpack.i.l.bf16 %v6714_v29 }
 0x5bc   :  { %v3147_v21 = vrot.slane %v4935_v28, 4  ;;  %v3091_v37 = vrot.slane %v4934_v38, 4  ;;  %v3094_v47 = vsel %vm158_vm2, %v4934_v38, %v3093_v20  ;;  %v3150_v57 = vsel %vm158_vm2, %v4935_v28, %v3149_v43 }
 0x5bd   :  { %v3102_v34 = vperm.slane %v3094_v47, %v5257_v24  ;;  %v3158_v33 = vperm.slane %v3150_v57, %v5257_v24  ;;  %v3401_v49 = vrot.slane %v4945_v26, 4  ;;  %v3344_v50 = vsel %vm158_vm2, %v3343_v14, %v4944_v52 }
 0x5be   :  { %v3092_v48 = vsel %vm158_vm2, %v3091_v37, %v4924_v18  ;;  %v3148_v17 = vsel %vm158_vm2, %v3147_v21, %v4925_v45  ;;  %v3345_v51 = vrot.slane %v4944_v52, 4  ;;  %v6732_v7 = vperm.slane %v3344_v50, %v5257_v24 }
 0x5bf   :  { %v3098_v31 = vperm.slane %v3092_v48, %v5257_v24  ;;  %v3115_v55 = vrot.slane %v3102_v34, 4  ;;  %v3118_v27 = vsel %vm158_vm2, %v3102_v34, %v3117_v32  ;;  %v3154_v23 = vperm.slane %v3148_v17, %v5257_v24 }
 0x5c0   :  { %v3126_v36 = vperm.slane %v3118_v27, %v5282_v0  ;;  %v3171_v63 = vrot.slane %v3158_v33, 4  ;;  %v3174_v46 = vsel %vm158_vm2, %v3158_v33, %v3173_v1  ;;  %v3346_v41 = vsel %vm158_vm2, %v4954_v4, %v3345_v51 }
 0x5c1   :  { %v3103_v18 = vrot.slane %v3098_v31, 4  ;;  %v3106_v45 = vsel %vm158_vm2, %v3098_v31, %v3105_v54  ;;  %v3116_v43 = vsel %vm158_vm2, %v3115_v55, %v3090_v35  ;;  %v3159_v20 = vrot.slane %v3154_v23, 4 }
 0x5c2   :  { %v3114_v30 = vperm.slane %v3106_v45, %v5282_v0  ;;  %v3122_v28 = vperm.slane %v3116_v43, %v5282_v0  ;;  %v3133_v32 = vrot.slane %v3126_v36, 4  ;;  %v3162_v38 = vsel %vm158_vm2, %v3154_v23, %v3161_v25  ;;  %v4948_v45 = vpop.permute.xlu0 %4947 }
 0x5c3   :  { %v3104_v14 = vsel %vm158_vm2, %v3103_v18, %v3086_v3  ;;  %v3160_v52 = vsel %vm158_vm2, %v3159_v20, %v3142_v61  ;;  %v3170_v1 = vperm.slane %v3162_v38, %v5282_v0  ;;  %v3172_v4 = vsel %vm158_vm2, %v3171_v63, %v3146_v56 }
 0x5c4   :  { %v3110_v54 = vperm.slane %v3104_v14, %v5282_v0  ;;  %v3129_v21 = vrot.slane %v3114_v30, 4  ;;  %v3131_v35 = vrot.slane %v3122_v28, 4  ;;  %v3134_v37 = vsel %vm158_vm2, 0.0, %v3133_v32 }
 0x5c5   :  { %v3166_v47 = vperm.slane %v3160_v52, %v5282_v0  ;;  %v3178_v57 = vperm.slane %v3172_v4, %v5282_v0  ;;  %v3182_v25 = vperm.slane %v3174_v46, %v5282_v0  ;;  %v3185_v34 = vrot.slane %v3170_v1, 4 }
 0x5c6   :  { %v3127_v3 = vrot.slane %v3110_v54, 4  ;;  %v3130_v61 = vsel %vm158_vm2, 0.0, %v3129_v21  ;;  %v3132_v33 = vsel %vm158_vm2, 0.0, %v3131_v35  ;;  %v3191_v56 = vsel %vm158_vm2, %v3129_v21, %v3110_v54 }
 0x5c7   :  { %v3183_v50 = vrot.slane %v3166_v47, 4  ;;  %v6758_v48 = vsel %vm158_vm2, 0.0, %v3185_v34  ;;  %v3187_v17 = vrot.slane %v3178_v57, 4  ;;  %v3189_v51 = vrot.slane %v3182_v25, 4 }
 0x5c8   :  { %v3128_v31 = vsel %vm158_vm2, 0.0, %v3127_v3  ;;  %v3196_v55 = vrot.slane %v3130_v61, 4  ;;  %v3202_v27 = vsel %vm158_vm2, %v3133_v32, %v3122_v28  ;;  %v3207_v23 = vrot.slane %v3134_v37, 4 }
 0x5c9   :  { %v6763_v36 = vsel %vm158_vm2, 0.0, %v3183_v50  ;;  %v3188_v63 = vsel %vm158_vm2, 0.0, %v3187_v17  ;;  %v3190_v46 = vsel %vm158_vm2, 0.0, %v3189_v51  ;;  %v6768_v18 = vperm.slane %v3202_v27, %v5257_v24 }
 0x5ca   :  { %v6771_v43 = vsel %vm158_vm2, %v3207_v23, %v3132_v33  ;;  %v6774_v20 = vsel %vm158_vm2, %v3185_v34, %v3166_v47  ;;  %v3250_v30 = vrot.slane %v6758_v48, 4  ;;  %v3256_v28 = vsel %vm158_vm2, %v3189_v51, %v3178_v57 }
 0x5cb   :  { %v6779_v32 = vperm.slane %v3256_v28, %v5257_v24  ;;  %v3261_v38 = vrot.slane %v3190_v46, 4  ;;  %v3354_v14 = vperm.slane %v3346_v41, %v5257_v24  ;;  %v3355_v52 = vrot.slane %v6732_v7, 4 }
 0x5cc   :  { %v3400_v1 = vsel %vm158_vm2, %v6718_v11, %v4945_v26  ;;  %v3402_v4 = vsel %vm158_vm2, %v4955_v58, %v3401_v49  ;;  %v4950_v54 = vunpack.i.h.bf16 %v4948_v45  ;;  %v4949_v21 = vunpack.i.l.bf16 %v4948_v45 }
 0x5cd   :  { %v6791_v35 = vsel %vm158_vm2, %v3261_v38, %v3188_v63  ;;  %v3367_v37 = vrot.slane %v3354_v14, 4  ;;  %v3406_v47 = vperm.slane %v3400_v1, %v5257_v24  ;;  %v3410_v41 = vperm.slane %v3402_v4, %v5257_v24 }
 0x5ce   :  { %v3387_v57 = vrot.slane %v4950_v54, 4  ;;  %v3331_v25 = vrot.slane %v4949_v21, 4  ;;  %v3334_v29 = vsel %vm158_vm2, %v4949_v21, %v6712_v40  ;;  %v3390_v62 = vsel %vm158_vm2, %v4950_v54, %v6708_v39 }
 0x5cf   :  { %v3411_v11 = vrot.slane %v3406_v47, 4  ;;  %v3423_v58 = vrot.slane %v3410_v41, 4  ;;  %v3342_v26 = vperm.slane %v3334_v29, %v5257_v24  ;;  %v3398_v49 = vperm.slane %v3390_v62, %v5257_v24 }
 0x5d0   :  { %v3332_v34 = vsel %vm158_vm2, %v3331_v25, %v4939_v22  ;;  %v3388_v3 = vsel %vm158_vm2, %v3387_v57, %v4940_v15  ;;  %v6808_v61 = vperm.slane %v3191_v56, %v5257_v24  ;;  %v3197_v40 = vsel %vm158_vm2, %v3196_v55, %v3128_v31 }
 0x5d1   :  { %v3338_v39 = vperm.slane %v3332_v34, %v5257_v24  ;;  %v3368_v33 = vsel %vm158_vm2, %v3367_v37, %v3342_v26  ;;  %v3369_v50 = vrot.slane %v3342_v26, 4  ;;  %v3394_v17 = vperm.slane %v3388_v3, %v5257_v24 }
 0x5d2   :  { %v3374_v51 = vperm.slane %v3368_v33, %v5282_v0  ;;  %v3424_v22 = vsel %vm158_vm2, %v3423_v58, %v3398_v49  ;;  %v3425_v27 = vrot.slane %v3398_v49, 4  ;;  %v6817_v6 = vperm.slane %v3197_v40, %v5257_v24 }
 0x5d3   :  { %v3356_v15 = vsel %vm158_vm2, %v3355_v52, %v3338_v39  ;;  %v3357_v56 = vrot.slane %v3338_v39, 4  ;;  %v3370_v31 = vsel %vm158_vm2, %v3354_v14, %v3369_v50  ;;  %v3412_v55 = vsel %vm158_vm2, %v3411_v11, %v3394_v17 }
 0x5d4   :  { %v3362_v23 = vperm.slane %v3356_v15, %v5282_v0  ;;  %v3378_v63 = vperm.slane %v3370_v31, %v5282_v0  ;;  %v3383_v46 = vrot.slane %v3374_v51, 4  ;;  %v3413_v45 = vrot.slane %v3394_v17, 4 }
 0x5d5   :  { %v3358_v28 = vsel %vm158_vm2, %v6732_v7, %v3357_v56  ;;  %v3418_v38 = vperm.slane %v3412_v55, %v5282_v0  ;;  %v3426_v1 = vsel %vm158_vm2, %v3410_v41, %v3425_v27  ;;  %v3430_v52 = vperm.slane %v3424_v22, %v5282_v0 }
 0x5d6   :  { %v3366_v4 = vperm.slane %v3358_v28, %v5282_v0  ;;  %v3379_v14 = vrot.slane %v3362_v23, 4  ;;  %v3384_v54 = vsel %vm158_vm2, 0.0, %v3383_v46  ;;  %v3385_v21 = vrot.slane %v3378_v63, 4 }
 0x5d7   :  { %v3414_v37 = vsel %vm158_vm2, %v3406_v47, %v3413_v45  ;;  %v3434_v57 = vperm.slane %v3426_v1, %v5282_v0  ;;  %v3435_v25 = vrot.slane %v3418_v38, 4  ;;  %v3439_v29 = vrot.slane %v3430_v52, 4 }
 0x5d8   :  { %v3380_v7 = vsel %vm158_vm2, 0.0, %v3379_v14  ;;  %v3381_v62 = vrot.slane %v3366_v4, 4  ;;  %v3386_v11 = vsel %vm158_vm2, 0.0, %v3385_v21  ;;  %v3422_v41 = vperm.slane %v3414_v37, %v5282_v0 }
 0x5d9   :  { %v3436_v58 = vsel %vm158_vm2, 0.0, %v3435_v25  ;;  %v3440_v26 = vsel %vm158_vm2, 0.0, %v3439_v29  ;;  %v3441_v49 = vrot.slane %v3434_v57, 4  ;;  %v3454_v34 = vsel %vm158_vm2, %v3385_v21, %v3374_v51 }
 0x5da   :  { %v3382_v47 = vsel %vm158_vm2, 0.0, %v3381_v62  ;;  %v3437_v3 = vrot.slane %v3422_v41, 4  ;;  %v3443_v40 = vsel %vm158_vm2, %v3381_v62, %v3362_v23  ;;  %v6842_v39 = vperm.slane %v3454_v34, %v5257_v24 }
 0x5db   :  { %v3442_v33 = vsel %vm158_vm2, 0.0, %v3441_v49  ;;  %v6846_v50 = vperm.slane %v3443_v40, %v5257_v24  ;;  %v3448_v17 = vrot.slane %v3382_v47, 4  ;;  %v3459_v22 = vrot.slane %v3386_v11, 4 }
 0x5dc   :  { %v3438_v27 = vsel %vm158_vm2, 0.0, %v3437_v3  ;;  %v3479_v15 = vrot.slane %v6842_v39, 4  ;;  %v3497_v51 = vsel %vm158_vm2, %v3437_v3, %v3418_v38  ;;  %v3508_v56 = vsel %vm158_vm2, %v3441_v49, %v3430_v52 }
 0x5dd   :  { %v6853_v31 = vsel %vm158_vm2, %v3448_v17, %v3380_v7  ;;  %v3460_v55 = vsel %vm158_vm2, %v3459_v22, %v3384_v54  ;;  %v6857_v23 = vperm.slane %v3497_v51, %v5257_v24  ;;  %v3502_v63 = vrot.slane %v3438_v27, 4 }
 0x5de   :  { %v6860_v46 = vperm.slane %v3460_v55, %v5257_v24  ;;  %v6863_v45 = vperm.slane %v3508_v56, %v5257_v24  ;;  %v3513_v28 = vrot.slane %v3442_v33, 4  ;;  %v3212_v38 = vperm.slane %v6771_v43, %v5257_v24 }
 0x5df   :  { %v6868_v1 = vsel %vm158_vm2, %v3502_v63, %v3436_v58  ;;  %v3215_v52 = vrot.slane %v6808_v61, 4  ;;  %v3227_v4 = vrot.slane %v6768_v18, 4  ;;  %v3249_v14 = vperm.slane %v6774_v20, %v5257_v24 }
 0x5e0   :  { %v3477_v54 = vrot.slane %v6860_v46, 4  ;;  %v3514_v21 = vsel %vm158_vm2, %v3513_v28, %v3440_v26  ;;  %v3533_v37 = vrot.slane %v6863_v45, 4  ;;  %v3251_v43 = vsel %vm158_vm2, %v3250_v30, %v6763_v36 }
 0x5e1   :  { %v6882_v57 = vperm.slane %v3514_v21, %v5257_v24  ;;  %v3216_v25 = vsel %vm158_vm2, %v6817_v6, %v3215_v52  ;;  %v3228_v29 = vsel %vm158_vm2, %v3212_v38, %v3227_v4  ;;  %v3255_v20 = vperm.slane %v3251_v43, %v5257_v24 }
 0x5e2   :  { %v3224_v7 = vperm.slane %v3216_v25, %v5282_v0  ;;  %v3236_v62 = vperm.slane %v3228_v29, %v5282_v0  ;;  %v3266_v11 = vperm.slane %v6791_v35, %v5257_v24  ;;  %v3269_v48 = vrot.slane %v3249_v14, 4 }
 0x5e3   :  { %v3531_v36 = vrot.slane %v6882_v57, 4  ;;  %v3281_v30 = vrot.slane %v6779_v32, 4  ;;  %v3213_v41 = vrot.slane %v6817_v6, 4  ;;  %v3225_v58 = vrot.slane %v3212_v38, 4 }
 0x5e4   :  { %v3241_v26 = vrot.slane %v3236_v62, 4  ;;  %v3270_v49 = vsel %vm158_vm2, %v3255_v20, %v3269_v48  ;;  %v3267_v34 = vrot.slane %v3255_v20, 4  ;;  %v3279_v47 = vrot.slane %v3266_v11, 4 }
 0x5e5   :  { %v3278_v3 = vperm.slane %v3270_v49, %v5282_v0  ;;  %v3282_v40 = vsel %vm158_vm2, %v3266_v11, %v3281_v30  ;;  %v3214_v35 = vsel %vm158_vm2, %v3213_v41, %v6808_v61  ;;  %v3226_v33 = vsel %vm158_vm2, %v3225_v58, %v6768_v18 }
 0x5e6   :  { %v3242_v17 = vsel %vm158_vm2, %v3241_v26, %v3224_v7  ;;  %v3290_v6 = vperm.slane %v3282_v40, %v5282_v0  ;;  %v3220_v22 = vperm.slane %v3214_v35, %v5282_v0  ;;  %v3232_v27 = vperm.slane %v3226_v33, %v5282_v0 }
 0x5e7   :  { %v3303_v51 = vpack.c.bf16 %v3242_v17, %v3242_v17  ;;  %v3268_v56 = vsel %vm158_vm2, %v3267_v34, %v3249_v14  ;;  %v3280_v55 = vsel %vm158_vm2, %v3279_v47, %v6779_v32  ;;  %v3243_v63 = vrot.slane %v3224_v7, 4 }
 0x5e8   :  { %v3295_v28 = vrot.slane %v3290_v6, 4  ;;  %v3237_v61 = vrot.slane %v3232_v27, 4  ;;  %v3274_v38 = vperm.slane %v3268_v56, %v5282_v0  ;;  %v3286_v18 = vperm.slane %v3280_v55, %v5282_v0 }
 0x5e9   :  { %v3626_v52 = vunpack.c.l.b16 %v3303_v51  ;;  %v3244_v4 = vsel %vm158_vm2, %v3236_v62, %v3243_v63  ;;  %v3297_v21 = vrot.slane %v3278_v3, 4  ;;  %v3239_v43 = vrot.slane %v3220_v22, 4 }
 0x5ea   :  { %v3296_v25 = vsel %vm158_vm2, %v3295_v28, %v3278_v3  ;;  %v3238_v29 = vsel %vm158_vm2, %v3237_v61, %v3220_v22  ;;  %v3291_v14 = vrot.slane %v3286_v18, 4  ;;  %v3305_v20 = vpack.c.bf16 %v3244_v4, %v3244_v4 }
 0x5eb   :  { %v3304_v11 = vpack.c.bf16 %v3296_v25, %v3296_v25  ;;  %v3299_v32 = vpack.c.bf16 %v3238_v29, %v3238_v29  ;;  %v3298_v7 = vsel %vm158_vm2, %v3290_v6, %v3297_v21  ;;  %v3240_v48 = vsel %vm158_vm2, %v3232_v27, %v3239_v43 }
 0x5ec   :  { %v3292_v30 = vsel %vm158_vm2, %v3291_v14, %v3274_v38  ;;  %v3306_v41 = vpack.c.bf16 %v3298_v7, %v3298_v7  ;;  %v3656_v58 = vunpack.c.l.b16 %v3305_v20  ;;  %v3293_v26 = vrot.slane %v3274_v38, 4 }
 0x5ed   :  { %v3627_v62 = vunpack.c.l.b16 %v3304_v11  ;;  %v3300_v49 = vpack.c.bf16 %v3292_v30, %v3292_v30  ;;  %v3566_v34 = vunpack.c.l.b16 %v3299_v32  ;;  %v3301_v47 = vpack.c.bf16 %v3240_v48, %v3240_v48 }
 0x5ee   :  { %v3657_v3 = vunpack.c.l.b16 %v3306_v41  ;;  %v3294_v40 = vsel %vm158_vm2, %v3286_v18, %v3293_v26  ;;  %v3453_v35 = vperm.slane %v6853_v31, %v5257_v24  ;;  %v3467_v33 = vrot.slane %v6846_v50, 4 }
 0x5ef   :  { %v3628_v17 = vpack.c.b16 %v3627_v62, %v3626_v52  ;;  %v3567_v6 = vunpack.c.l.b16 %v3300_v49  ;;  %v3302_v22 = vpack.c.bf16 %v3294_v40, %v3294_v40  ;;  %v3596_v27 = vunpack.c.l.b16 %v3301_v47 }
 0x5f0   :  { %v3658_v51 = vpack.c.b16 %v3657_v3, %v3656_v58  ;;  %v3468_v56 = vsel %vm158_vm2, %v3453_v35, %v3467_v33  ;;  %v3480_v55 = vsel %vm158_vm2, %v6860_v46, %v3479_v15  ;;  %v3507_v63 = vperm.slane %v6868_v1, %v5257_v24 }
 0x5f1   :  { %v3633_v28 = vsel %vm80_vm1, %v3628_v17, 0  ;;  %v3568_v31 = vpack.c.b16 %v3567_v6, %v3566_v34  ;;  %v3597_v61 = vunpack.c.l.b16 %v3302_v22  ;;  %v3476_v38 = vperm.slane %v3468_v56, %v5282_v0 }
 0x5f2   :  { %3642 = vmatpush.bf16.xpose.msra.mxu3 %v3633_v28  ;;  %v3663_v18 = vsel %vm80_vm1, %v3658_v51, 0  ;;  %v3488_v52 = vperm.slane %v3480_v55, %v5282_v0  ;;  %v3521_v4 = vrot.slane %v6857_v23, 4  ;;  %v3534_v15 = vsel %vm158_vm2, %v6882_v57, %v3533_v37 }
 0x5f3   :  { %v3573_v1 = vsel %vm80_vm1, %v3568_v31, 0  ;;  %3672 = vmatpush.bf16.xpose.msrb.mxu0 %v3663_v18  ;;  %v3598_v21 = vpack.c.b16 %v3597_v61, %v3596_v27  ;;  %v3542_v43 = vperm.slane %v3534_v15, %v5282_v0  ;;  %v3465_v25 = vrot.slane %v3453_v35, 4 }
 0x5f4   :  { %3582 = vmatpush.bf16.xpose.msra.mxu1 %v3573_v1  ;;  %v3493_v29 = vrot.slane %v3488_v52, 4  ;;  %v3522_v14 = vsel %vm158_vm2, %v3507_v63, %v3521_v4  ;;  %v3478_v20 = vsel %vm158_vm2, %v3477_v54, %v6842_v39  ;;  %v3519_v11 = vrot.slane %v3507_v63, 4 }
 0x5f5   :  { %v3603_v32 = vsel %vm80_vm1, %v3598_v21, 0  ;;  %v3530_v37 = vperm.slane %v3522_v14, %v5282_v0  ;;  %v3547_v7 = vrot.slane %v3542_v43, 4  ;;  %v3466_v48 = vsel %vm158_vm2, %v3465_v25, %v6846_v50 }
 0x5f6   :  { %3612 = vmatpush.bf16.xpose.msra.mxu2 %v3603_v32  ;;  %v3494_v30 = vsel %vm158_vm2, %v3493_v29, %v3476_v38  ;;  %v3472_v41 = vperm.slane %v3466_v48, %v5282_v0  ;;  %v3484_v58 = vperm.slane %v3478_v20, %v5282_v0  ;;  %v3520_v46 = vsel %vm158_vm2, %v3519_v11, %v6857_v23 }
 0x5f7   :  { %v3548_v39 = vsel %vm158_vm2, %v3547_v7, %v3530_v37  ;;  %v3555_v54 = vpack.c.bf16 %v3494_v30, %v3494_v30  ;;  %v3526_v26 = vperm.slane %v3520_v46, %v5282_v0  ;;  %v3532_v50 = vsel %vm158_vm2, %v3531_v36, %v6863_v45 }
 0x5f8   :  { %v3556_v62 = vpack.c.bf16 %v3548_v39, %v3548_v39  ;;  %v3489_v49 = vrot.slane %v3484_v58, 4  ;;  %v3538_v34 = vperm.slane %v3532_v50, %v5282_v0  ;;  %v3495_v47 = vrot.slane %v3476_v38, 4  ;;  %v6996_v50 = vld [vmem:[%s7376_s1] sm:$0xff] }
 0x5f9   :  { %4738 = vmatmul.msk.bf16.vlgmr.msra.gmra.mxu3 %vm80_vm1, %v3623_v19  ;;  %v3854_v23 = vunpack.c.l.b16 %v3555_v54  ;;  %v3549_v3 = vrot.slane %v3530_v37, 4  ;;  %v3491_v40 = vrot.slane %v3472_v41, 4  ;;  %v3545_v35 = vrot.slane %v3526_v26, 4 }
 0x5fa   :  { %4739 = vmatmul.msk.bf16.vlgmr.msrb.gmra.mxu0 %vm80_vm1, %v3653_v59  ;;  %v3855_v45 = vunpack.c.l.b16 %v3556_v62  ;;  %v3490_v57 = vsel %vm158_vm2, %v3489_v49, %v3472_v41  ;;  %v3543_v36 = vrot.slane %v3538_v34, 4  ;;  %v3496_v33 = vsel %vm158_vm2, %v3488_v52, %v3495_v47 }
 0x5fb   :  { %4736 = vmatmul.msk.bf16.vlgmr.msra.gmra.mxu1 %vm80_vm1, %v3563_v5  ;;  %v3551_v8 = vpack.c.bf16 %v3490_v57, %v3490_v57  ;;  %v3550_v44 = vsel %vm158_vm2, %v3542_v43, %v3549_v3  ;;  %v3557_v19 = vpack.c.bf16 %v3496_v33, %v3496_v33  ;;  %v3492_v17 = vsel %vm158_vm2, %v3484_v58, %v3491_v40 }
 0x5fc   :  { %v3856_v12 = vpack.c.b16 %v3855_v45, %v3854_v23  ;;  %v3544_v42 = vsel %vm158_vm2, %v3543_v36, %v3526_v26  ;;  %v3558_v59 = vpack.c.bf16 %v3550_v44, %v3550_v44  ;;  %v3546_v6 = vsel %vm158_vm2, %v3538_v34, %v3545_v35 }
 0x5fd   :  { %4737 = vmatmul.msk.bf16.vlgmr.msra.gmra.mxu2 %vm80_vm1, %v3593_v9  ;;  %v3552_v53 = vpack.c.bf16 %v3544_v42, %v3544_v42  ;;  %v3798_v60 = vunpack.c.l.b16 %v3551_v8  ;;  %v3882_v5 = vunpack.c.l.b16 %v3557_v19  ;;  %v3553_v22 = vpack.c.bf16 %v3492_v17, %v3492_v17 }
 0x5fe   :  { %3868 = vmatpush.bf16.msrb.mxu3 %v3856_v12  ;;  %v3883_v27 = vunpack.c.l.b16 %v3558_v59  ;;  %v3554_v51 = vpack.c.bf16 %v3546_v6, %v3546_v6  ;;  %v7006_v6 = vld [vmem:[%s7376_s1 + $0x8] sm:$0xff] }
 0x5ff   :  { %v3799_v56 = vunpack.c.l.b16 %v3552_v53  ;;  %v3826_v55 = vunpack.c.l.b16 %v3553_v22 }
 0x600   :  { %v3884_v63 = vpack.c.b16 %v3883_v27, %v3882_v5  ;;  %v3827_v28 = vunpack.c.l.b16 %v3554_v51 }
 0x601   :  { %v3800_v31 = vpack.c.b16 %v3799_v56, %v3798_v60 }
 0x602   :  { %3896 = vmatpush.bf16.msra.mxu0 %v3884_v63  ;;  %v3828_v61 = vpack.c.b16 %v3827_v28, %v3826_v55 }
 0x603   :  { %3812 = vmatpush.bf16.msrb.mxu1 %v3800_v31 }
 0x604   :  { %3840 = vmatpush.bf16.msrb.mxu2 %v3828_v61 }
 0x677   :  { %v6984_v18 = vpop.f32.mrf.mxu0 }
 0x678   :  { %v3584_v38 = vpop.f32.mrf.mxu1  ;;  %v3697_v11 = vsel %vm1836_vm3, %v6984_v18, -inf }
 0x679   :  { %v3679_v13 = vsel %vm1836_vm3, %v3584_v38, -inf }
 0x67a   :  { %3680 = vmax.xlane.f32.xlu0 %v3679_v13 }
 0x67c   :  { %v3644_v16 = vpop.f32.mrf.mxu3 }
 0x67d   :  { %v3691_v9 = vsel %vm1836_vm3, %v3644_v16, -inf }
 0x67e   :  { %3692 = vmax.xlane.f32.xlu1 %v3691_v9 }
 0x67f   :  { %v3676_v14 = vpop.f32.mrf.mxu0 }
 0x680   :  { %v3614_v52 = vpop.f32.mrf.mxu2  ;;  %v3586_v21 = vpop.f32.mrf.mxu1  ;;  %v3700_v20 = vsel %vm1836_vm3, %v3676_v14, -inf }
 0x681   :  { %v3685_v4 = vsel %vm1836_vm3, %v3614_v52, -inf  ;;  %v3682_v29 = vsel %vm1836_vm3, %v3586_v21, -inf }
 0x682   :  { %3686 = vmax.xlane.f32.xlu2 %v3685_v4 }
 0x684   :  { %v3646_v15 = vpop.f32.mrf.mxu3 }
 0x685   :  { %v3694_v1 = vsel %vm1836_vm3, %v3646_v15, -inf }
 0x686   :  { %3695 = vmax.xlane.f32.xlu0 %v3694_v1 }
 0x688   :  { %v3616_v43 = vpop.f32.mrf.mxu2 }
 0x689   :  { %v3688_v25 = vsel %vm1836_vm3, %v3616_v43, -inf }
 0x68a   :  { %3689 = vmax.xlane.f32.xlu1 %v3688_v25  ;;  %3683 = vmax.xlane.f32.xlu2 %v3682_v29 }
 0x68e   :  { %3701 = vmax.xlane.f32.xlu0 %v3700_v20 }
 0x692   :  { %3698 = vmax.xlane.f32.xlu1 %v3697_v11 }
 0x6ed   :  { %v3681_v32 = vpop.xlane.xlu0 %3680 }
 0x6ee   :  { %v3703_v37 = vsub.f32 %v3584_v38, %v3681_v32 }
 0x6f0   :  { %v3711_v7 = vmul.f32 1.442695, %v3703_v37 }
 0x6f1   :  { %v3693_v48 = vpop.xlane.xlu1 %3692 }
 0x6f2   :  { %5014 = vpow2.f32 %v3711_v7  ;;  %v3707_v30 = vsub.f32 %v3644_v16, %v3693_v48 }
 0x6f4   :  { %v3719_v41 = vmul.f32 1.442695, %v3707_v30 }
 0x6f5   :  { %v3687_v58 = vpop.xlane.xlu2 %3686 }
 0x6f6   :  { %5016 = vpow2.f32 %v3719_v41  ;;  %v3705_v46 = vsub.f32 %v3614_v52, %v3687_v58 }
 0x6f8   :  { %v5015_v39 = vpop.eup %5014  ;;  %v3715_v54 = vmul.f32 1.442695, %v3705_v46 }
 0x6f9   :  { %v3696_v26 = vpop.xlane.xlu0 %3695  ;;  %v3727_v62 = vmul.f32 %v6996_v50, %v5015_v39 }
 0x6fa   :  { %v3708_v49 = vsub.f32 %v3646_v15, %v3696_v26  ;;  %5018 = vpow2.f32 %v3715_v54 }
 0x6fb   :  { %v3735_v34 = vsel %vm1836_vm3, %v3727_v62, 0.0  ;;  %v3783_v38 = vpack.c.bf16 %v3727_v62, %v3727_v62 }
 0x6fc   :  { %v5017_v47 = vpop.eup %5016  ;;  %v3721_v23 = vmul.f32 1.442695, %v3708_v49  ;;  %3736 = vadd.xlane.f32.xlu0 %v3735_v34 }
 0x6fd   :  { %v3690_v3 = vpop.xlane.xlu1 %3689  ;;  %v3684_v40 = vpop.xlane.xlu2 %3683  ;;  %v3731_v35 = vmul.f32 %v6996_v50, %v5017_v47 }
 0x6fe   :  { %5020 = vpow2.f32 %v3721_v23  ;;  %v3706_v45 = vsub.f32 %v3616_v43, %v3690_v3  ;;  %v3704_v57 = vsub.f32 %v3586_v21, %v3684_v40  ;;  %v3793_v43 = vunpack.c.l.b16 %v3783_v38 }
 0x6ff   :  { %v3747_v36 = vsel %vm1836_vm3, %v3731_v35, 0.0  ;;  %v3787_v60 = vpack.c.bf16 %v3731_v35, %v3731_v35 }
 0x700   :  { %v3717_v33 = vmul.f32 1.442695, %v3706_v45  ;;  %v3713_v8 = vmul.f32 1.442695, %v3704_v57  ;;  %3748 = vadd.xlane.f32.xlu2 %v3747_v36  ;;  %v5019_v19 = vpop.eup %5018 }
 0x701   :  { %v3702_v44 = vpop.xlane.xlu0 %3701  ;;  %v3729_v59 = vmul.f32 %v6996_v50, %v5019_v19  ;;  %v3849_v31 = vunpack.c.l.b16 %v3787_v60 }
 0x702   :  { %5022 = vpow2.f32 %v3717_v33  ;;  %v3710_v17 = vsub.f32 %v3676_v14, %v3702_v44 }
 0x703   :  { %5024 = vpow2.f32 %v3713_v8  ;;  %v3785_v63 = vpack.c.bf16 %v3729_v59, %v3729_v59  ;;  %v3741_v30 = vsel %vm1836_vm3, %v3729_v59, 0.0 }
 0x704   :  { %v5021_v12 = vpop.eup %5020  ;;  %v3725_v42 = vmul.f32 1.442695, %v3710_v17 }
 0x705   :  { %v3732_v53 = vmul.f32 %v7006_v6, %v5021_v12  ;;  %v3699_v5 = vpop.xlane.xlu1 %3698 }
 0x706   :  { %5026 = vpow2.f32 %v3725_v42  ;;  %v3709_v22 = vsub.f32 %v6984_v18, %v3699_v5  ;;  %v3821_v18 = vunpack.c.l.b16 %v3785_v63 }
 0x707   :  { %v3788_v27 = vpack.c.bf16 %v3732_v53, %v3732_v53  ;;  %v3750_v39 = vsel %vm1836_vm3, %v3732_v53, 0.0 }
 0x708   :  { %v5023_v51 = vpop.eup %5022  ;;  %v3723_v56 = vmul.f32 1.442695, %v3709_v22 }
 0x709   :  { %v5025_v55 = vpop.eup %5024  ;;  %v3730_v28 = vmul.f32 %v7006_v6, %v5023_v51  ;;  %v3850_v61 = vunpack.c.l.b16 %v3788_v27 }
 0x70a   :  { %5028 = vpow2.f32 %v3723_v56  ;;  %v3728_v13 = vmul.f32 %v7006_v6, %v5025_v55 }
 0x70b   :  { %v3786_v16 = vpack.c.bf16 %v3730_v28, %v3730_v28  ;;  %v3851_v9 = vpack.c.b16 %v3850_v61, %v3849_v31  ;;  %v3744_v54 = vsel %vm1836_vm3, %v3730_v28, 0.0 }
 0x70c   :  { %v5027_v52 = vpop.eup %5026  ;;  %v3738_v4 = vsel %vm1836_vm3, %v3728_v13, 0.0  ;;  %v3784_v15 = vpack.c.bf16 %v3728_v13, %v3728_v13 }
 0x70d   :  { %v3822_v1 = vunpack.c.l.b16 %v3786_v16  ;;  %3739 = vadd.xlane.f32.xlu2 %v3738_v4  ;;  %4742 = vmatmul.msk.bf16.vlgmr.msrb.gmra.mxu3 %vm1836_vm3, %v3851_v9  ;;  %v3734_v21 = vmul.f32 %v7006_v6, %v5027_v52 }
 0x70e   :  { %v3794_v25 = vunpack.c.l.b16 %v3784_v15 }
 0x70f   :  { %v3756_v29 = vsel %vm1836_vm3, %v3734_v21, 0.0  ;;  %v3823_v14 = vpack.c.b16 %v3822_v1, %v3821_v18  ;;  %v3790_v32 = vpack.c.bf16 %v3734_v21, %v3734_v21 }
 0x710   :  { %v5029_v20 = vpop.eup %5028  ;;  %v3795_v11 = vpack.c.b16 %v3794_v25, %v3793_v43  ;;  %3757 = vadd.xlane.f32.xlu0 %v3756_v29 }
 0x711   :  { %4741 = vmatmul.msk.bf16.vlgmr.msrb.gmra.mxu2 %vm1836_vm3, %v3823_v14  ;;  %v3733_v37 = vmul.f32 %v6996_v50, %v5029_v20  ;;  %v3878_v41 = vunpack.c.l.b16 %v3790_v32 }
 0x712   :  { %4740 = vmatmul.msk.bf16.vlgmr.msrb.gmra.mxu1 %vm1836_vm3, %v3795_v11 }
 0x713   :  { %v3753_v7 = vsel %vm1836_vm3, %v3733_v37, 0.0  ;;  %v3789_v48 = vpack.c.bf16 %v3733_v37, %v3733_v37 }
 0x714   :  { %3754 = vadd.xlane.f32.xlu1 %v3753_v7 }
 0x715   :  { %v3877_v58 = vunpack.c.l.b16 %v3789_v48  ;;  %3742 = vadd.xlane.f32.xlu2 %v3741_v30 }
 0x717   :  { %v3879_v46 = vpack.c.b16 %v3878_v41, %v3877_v58 }
 0x719   :  { %4743 = vmatmul.msk.bf16.vlgmr.msra.gmra.mxu0 %vm1836_vm3, %v3879_v46 }
 0x71c   :  { %3751 = vadd.xlane.f32.xlu1 %v3750_v39 }
 0x724   :  { %3745 = vadd.xlane.f32.xlu1 %v3744_v54 }
 0x76f   :  { %v3737_v62 = vpop.xlane.xlu0 %3736 }
 0x770   :  { %vm3759_vm10 = vcmp.gt.f32.partialorder %v3737_v62, 0.0 }
 0x771   :  { %v3767_v34 = vsel %vm3759_vm10, %v3737_v62, 1.0 }
 0x772   :  { %5030 = vrcp.f32 %v3767_v34 }
 0x773   :  { %v3749_v26 = vpop.xlane.xlu2 %3748 }
 0x774   :  { %vm3763_vm11 = vcmp.gt.f32.partialorder %v3749_v26, 0.0 }
 0x775   :  { %v3771_v47 = vsel %vm3763_vm11, %v3749_v26, 1.0 }
 0x776   :  { %5032 = vrcp.f32 %v3771_v47 }
 0x778   :  { %v5031_v36 = vpop.eup %5030 }
 0x77c   :  { %v5033_v44 = vpop.eup %5032 }
 0x780   :  { %v3740_v49 = vpop.xlane.xlu2 %3739 }
 0x781   :  { %vm3760_vm14 = vcmp.gt.f32.partialorder %v3740_v49, 0.0 }
 0x782   :  { %v3768_v45 = vsel %vm3760_vm14, %v3740_v49, 1.0  ;;  %vm4647_vm14 = vcmask 1041409  }
 0x783   :  { %v3758_v57 = vpop.xlane.xlu0 %3757 }
 0x784   :  { %vm3766_vm4 = vcmp.gt.f32.partialorder %v3758_v57, 0.0 }
 0x785   :  { %v3774_v27 = vsel %vm3766_vm4, %v3758_v57, 1.0  ;;  %vm4653_vm4 = vcmask 1043459  }
 0x787   :  { %v3755_v23 = vpop.xlane.xlu1 %3754 }
 0x788   :  { %v3743_v3 = vpop.xlane.xlu2 %3742  ;;  %vm3765_vm13 = vcmp.gt.f32.partialorder %v3755_v23, 0.0 }
 0x789   :  { %vm3761_vm12 = vcmp.gt.f32.partialorder %v3743_v3, 0.0  ;;  %v3773_v35 = vsel %vm3765_vm13, %v3755_v23, 1.0 }
 0x78a   :  { %v3769_v40 = vsel %vm3761_vm12, %v3743_v3, 1.0 }
 0x78b   :  { %5034 = vrcp.f32 %v3769_v40 }
 0x78c   :  { %5036 = vrcp.f32 %v3773_v35 }
 0x78d   :  { %5038 = vrcp.f32 %v3768_v45 }
 0x78f   :  { %v3814_v33 = vpop.f32.mrf.mxu1  ;;  %v3752_v8 = vpop.xlane.xlu1 %3751 }
 0x790   :  { %v3903_v19 = vmul.f32 %v5031_v36, %v3814_v33  ;;  %vm3764_vm15 = vcmp.gt.f32.partialorder %v3752_v8, 0.0  ;;  %v3870_v17 = vpop.f32.mrf.mxu3 }
 0x791   :  { %v3772_v12 = vsel %vm3764_vm15, %v3752_v8, 1.0  ;;  %v3907_v42 = vmul.f32 %v5033_v44, %v3870_v17  ;;  %v5035_v60 = vpop.eup %5034  ;;  %vm4650_vm15 = vcmask 1042434  }
 0x792   :  { %v3913_v59 = vrot.slane %v3903_v19, 4  ;;  %5040 = vrcp.f32 %v3772_v12  ;;  %v5037_v55 = vpop.eup %5036 }
 0x793   :  { %v3911_v53 = vrot.slane %v3907_v42, 4  ;;  %v5039_v31 = vpop.eup %5038  ;;  %5042 = vrcp.f32 %v3774_v27 }
 0x794   :  { %v3914_v5 = vsel %vm158_vm2, %v3907_v42, %v3913_v59  ;;  %v3842_v22 = vpop.f32.mrf.mxu2 }
 0x795   :  { %v3912_v51 = vsel %vm158_vm2, %v3911_v53, %v3903_v19  ;;  %v3905_v56 = vmul.f32 %v5035_v60, %v3842_v22  ;;  %v3922_v63 = vperm.slane %v3914_v5, %v5257_v24 }
 0x796   :  { %v3898_v28 = vpop.f32.mrf.mxu0  ;;  %v3918_v61 = vperm.slane %v3912_v51, %v5257_v24 }
 0x797   :  { %v3925_v38 = vrot.slane %v3905_v56, 4  ;;  %v3816_v13 = vpop.f32.mrf.mxu1  ;;  %v3909_v16 = vmul.f32 %v5037_v55, %v3898_v28  ;;  %v3746_v9 = vpop.xlane.xlu1 %3745  ;;  %v3949_v25 = vrot.slane %v3922_v63, 4 }
 0x798   :  { %v5041_v52 = vpop.eup %5040  ;;  %v3904_v4 = vmul.f32 %v5039_v31, %v3816_v13  ;;  %vm3762_vm5 = vcmp.gt.f32.partialorder %v3746_v9, 0.0  ;;  %v3872_v15 = vpop.f32.mrf.mxu3  ;;  %v3937_v20 = vrot.slane %v3918_v61, 4 }
 0x799   :  { %v3923_v18 = vrot.slane %v3909_v16, 4  ;;  %v3926_v1 = vsel %vm158_vm2, %v3909_v16, %v3925_v38  ;;  %v3770_v21 = vsel %vm3762_vm5, %v3746_v9, 1.0  ;;  %v3908_v43 = vmul.f32 %v5041_v52, %v3872_v15  ;;  %v5043_v39 = vpop.eup %5042 }
 0x79a   :  { %v3969_v29 = vrot.slane %v3904_v4, 4  ;;  %v3934_v14 = vperm.slane %v3926_v1, %v5257_v24  ;;  %5044 = vrcp.f32 %v3770_v21  ;;  %vm4656_vm5 = vcmask 1044484  }
 0x79b   :  { %v3924_v11 = vsel %vm158_vm2, %v3923_v18, %v3905_v56  ;;  %v3967_v32 = vrot.slane %v3908_v43, 4 }
 0x79c   :  { %v3930_v37 = vperm.slane %v3924_v11, %v5257_v24  ;;  %v3947_v7 = vrot.slane %v3934_v14, 4  ;;  %v3950_v48 = vsel %vm158_vm2, %v3934_v14, %v3949_v25  ;;  %v3970_v30 = vsel %vm158_vm2, %v3908_v43, %v3969_v29  ;;  %v3844_v17 = vpop.f32.mrf.mxu2 }
 0x79d   :  { %v3958_v41 = vperm.slane %v3950_v48, %v5282_v0  ;;  %v3968_v58 = vsel %vm158_vm2, %v3967_v32, %v3904_v4  ;;  %v3978_v46 = vperm.slane %v3970_v30, %v5257_v24 }
 0x79e   :  { %v3935_v54 = vrot.slane %v3930_v37, 4  ;;  %v3938_v26 = vsel %vm158_vm2, %v3930_v37, %v3937_v20  ;;  %v3948_v62 = vsel %vm158_vm2, %v3947_v7, %v3922_v63  ;;  %v3974_v49 = vperm.slane %v3968_v58, %v5257_v24  ;;  %v3900_v34 = vpop.f32.mrf.mxu0 }
 0x79f   :  { %v3946_v47 = vperm.slane %v3938_v26, %v5282_v0  ;;  %v3954_v23 = vperm.slane %v3948_v62, %v5282_v0  ;;  %v3965_v3 = vrot.slane %v3958_v41, 4  ;;  %v4005_v57 = vrot.slane %v3978_v46, 4 }
 0x7a0   :  { %v5045_v40 = vpop.eup %5044  ;;  %v3936_v35 = vsel %vm158_vm2, %v3935_v54, %v3918_v61  ;;  %v3993_v45 = vrot.slane %v3974_v49, 4  ;;  %v3910_v36 = vmul.f32 %v5043_v39, %v3900_v34 }
 0x7a1   :  { %v3942_v33 = vperm.slane %v3936_v35, %v5282_v0  ;;  %v3961_v8 = vrot.slane %v3946_v47, 4  ;;  %v3963_v44 = vrot.slane %v3954_v23, 4  ;;  %v3966_v19 = vsel %vm158_vm2, 0.0, %v3965_v3 }
 0x7a2   :  { %v4034_v12 = vsel %vm158_vm2, %v3965_v3, %v3954_v23  ;;  %v4039_v42 = vrot.slane %v3966_v19, 4  ;;  %v3906_v59 = vmul.f32 %v5045_v40, %v3844_v17  ;;  %v3979_v53 = vrot.slane %v3910_v36, 4 }
 0x7a3   :  { %v3962_v60 = vsel %vm158_vm2, 0.0, %v3961_v8  ;;  %v3959_v5 = vrot.slane %v3942_v33, 4  ;;  %v3964_v22 = vsel %vm158_vm2, 0.0, %v3963_v44  ;;  %v4023_v27 = vsel %vm158_vm2, %v3961_v8, %v3942_v33 }
 0x7a4   :  { %v4028_v51 = vrot.slane %v3962_v60, 4  ;;  %v3981_v56 = vrot.slane %v3906_v59, 4  ;;  %v3980_v55 = vsel %vm158_vm2, %v3979_v53, %v3906_v59  ;;  %v4027_v63 = vperm.slane %v4023_v27, %v5257_v24 }
 0x7a5   :  { %v3986_v28 = vperm.slane %v3980_v55, %v5257_v24  ;;  %v3960_v31 = vsel %vm158_vm2, 0.0, %v3959_v5  ;;  %v4038_v61 = vperm.slane %v4034_v12, %v5257_v24  ;;  %v4040_v38 = vsel %vm158_vm2, %v4039_v42, %v3964_v22 }
 0x7a6   :  { %v3982_v13 = vsel %vm158_vm2, %v3910_v36, %v3981_v56  ;;  %v4029_v16 = vsel %vm158_vm2, %v4028_v51, %v3960_v31  ;;  %v4044_v9 = vperm.slane %v4040_v38, %v5257_v24  ;;  %v4047_v52 = vrot.slane %v4027_v63, 4 }
 0x7a7   :  { %v3990_v4 = vperm.slane %v3982_v13, %v5257_v24  ;;  %v3991_v15 = vrot.slane %v3986_v28, 4  ;;  %v3994_v18 = vsel %vm158_vm2, %v3986_v28, %v3993_v45  ;;  %v4033_v1 = vperm.slane %v4029_v16, %v5257_v24 }
 0x7a8   :  { %v4002_v21 = vperm.slane %v3994_v18, %v5282_v0  ;;  %v4059_v43 = vrot.slane %v4038_v61, 4  ;;  %v4057_v25 = vrot.slane %v4044_v9, 4 }
 0x7a9   :  { %v3992_v29 = vsel %vm158_vm2, %v3991_v15, %v3974_v49  ;;  %v4003_v14 = vrot.slane %v3990_v4, 4  ;;  %v4006_v20 = vsel %vm158_vm2, %v3990_v4, %v4005_v57  ;;  %v4048_v11 = vsel %vm158_vm2, %v4033_v1, %v4047_v52 }
 0x7aa   :  { %v3998_v32 = vperm.slane %v3992_v29, %v5282_v0  ;;  %v4014_v37 = vperm.slane %v4006_v20, %v5282_v0  ;;  %v4017_v7 = vrot.slane %v4002_v21, 4  ;;  %v4056_v48 = vperm.slane %v4048_v11, %v5282_v0 }
 0x7ab   :  { %v4004_v30 = vsel %vm158_vm2, %v4003_v14, %v3978_v46  ;;  %v4060_v41 = vsel %vm158_vm2, %v4044_v9, %v4059_v43  ;;  %v4045_v58 = vrot.slane %v4033_v1, 4  ;;  %v4058_v39 = vsel %vm158_vm2, %v4057_v25, %v4038_v61 }
 0x7ac   :  { %v4010_v54 = vperm.slane %v4004_v30, %v5282_v0  ;;  %v4015_v26 = vrot.slane %v3998_v32, 4  ;;  %v4018_v62 = vsel %vm158_vm2, 0.0, %v4017_v7  ;;  %v4021_v49 = vrot.slane %v4014_v37, 4 }
 0x7ad   :  { %v4082_v34 = vrot.slane %v4018_v62, 4  ;;  %v4068_v47 = vperm.slane %v4060_v41, %v5282_v0  ;;  %v4075_v23 = vrot.slane %v4056_v48, 4  ;;  %v4046_v3 = vsel %vm158_vm2, %v4045_v58, %v4027_v63 }
 0x7ae   :  { %v4019_v40 = vrot.slane %v4010_v54, 4  ;;  %v4022_v46 = vsel %vm158_vm2, 0.0, %v4021_v49  ;;  %v4052_v35 = vperm.slane %v4046_v3, %v5282_v0  ;;  %v4064_v45 = vperm.slane %v4058_v39, %v5282_v0 }
 0x7af   :  { %v4093_v57 = vrot.slane %v4022_v46, 4  ;;  %v4073_v36 = vrot.slane %v4068_v47, 4  ;;  %v4076_v33 = vsel %vm158_vm2, %v4068_v47, %v4075_v23  ;;  %v4016_v8 = vsel %vm158_vm2, 0.0, %v4015_v26 }
 0x7b0   :  { %4149 = vrot.lane.b32.xlu2 %v4076_v33, %s5151_s14  ;;  %v4069_v44 = vrot.slane %v4064_v45, 4  ;;  %v4071_v19 = vrot.slane %v4052_v35, 4  ;;  %v4020_v17 = vsel %vm158_vm2, 0.0, %v4019_v40  ;;  %v4077_v12 = vsel %vm158_vm2, %v4017_v7, %v3998_v32  ;;  %v4758_v32 = vld [vmem:[#allocation5] sm:$0xff] }
 0x7b1   :  { %v4074_v42 = vsel %vm158_vm2, %v4073_v36, %v4056_v48  ;;  %v4081_v59 = vperm.slane %v4077_v12, %v5257_v24  ;;  %v4083_v53 = vsel %vm158_vm2, %v4082_v34, %v4016_v8  ;;  %v4088_v60 = vsel %vm158_vm2, %v4021_v49, %v4010_v54 }
 0x7b2   :  { %4141 = vrot.lane.b32.xlu1 %v4074_v42, %s5147_s27  ;;  %v4072_v5 = vsel %vm158_vm2, %v4064_v45, %v4071_v19  ;;  %v4087_v22 = vperm.slane %v4083_v53, %v5257_v24  ;;  %v4092_v27 = vperm.slane %v4088_v60, %v5257_v24  ;;  %v4094_v51 = vsel %vm158_vm2, %v4093_v57, %v4020_v17  ;;  %v4957_v45 = vld [vmem:[%s7382_s7] ss:$0 sm:$0xff] }
 0x7b3   :  { %4133 = vrot.lane.b32.xlu0 %v4072_v5, %s5148_s10  ;;  %v4098_v56 = vperm.slane %v4094_v51, %v5257_v24  ;;  %v4101_v55 = vrot.slane %v4081_v59, 4  ;;  %v4070_v63 = vsel %vm158_vm2, %v4069_v44, %v4052_v35 }
 0x7b4   :  { %v4099_v28 = vrot.slane %v4087_v22, 4  ;;  %v4113_v31 = vrot.slane %v4092_v27, 4 }
 0x7b5   :  { %v4111_v61 = vrot.slane %v4098_v56, 4  ;;  %v4102_v13 = vsel %vm158_vm2, %v4087_v22, %v4101_v55 }
 0x7b6   :  { %v4100_v38 = vsel %vm158_vm2, %v4099_v28, %v4081_v59  ;;  %v4114_v16 = vsel %vm158_vm2, %v4098_v56, %v4113_v31  ;;  %v4110_v1 = vperm.slane %v4102_v13, %v5282_v0 }
 0x7b7   :  { %v4106_v9 = vperm.slane %v4100_v38, %v5282_v0  ;;  %v4112_v52 = vsel %vm158_vm2, %v4111_v61, %v4092_v27  ;;  %v4122_v4 = vperm.slane %v4114_v16, %v5282_v0 }
 0x7b8   :  { %v4118_v15 = vperm.slane %v4112_v52, %v5282_v0  ;;  %v4129_v20 = vrot.slane %v4110_v1, 4 }
 0x7b9   :  { %v4125_v18 = vrot.slane %v4106_v9, 4  ;;  %v4127_v21 = vrot.slane %v4122_v4, 4 }
 0x7ba   :  { %4161 = vrot.lane.b32.xlu1 %v6546_v2, %s5150_s12  ;;  %v4123_v43 = vrot.slane %v4118_v15, 4  ;;  %v4130_v11 = vsel %vm158_vm2, %v4122_v4, %v4129_v20  ;;  %v4759_v2 = vld [vmem:[#allocation5 + $0x8] sm:$0xff] }
 0x7bb   :  { %v4126_v25 = vsel %vm158_vm2, %v4118_v15, %v4125_v18  ;;  %v4128_v29 = vsel %vm158_vm2, %v4127_v21, %v4110_v1  ;;  %4201 = vmatpush.bf16.msra.mxu1 %v4759_v2 }
 0x7bc   :  { %4135 = vrot.lane.b32.xlu2 %v4126_v25, %s5148_s10  ;;  %4143 = vrot.lane.b32.xlu0 %v4128_v29, %s5147_s27  ;;  %v4124_v14 = vsel %vm158_vm2, %v4123_v43, %v4106_v9 }
 0x7bf   :  { %4202 = vmatpush.bf16.msra.mxu1 %v4758_v32 }
 0x7c4   :  { %4163 = vrot.lane.b32.xlu2 %v6548_v10, %s5150_s12  ;;  %4151 = vrot.lane.b32.xlu0 %v4130_v11, %s5151_s14 }
 0x80a   :  { %v4150_v37 = vpop.permute.xlu2 %4149 }
 0x816   :  { %v4136_v30 = vpop.permute.xlu2 %4135 }
 0x817   :  { %v4156_v10 = vsel %vm80_vm1, %v4124_v14, %v4136_v30 }
 0x81e   :  { %v4164_v47 = vpop.permute.xlu2 %4163 }
 0x824   :  { %v4142_v48 = vpop.permute.xlu1 %4141 }
 0x825   :  { %v4134_v7 = vpop.permute.xlu0 %4133 }
 0x826   :  { %v4155_v41 = vsel %vm80_vm1, %v4070_v63, %v4134_v7 }
 0x827   :  { %v4157_v39 = vsel %vm1836_vm3, %v4155_v41, %v4142_v48 }
 0x828   :  { %v4159_v26 = vsel %vm2735_vm6, %v4157_v39, %v4150_v37 }
 0x82c   :  { %v4162_v54 = vpop.permute.xlu1 %4161 }
 0x82d   :  { %v4167_v62 = vadd.f32 %v4162_v54, %v4159_v26 }
 0x82e   :  { %v4144_v58 = vpop.permute.xlu0 %4143 }
 0x82f   :  { %v4158_v49 = vsel %vm1836_vm3, %v4156_v10, %v4144_v58  ;;  %v4169_v40 = vmax.f32 %v4167_v62, 0.0 }
 0x836   :  { %v4152_v34 = vpop.permute.xlu0 %4151 }
 0x837   :  { %v4160_v23 = vsel %vm2735_vm6, %v4158_v49, %v4152_v34 }
 0x838   :  { %v4168_v3 = vadd.f32 %v4164_v47, %v4160_v23 }
 0x83a   :  { %v4170_v46 = vmax.f32 %v4168_v3, 0.0 }
 0x83c   :  { %v4176_v35 = vpack.c.bf16 %v4170_v46, %v4169_v40 }
 0x83e   :  { %4752 = vmatmul.msk.bf16.vlgmr.msra.gmra.mxu1 %vm2738_vm7, %v4176_v35 }
 0x8bb   :  { %v4204_v57 = vpop.f32.mrf.mxu1 }
 0x8bc   :  { %v7124_v36 = vadd.f32 %v4957_v45, %v4204_v57 }
 0x8be   :  { %4225 = vst [vmem:[#allocation1] ss:$9 sm:$0xff] %v7124_v36  ;;  %4254 = vrot.lane.b32.xlu0 %v7124_v36, %s5142_s24  ;;  %v7130_v33 = vrot.slane %v7124_v36, 2  ;;  %v7133_v8 = vrot.slane %v7124_v36, 1  ;;  %v7136_v44 = vrot.slane %v7124_v36, 3  ;;  %v7139_v19 = vrot.slane %v7124_v36, 5 }
 0x8bf   :  { %v7147_v17 = vrot.slane %v7124_v36, 4  ;;  %v7151_v12 = vrot.slane %v7124_v36, 6  ;;  %v7155_v42 = vrot.slane %v7124_v36, 7 }
 0x8c0   :  { %4258 = vrot.lane.b32.xlu2 %v7130_v33, %s5142_s24  ;;  %4229 = vst [vmem:[#allocation1 + $0x2] ss:$9 sm:$0xff] %v7130_v33  ;;  %4256 = vrot.lane.b32.xlu1 %v7133_v8, %s5142_s24 }
 0x8c1   :  { %4227 = vst [vmem:[#allocation1 + $0x1] ss:$9 sm:$0xff] %v7133_v8 }
 0x8c2   :  { %4231 = vst [vmem:[#allocation1 + $0x3] ss:$9 sm:$0xff] %v7136_v44 }
 0x8c3   :  { %4235 = vst [vmem:[#allocation1 + $0x5] ss:$9 sm:$0xff] %v7139_v19  ;;  %v4206_v59 = vpop.f32.mrf.mxu1 }
 0x8c4   :  { %4233 = vst [vmem:[#allocation1 + $0x4] ss:$9 sm:$0xff] %v7147_v17  ;;  %v7163_v53 = vadd.f32 %v4957_v45, %v4206_v59 }
 0x8c5   :  { %4237 = vst [vmem:[#allocation1 + $0x6] ss:$9 sm:$0xff] %v7151_v12 }
 0x8c6   :  { %4260 = vrot.lane.b32.xlu0 %v7136_v44, %s5142_s24  ;;  %4239 = vst [vmem:[#allocation1 + $0x7] ss:$9 sm:$0xff] %v7155_v42  ;;  %v7170_v60 = vrot.slane %v7163_v53, 1  ;;  %v7173_v5 = vrot.slane %v7163_v53, 2  ;;  %v7176_v22 = vrot.slane %v7163_v53, 3  ;;  %v4221_v51 = vrot.slane %v7163_v53, 4 }
 0x8c7   :  { %v7185_v56 = vrot.slane %v7163_v53, 5  ;;  %v7193_v55 = vrot.slane %v7163_v53, 6  ;;  %v7197_v63 = vrot.slane %v7163_v53, 7 }
 0x8c8   :  { %4264 = vrot.lane.b32.xlu2 %v7139_v19, %s5142_s24  ;;  %4262 = vrot.lane.b32.xlu1 %v7147_v17, %s5142_s24 }
 0x8cd   :  { %v7178_v27 = vld [vmem:[#allocation1] sm:$0xff] }
 0x8ce   :  { %4266 = vrot.lane.b32.xlu0 %v7151_v12, %s5142_s24  ;;  %4241 = vst [vmem:[#allocation1] ss:$9 sm:$0xff] %v7163_v53  ;;  %v4252_v47 = vpack.c.bf16 %v7178_v27, %v7178_v27 }
 0x8cf   :  { %4242 = vst [vmem:[#allocation1 + $0x1] ss:$9 sm:$0xff] %v7170_v60 }
 0x8d0   :  { %4270 = vrot.lane.b32.xlu2 %v7163_v53, %s5142_s24  ;;  %4268 = vrot.lane.b32.xlu1 %v7155_v42, %s5142_s24  ;;  %4243 = vst [vmem:[#allocation1 + $0x2] ss:$9 sm:$0xff] %v7173_v5  ;;  %v4378_v35 = vunpack.c.l.b16 %v4252_v47 }
 0x8d1   :  { %4244 = vst [vmem:[#allocation1 + $0x3] ss:$9 sm:$0xff] %v7176_v22 }
 0x8d2   :  { %4245 = vst [vmem:[#allocation1 + $0x4] ss:$9 sm:$0xff] %v4221_v51 }
 0x8d3   :  { %4246 = vst [vmem:[#allocation1 + $0x5] ss:$9 sm:$0xff] %v7185_v56 }
 0x8d4   :  { %4247 = vst [vmem:[#allocation1 + $0x6] ss:$9 sm:$0xff] %v7193_v55 }
 0x8d5   :  { %4248 = vst [vmem:[#allocation1 + $0x7] ss:$9 sm:$0xff] %v7197_v63 }
 0x8d6   :  { %4272 = vrot.lane.b32.xlu0 %v7170_v60, %s5142_s24 }
 0x8d8   :  { %4276 = vrot.lane.b32.xlu2 %v7176_v22, %s5142_s24  ;;  %4274 = vrot.lane.b32.xlu1 %v7173_v5, %s5142_s24 }
 0x8dc   :  { %v7240_v31 = vld [vmem:[#allocation1] sm:$0xff] }
 0x8dd   :  { %v4253_v49 = vpack.c.bf16 %v7240_v31, %v7240_v31 }
 0x8de   :  { %4278 = vrot.lane.b32.xlu0 %v4221_v51, %s5142_s24 }
 0x8df   :  { %v4379_v3 = vunpack.c.l.b16 %v4253_v49 }
 0x8e0   :  { %4282 = vrot.lane.b32.xlu2 %v7193_v55, %s5142_s24  ;;  %4280 = vrot.lane.b32.xlu1 %v7185_v56, %s5142_s24 }
 0x8e1   :  { %v4380_v45 = vpack.c.b16 %v4379_v3, %v4378_v35 }
 0x8e6   :  { %4284 = vrot.lane.b32.xlu0 %v7197_v63, %s5142_s24 }
 0x8e8   :  { %4317 = vrot.lane.b32.xlu2 %v7133_v8, %s5140_s3  ;;  %4315 = vrot.lane.b32.xlu1 %v7124_v36, %s5140_s3 }
 0x8ee   :  { %4319 = vrot.lane.b32.xlu0 %v7130_v33, %s5140_s3 }
 0x8f0   :  { %4323 = vrot.lane.b32.xlu2 %v7147_v17, %s5140_s3  ;;  %4321 = vrot.lane.b32.xlu1 %v7136_v44, %s5140_s3 }
 0x8f6   :  { %4325 = vrot.lane.b32.xlu0 %v7139_v19, %s5140_s3 }
 0x8f8   :  { %4329 = vrot.lane.b32.xlu2 %v7155_v42, %s5140_s3  ;;  %4327 = vrot.lane.b32.xlu1 %v7151_v12, %s5140_s3 }
 0x900   :  { %4331 = vrot.lane.b32.xlu2 %v7163_v53, %s5140_s3 }
 0x908   :  { %4333 = vrot.lane.b32.xlu2 %v7170_v60, %s5140_s3 }
 0x910   :  { %4335 = vrot.lane.b32.xlu2 %v7173_v5, %s5140_s3 }
 0x918   :  { %4337 = vrot.lane.b32.xlu2 %v7176_v22, %s5140_s3 }
 0x91a   :  { %v4259_v28 = vpop.permute.xlu2 %4258 }
 0x91b   :  { %4290 = vst [vmem:[#allocation1 + $0x2] ss:$9 sm:$0xff] %v4259_v28 }
 0x920   :  { %4339 = vrot.lane.b32.xlu2 %v4221_v51, %s5140_s3 }
 0x922   :  { %v4265_v61 = vpop.permute.xlu2 %4264 }
 0x923   :  { %4296 = vst [vmem:[#allocation1 + $0x5] ss:$9 sm:$0xff] %v4265_v61 }
 0x928   :  { %4345 = vrot.lane.b32.xlu2 %v7197_v63, %s5140_s3 }
 0x92a   :  { %v4271_v38 = vpop.permute.xlu2 %4270 }
 0x930   :  { %v4255_v13 = vpop.permute.xlu0 %4254  ;;  %4566 = vrot.lane.b32.xlu2 %v7124_v36, %s5143_s25 }
 0x931   :  { %4286 = vst [vmem:[#allocation1] ss:$9 sm:$0xff] %v4255_v13 }
 0x932   :  { %v4277_v16 = vpop.permute.xlu2 %4276  ;;  %v4257_v9 = vpop.permute.xlu1 %4256 }
 0x933   :  { %4288 = vst [vmem:[#allocation1 + $0x1] ss:$9 sm:$0xff] %v4257_v9 }
 0x938   :  { %v4261_v52 = vpop.permute.xlu0 %4260  ;;  %4590 = vrot.lane.b32.xlu2 %v4221_v51, %s5143_s25 }
 0x939   :  { %4292 = vst [vmem:[#allocation1 + $0x3] ss:$9 sm:$0xff] %v4261_v52 }
 0x93a   :  { %v4283_v4 = vpop.permute.xlu2 %4282  ;;  %v4263_v15 = vpop.permute.xlu1 %4262 }
 0x93b   :  { %4294 = vst [vmem:[#allocation1 + $0x4] ss:$9 sm:$0xff] %v4263_v15 }
 0x940   :  { %v4267_v18 = vpop.permute.xlu0 %4266  ;;  %4578 = vrot.lane.b32.xlu2 %v7151_v12, %s5143_s25 }
 0x941   :  { %4298 = vst [vmem:[#allocation1 + $0x6] ss:$9 sm:$0xff] %v4267_v18 }
 0x942   :  { %v4318_v1 = vpop.permute.xlu2 %4317  ;;  %v4269_v21 = vpop.permute.xlu1 %4268 }
 0x943   :  { %4300 = vst [vmem:[#allocation1 + $0x7] ss:$9 sm:$0xff] %v4269_v21 }
 0x948   :  { %v4273_v43 = vpop.permute.xlu0 %4272 }
 0x94a   :  { %v4301_v25 = vld [vmem:[#allocation1] sm:$0xff]  ;;  %v4324_v29 = vpop.permute.xlu2 %4323  ;;  %v4275_v14 = vpop.permute.xlu1 %4274 }
 0x94b   :  { %4302 = vst [vmem:[#allocation1] ss:$9 sm:$0xff] %v4271_v38  ;;  %v4313_v48 = vpack.c.bf16 %v4301_v25, %v4301_v25 }
 0x94c   :  { %4305 = vst [vmem:[#allocation1 + $0x3] ss:$9 sm:$0xff] %v4277_v16 }
 0x94d   :  { %4308 = vst [vmem:[#allocation1 + $0x6] ss:$9 sm:$0xff] %v4283_v4  ;;  %v4383_v26 = vunpack.c.l.b16 %v4313_v48 }
 0x94e   :  { %4303 = vst [vmem:[#allocation1 + $0x1] ss:$9 sm:$0xff] %v4273_v43 }
 0x94f   :  { %4304 = vst [vmem:[#allocation1 + $0x2] ss:$9 sm:$0xff] %v4275_v14 }
 0x950   :  { %v4279_v20 = vpop.permute.xlu0 %4278 }
 0x951   :  { %4306 = vst [vmem:[#allocation1 + $0x4] ss:$9 sm:$0xff] %v4279_v20 }
 0x952   :  { %v4330_v11 = vpop.permute.xlu2 %4329  ;;  %v4281_v2 = vpop.permute.xlu1 %4280 }
 0x953   :  { %4307 = vst [vmem:[#allocation1 + $0x5] ss:$9 sm:$0xff] %v4281_v2 }
 0x958   :  { %v4285_v32 = vpop.permute.xlu0 %4284 }
 0x959   :  { %4309 = vst [vmem:[#allocation1 + $0x7] ss:$9 sm:$0xff] %v4285_v32 }
 0x95a   :  { %v4332_v37 = vpop.permute.xlu2 %4331  ;;  %v4316_v7 = vpop.permute.xlu1 %4315 }
 0x960   :  { %v4310_v30 = vld [vmem:[#allocation1] sm:$0xff]  ;;  %v4320_v41 = vpop.permute.xlu0 %4319 }
 0x961   :  { %4361 = vst [vmem:[#allocation1 + $0x7] ss:$9 sm:$0xff] %v4330_v11  ;;  %v4314_v58 = vpack.c.bf16 %v4310_v30, %v4310_v30 }
 0x962   :  { %4349 = vst [vmem:[#allocation1 + $0x1] ss:$9 sm:$0xff] %v4318_v1  ;;  %v4334_v39 = vpop.permute.xlu2 %4333  ;;  %v4322_v54 = vpop.permute.xlu1 %4321 }
 0x963   :  { %4355 = vst [vmem:[#allocation1 + $0x4] ss:$9 sm:$0xff] %v4324_v29  ;;  %v4384_v10 = vunpack.c.l.b16 %v4314_v58 }
 0x964   :  { %4347 = vst [vmem:[#allocation1] ss:$9 sm:$0xff] %v4316_v7 }
 0x965   :  { %4351 = vst [vmem:[#allocation1 + $0x2] ss:$9 sm:$0xff] %v4320_v41  ;;  %v4385_v62 = vpack.c.b16 %v4384_v10, %v4383_v26 }
 0x966   :  { %4353 = vst [vmem:[#allocation1 + $0x3] ss:$9 sm:$0xff] %v4322_v54 }
 0x967   :  { %v4390_v34 = vsel %vm80_vm1, %v4385_v62, 0 }
 0x968   :  { %v4326_v23 = vpop.permute.xlu0 %4325  ;;  %4399 = vmatpush.bf16.xpose.msra.mxu2 %v4390_v34 }
 0x969   :  { %4357 = vst [vmem:[#allocation1 + $0x5] ss:$9 sm:$0xff] %v4326_v23 }
 0x96a   :  { %v4336_v40 = vpop.permute.xlu2 %4335  ;;  %v4328_v46 = vpop.permute.xlu1 %4327 }
 0x96b   :  { %4359 = vst [vmem:[#allocation1 + $0x6] ss:$9 sm:$0xff] %v4328_v46 }
 0x96f   :  { %4753 = vmatmul.msk.bf16.vlgmr.msra.gmra.mxu2 %vm80_vm1, %v4380_v45 }
 0x972   :  { %v4338_v57 = vpop.permute.xlu2 %4337  ;;  %v4362_v36 = vld [vmem:[#allocation1] sm:$0xff] }
 0x973   :  { %4366 = vst [vmem:[#allocation1 + $0x3] ss:$9 sm:$0xff] %v4338_v57  ;;  %v4374_v16 = vpack.c.bf16 %v4362_v36, %v4362_v36 }
 0x974   :  { %4363 = vst [vmem:[#allocation1] ss:$9 sm:$0xff] %v4332_v37 }
 0x975   :  { %4364 = vst [vmem:[#allocation1 + $0x1] ss:$9 sm:$0xff] %v4334_v39  ;;  %v4467_v15 = vunpack.c.l.b16 %v4374_v16 }
 0x976   :  { %4365 = vst [vmem:[#allocation1 + $0x2] ss:$9 sm:$0xff] %v4336_v40 }
 0x97a   :  { %v4340_v12 = vpop.permute.xlu2 %4339 }
 0x97b   :  { %4367 = vst [vmem:[#allocation1 + $0x4] ss:$9 sm:$0xff] %v4340_v12 }
 0x982   :  { %v4346_v59 = vpop.permute.xlu2 %4345 }
 0x983   :  { %4370 = vst [vmem:[#allocation1 + $0x7] ss:$9 sm:$0xff] %v4346_v59 }
 0x98a   :  { %v7293_v25 = vpop.permute.xlu2 %4566 }
 0x992   :  { %v7297_v29 = vpop.permute.xlu2 %4590 }
 0x9f2   :  { %v4401_v27 = vpop.f32.mrf.mxu2 }
 0x9f3   :  { %v4406_v51 = vsel %vm1836_vm3, %v4401_v27, -inf }
 0x9f4   :  { %4407 = vmax.xlane.f32.xlu0 %v4406_v51 }
 0x9fa   :  { %v4403_v28 = vpop.f32.mrf.mxu2 }
 0x9fb   :  { %v4409_v31 = vsel %vm1836_vm3, %v4403_v28, -inf }
 0x9fc   :  { %4410 = vmax.xlane.f32.xlu1 %v4409_v31 }
 0xa08   :  { %4341 = vrot.lane.b32.xlu0 %v7185_v56, %s5140_s3 }
 0xa10   :  { %4582 = vrot.lane.b32.xlu0 %v7163_v53, %s5143_s25 }
 0xa15   :  { %4343 = vrot.lane.b32.xlu1 %v7193_v55, %s5140_s3 }
 0xa18   :  { %4576 = vrot.lane.b32.xlu0 %v7139_v19, %s5143_s25 }
 0xa1d   :  { %4568 = vrot.lane.b32.xlu1 %v7133_v8, %s5143_s25 }
 0xa25   :  { %4584 = vrot.lane.b32.xlu1 %v7170_v60, %s5143_s25 }
 0xa2d   :  { %4570 = vrot.lane.b32.xlu1 %v7130_v33, %s5143_s25 }
 0xa35   :  { %4586 = vrot.lane.b32.xlu1 %v7173_v5, %s5143_s25 }
 0xa3d   :  { %4572 = vrot.lane.b32.xlu1 %v7136_v44, %s5143_s25 }
 0xa45   :  { %4588 = vrot.lane.b32.xlu1 %v7176_v22, %s5143_s25 }
 0xa4d   :  { %4574 = vrot.lane.b32.xlu1 %v7147_v17, %s5143_s25 }
 0xa55   :  { %4592 = vrot.lane.b32.xlu1 %v7185_v56, %s5143_s25 }
 0xa5d   :  { %4580 = vrot.lane.b32.xlu1 %v7155_v42, %s5143_s25 }
 0xa67   :  { %v4408_v8 = vpop.xlane.xlu0 %4407 }
 0xa68   :  { %v4412_v33 = vsub.f32 %v4401_v27, %v4408_v8 }
 0xa6a   :  { %v4414_v19 = vmul.f32 1.442695, %v4412_v33 }
 0xa6c   :  { %5046 = vpow2.f32 %v4414_v19 }
 0xa6f   :  { %v4411_v53 = vpop.xlane.xlu1 %4410 }
 0xa70   :  { %v4413_v60 = vsub.f32 %v4403_v28, %v4411_v53 }
 0xa72   :  { %v5047_v5 = vpop.eup %5046  ;;  %v4416_v44 = vmul.f32 1.442695, %v4413_v60 }
 0xa73   :  { %v4418_v61 = vmul.f32 %v6996_v50, %v5047_v5 }
 0xa74   :  { %5048 = vpow2.f32 %v4416_v44 }
 0xa75   :  { %v4420_v22 = vsel %vm1836_vm3, %v4418_v61, 0.0  ;;  %v4458_v4 = vpack.c.bf16 %v4418_v61, %v4418_v61 }
 0xa76   :  { %4421 = vadd.xlane.f32.xlu2 %v4420_v22 }
 0xa77   :  { %v4462_v21 = vunpack.c.l.b16 %v4458_v4 }
 0xa7a   :  { %v5049_v17 = vpop.eup %5048  ;;  %v4342_v38 = vpop.permute.xlu0 %4341 }
 0xa7b   :  { %4368 = vst [vmem:[#allocation1 + $0x5] ss:$9 sm:$0xff] %v4342_v38  ;;  %v4419_v56 = vmul.f32 %v7006_v6, %v5049_v17 }
 0xa7d   :  { %v4423_v42 = vsel %vm1836_vm3, %v4419_v56, 0.0  ;;  %v4459_v9 = vpack.c.bf16 %v4419_v56, %v4419_v56 }
 0xa7e   :  { %4424 = vadd.xlane.f32.xlu0 %v4423_v42 }
 0xa7f   :  { %v4463_v1 = vunpack.c.l.b16 %v4459_v9 }
 0xa81   :  { %v4464_v43 = vpack.c.b16 %v4463_v1, %v4462_v21 }
 0xa82   :  { %v7301_v20 = vpop.permute.xlu0 %4582 }
 0xa87   :  { %v4344_v13 = vpop.permute.xlu1 %4343 }
 0xa88   :  { %4369 = vst [vmem:[#allocation1 + $0x6] ss:$9 sm:$0xff] %v4344_v13 }
 0xa8a   :  { %v7307_v2 = vpop.permute.xlu0 %4576 }
 0xa8e   :  { %4596 = vrot.lane.b32.xlu2 %v7197_v63, %s5143_s25 }
 0xa8f   :  { %v4371_v50 = vld [vmem:[#allocation1] sm:$0xff]  ;;  %v7295_v63 = vpop.permute.xlu1 %4568 }
 0xa90   :  { %v4375_v52 = vpack.c.bf16 %v4371_v50, %v4371_v50 }
 0xa92   :  { %4594 = vrot.lane.b32.xlu0 %v7193_v55, %s5143_s25  ;;  %v4468_v18 = vunpack.c.l.b16 %v4375_v52  ;;  %v7303_v55 = vpop.permute.xlu2 %4578 }
 0xa94   :  { %v4469_v6 = vpack.c.b16 %v4468_v18, %v4467_v15 }
 0xa96   :  { %4481 = vmatpush.bf16.msra.mxu3 %v4469_v6 }
 0xa97   :  { %v7299_v14 = vpop.permute.xlu1 %4584 }
 0xa99   :  { %4754 = vmatmul.msk.bf16.vlgmr.msra.gmra.mxu3 %vm1836_vm3, %v4464_v43 }
 0xa9f   :  { %v7305_v11 = vpop.permute.xlu1 %4570 }
 0xaa7   :  { %v7309_v37 = vpop.permute.xlu1 %4586 }
 0xaaf   :  { %v7311_v30 = vpop.permute.xlu1 %4572 }
 0xab7   :  { %v7313_v26 = vpop.permute.xlu1 %4588 }
 0xabf   :  { %v4575_v3 = vpop.permute.xlu1 %4574 }
 0xac7   :  { %v7316_v19 = vpop.permute.xlu1 %4592 }
 0xae9   :  { %v4422_v32 = vpop.xlane.xlu2 %4421 }
 0xaea   :  { %vm4426_vm3 = vcmp.gt.f32.partialorder %v4422_v32, 0.0 }
 0xaeb   :  { %v4428_v7 = vsel %vm4426_vm3, %v4422_v32, 1.0  ;;  %vm4659_vm3 = vcmask 1045509  }
 0xaec   :  { %5050 = vrcp.f32 %v4428_v7  ;;  %v4441_v23 = vand.u32 2147483648, %v4428_v7  ;;  %vm4435_vm0 = vweird.f32 %v4428_v7  ;;  %v4439_v40 = vand.u32 2147483647, %v4428_v7 }
 0xaee   :  { %v4442_v45 = vor.u32 1.1754944e-38, %v4441_v23  ;;  %vm4440_vm9 = vcmp.eq.f32.partialorder %v4439_v40, 8.507059e+37 }
 0xaf1   :  { %v4425_v48 = vpop.xlane.xlu0 %4424 }
 0xaf2   :  { %vm4427_vm6 = vcmp.gt.f32.partialorder %v4425_v48, 0.0  ;;  %v5051_v58 = vpop.eup %5050 }
 0xaf3   :  { %v4429_v41 = vsel %vm4427_vm6, %v4425_v48, 1.0  ;;  %v4431_v39 = vmul.f32 %v5051_v58, %v4428_v7  ;;  %vm4436_vm7 = vweird.f32 %v5051_v58  ;;  %vm4662_vm6 = vcmask 1046534  }
 0xaf4   :  { %5052 = vrcp.f32 %v4429_v41  ;;  %vm4437_vm8 = vmor %vm4435_vm0, %vm4436_vm7  ;;  %v4455_v59 = vand.u32 2147483648, %v4429_v41  ;;  %vm4449_vm11 = vweird.f32 %v4429_v41  ;;  %v4453_v51 = vand.u32 2147483647, %v4429_v41 }
 0xaf5   :  { %v4432_v10 = vsub.f32 1.0, %v4431_v39  ;;  %vm4665_vm7 = vcmask 1047559  }
 0xaf6   :  { %v4456_v33 = vor.u32 1.1754944e-38, %v4455_v59  ;;  %vm4454_vm13 = vcmp.eq.f32.partialorder %v4453_v51, 8.507059e+37 }
 0xaf7   :  { %v4433_v49 = vmul.f32 %v5051_v58, %v4432_v10 }
 0xaf9   :  { %v4434_v47 = vadd.f32 %v5051_v58, %v4433_v49 }
 0xafa   :  { %v5053_v54 = vpop.eup %5052 }
 0xafb   :  { %v4445_v62 = vmul.f32 %v5053_v54, %v4429_v41  ;;  %v4438_v35 = vsel %vm4437_vm8, %v5051_v58, %v4434_v47  ;;  %vm4450_vm10 = vweird.f32 %v5053_v54 }
 0xafc   :  { %v4443_v36 = vsel %vm4440_vm9, %v4442_v45, %v4438_v35  ;;  %vm4451_vm12 = vmor %vm4449_vm11, %vm4450_vm10 }
 0xafd   :  { %v4446_v34 = vsub.f32 1.0, %v4445_v62  ;;  %v4581_v62 = vpop.permute.xlu1 %4580 }
 0xaff   :  { %v4447_v46 = vmul.f32 %v5053_v54, %v4446_v34 }
 0xb01   :  { %v4448_v57 = vadd.f32 %v5053_v54, %v4447_v46 }
 0xb03   :  { %v4452_v8 = vsel %vm4451_vm12, %v5053_v54, %v4448_v57 }
 0xb04   :  { %v4457_v61 = vsel %vm4454_vm13, %v4456_v33, %v4452_v8 }
 0xb1c   :  { %v4483_v12 = vpop.f32.mrf.mxu3 }
 0xb1d   :  { %v4488_v27 = vmul.f32 %v4483_v12, %v4443_v36 }
 0xb1f   :  { %v4490_v28 = vrot.slane %v4488_v27, 4  ;;  %v4495_v31 = vperm.slane %v4488_v27, %v5257_v24 }
 0xb21   :  { %v4491_v53 = vsel %vm158_vm2, 0.0, %v4490_v28  ;;  %v4500_v60 = vrot.slane %v4495_v31, 4  ;;  %v4505_v5 = vperm.slane %v4495_v31, %v5282_v0 }
 0xb22   :  { %v4499_v44 = vperm.slane %v4491_v53, %v5257_v24 }
 0xb23   :  { %v4501_v22 = vsel %vm158_vm2, 0.0, %v4500_v60  ;;  %v4520_v17 = vrot.slane %v4505_v5, 4  ;;  %v4614_v9 = vadd.f32 %v7293_v25, %v4505_v5 }
 0xb24   :  { %v4509_v38 = vperm.slane %v4501_v22, %v5282_v0  ;;  %v4510_v56 = vrot.slane %v4499_v44, 4  ;;  %v4515_v42 = vperm.slane %v4499_v44, %v5282_v0  ;;  %v4485_v13 = vpop.f32.mrf.mxu3 }
 0xb25   :  { %v4521_v16 = vsel %vm158_vm2, 0.0, %v4520_v17  ;;  %v4489_v50 = vmul.f32 %v4485_v13, %v4457_v61 }
 0xb26   :  { %v4511_v52 = vsel %vm158_vm2, 0.0, %v4510_v56  ;;  %v4522_v4 = vrot.slane %v4509_v38, 4  ;;  %v4524_v15 = vrot.slane %v4515_v42, 4  ;;  %v4615_v18 = vadd.f32 %v7295_v63, %v4521_v16 }
 0xb27   :  { %v4519_v1 = vperm.slane %v4511_v52, %v5282_v0  ;;  %v4616_v6 = vadd.f32 %v7305_v11, %v4509_v38  ;;  %v4618_v21 = vadd.f32 %v4575_v3, %v4515_v42  ;;  %v4528_v43 = vrot.slane %v4489_v50, 4 }
 0xb28   :  { %v4523_v32 = vsel %vm158_vm2, 0.0, %v4522_v4  ;;  %v4525_v7 = vsel %vm158_vm2, 0.0, %v4524_v15  ;;  %v4646_v48 = vrot.slane %v4615_v18, 7  ;;  %v4533_v25 = vperm.slane %v4489_v50, %v5257_v24  ;;  %v4597_v50 = vpop.permute.xlu2 %4596 }
 0xb29   :  { %v4526_v41 = vrot.slane %v4519_v1, 4  ;;  %v4617_v58 = vadd.f32 %v7311_v30, %v4523_v32  ;;  %v4619_v39 = vadd.f32 %v7307_v2, %v4525_v7  ;;  %v4620_v63 = vadd.f32 %v7303_v55, %v4519_v1 }
 0xb2a   :  { %v4648_v54 = vsel %vm4647_vm14, %v4646_v48, %v4614_v9  ;;  %v4649_v10 = vrot.slane %v4616_v6, 6  ;;  %v4529_v11 = vsel %vm158_vm2, 0.0, %v4528_v43  ;;  %v4655_v47 = vrot.slane %v4618_v21, 4 }
 0xb2b   :  { %v4527_v49 = vsel %vm158_vm2, 0.0, %v4526_v41  ;;  %v4652_v34 = vrot.slane %v4617_v58, 5  ;;  %v4537_v30 = vperm.slane %v4529_v11, %v5257_v24  ;;  %v4538_v2 = vrot.slane %v4533_v25, 4 }
 0xb2c   :  { %v4621_v23 = vadd.f32 %v4581_v62, %v4527_v49  ;;  %v4651_v3 = vsel %vm4650_vm15, %v4649_v10, %v4648_v54  ;;  %v4658_v40 = vrot.slane %v4619_v39, 3  ;;  %v4661_v46 = vrot.slane %v4620_v63, 2 }
 0xb2d   :  { %v4654_v55 = vsel %vm4653_vm4, %v4652_v34, %v4651_v3  ;;  %v4543_v35 = vperm.slane %v4533_v25, %v5282_v0  ;;  %v4539_v36 = vsel %vm158_vm2, 0.0, %v4538_v2  ;;  %v4548_v12 = vrot.slane %v4537_v30, 4 }
 0xb2e   :  { %v4657_v45 = vsel %vm4656_vm5, %v4655_v47, %v4654_v55  ;;  %v4664_v57 = vrot.slane %v4621_v23, 1  ;;  %v4547_v27 = vperm.slane %v4539_v36, %v5282_v0  ;;  %v4553_v51 = vperm.slane %v4537_v30, %v5282_v0 }
 0xb2f   :  { %v4660_v59 = vsel %vm4659_vm3, %v4658_v40, %v4657_v45  ;;  %v4558_v24 = vrot.slane %v4543_v35, 4  ;;  %v4549_v28 = vsel %vm158_vm2, 0.0, %v4548_v12  ;;  %v4622_v5 = vadd.f32 %v7301_v20, %v4543_v35 }
 0xb30   :  { %v4663_v31 = vsel %vm4662_vm6, %v4661_v46, %v4660_v59  ;;  %v4557_v8 = vperm.slane %v4549_v28, %v5282_v0  ;;  %v4560_v53 = vrot.slane %v4547_v27, 4  ;;  %v4562_v60 = vrot.slane %v4553_v51, 4  ;;  %v4595_v0 = vpop.permute.xlu0 %4594 }
 0xb31   :  { %v4559_v33 = vsel %vm158_vm2, 0.0, %v4558_v24  ;;  %v4624_v61 = vadd.f32 %v7309_v37, %v4547_v27  ;;  %v4666_v22 = vsel %vm4665_vm7, %v4664_v57, %v4663_v31  ;;  %v4626_v42 = vadd.f32 %v7297_v29, %v4553_v51 }
 0xb32   :  { %v4623_v44 = vadd.f32 %v7299_v14, %v4559_v33  ;;  %v4561_v17 = vsel %vm158_vm2, 0.0, %v4560_v53  ;;  %v4563_v38 = vsel %vm158_vm2, 0.0, %v4562_v60  ;;  %v4564_v56 = vrot.slane %v4557_v8, 4 }
 0xb33   :  { %v4625_v13 = vadd.f32 %v7313_v26, %v4561_v17  ;;  %v4627_v16 = vadd.f32 %v7316_v19, %v4563_v38  ;;  %v4669_v20 = vrot.slane %v4624_v61, 6  ;;  %v4628_v37 = vadd.f32 %v4595_v0, %v4557_v8 }
 0xb34   :  { %v4667_v9 = vrot.slane %v4623_v44, 7  ;;  %v4565_v14 = vsel %vm158_vm2, 0.0, %v4564_v56  ;;  %v4683_v52 = vsel %vm80_vm1, %v4666_v22, 0.0  ;;  %v4673_v1 = vrot.slane %v4626_v42, 4 }
 0xb35   :  { %v4629_v4 = vadd.f32 %v4597_v50, %v4565_v14  ;;  %v4671_v18 = vrot.slane %v4625_v13, 5  ;;  %4685 = vst [vmem:[#allocation7] sm:$0xff] %v4683_v52  ;;  %v4675_v6 = vrot.slane %v4627_v16, 3  ;;  %v4677_v43 = vrot.slane %v4628_v37, 2 }
 0xb36   :  { %v4668_v15 = vsel %vm4647_vm14, %v4667_v9, %v4622_v5 }
 0xb37   :  { %v4670_v29 = vsel %vm4650_vm15, %v4669_v20, %v4668_v15  ;;  %v4679_v19 = vrot.slane %v4629_v4, 1 }
 0xb38   :  { %v4672_v26 = vsel %vm4653_vm4, %v4671_v18, %v4670_v29 }
 0xb39   :  { %v4674_v21 = vsel %vm4656_vm5, %v4673_v1, %v4672_v26 }
 0xb3a   :  { %v4676_v32 = vsel %vm4659_vm3, %v4675_v6, %v4674_v21 }
 0xb3b   :  { %v4678_v7 = vsel %vm4662_vm6, %v4677_v43, %v4676_v32 }
 0xb3c   :  { %v4680_v48 = vsel %vm4665_vm7, %v4679_v19, %v4678_v7 }
 0xb3d   :  { %v4684_v25 = vsel %vm80_vm1, %v4680_v48, 0.0 }
 0xb3e   :  { %4686 = vst [vmem:[#allocation7 + $0x8] sm:$0xff] %v4684_v25 }
 0xb3f   :  { %4699 = dma.vmem_to_hbm [thread:$0]  %s4692_s21, 256, %s4694_s20, [#allocation4], %s5154_s0, %s5154_s0, %s5148_s10  }
 0xb40   :  { %5132 = dma.done.wait [#allocation4], 256  }
 0xb41   :  { %5133 = vsyncadd [#allocation4], 4294967040 }
 0xb42   :  { %4704 = vsyncpa [#allocation3], 1 }
 0xb43   :  { %4705 = vsyncpa [#allocation6], 1 }
 0xb44   :  { %4706 = vsyncpa [#allocation4], 1 }

</bundles_post_ra>
